<compile_context>
chip_gen: v7x
topology: tpu7x:2x2x1
jax: 0.10.0
libtpu: 0.0.40
codegen_flags: <defaults>
</compile_context>

<pallas_src>
import functools

import jax
import jax.numpy as jnp
from jax.experimental import pallas as pl
from jax.experimental.pallas import tpu as pltpu


def _spatial_attention_kernel(x_ref, w_ref, out_ref, apad_ref, mpad_ref, *,
                              C, H, W, ksize):
    """One grid step processes BT batch elements.

    x_ref:     (BT, C, H, W)      input tile                         [VMEM]
    w_ref:     (2*k*k,)           conv weight, flat (ci, dy, dx)     [SMEM]
    out_ref:   (BT, H, W)         sigmoid(conv) output tile          [VMEM]
    *_pad_ref: (BT, H+2p, W+2p)   zero-padded pooled planes          [VMEM scratch]
    """
    k = ksize
    p = k // 2
    BT = x_ref.shape[0]
    Wp = W + 2 * p
    f32 = jnp.float32

    # ---- channel mean / max (unrolled over static C -> pure VPU, no XLU) ----
    # Per-channel ref loads keep the live value set small; bf16 inputs stay
    # bf16 over HBM and are widened to f32 here.
    xc = x_ref[:, 0, :, :].astype(f32)                       # (BT, H, W)
    s = xc
    mx = xc
    for c in range(1, C):
        xc = x_ref[:, c, :, :].astype(f32)
        s = s + xc
        mx = jnp.maximum(mx, xc)
    avg = s * (1.0 / C)

    # ---- stage zero-padded pooled planes in VMEM scratch ---------------------
    # Write the interior and zero ONLY the p-wide border (never overwritten),
    # instead of zero-filling the whole plane every step.  Done unconditionally
    # so it stays correct when the batch axis is sharded across TensorCores.
    zrow = jnp.zeros((BT, p, Wp), f32)
    zcol = jnp.zeros((BT, H, p), f32)
    for pooled, pad_ref in ((avg, apad_ref), (mx, mpad_ref)):
        pad_ref[:, 0:p, :] = zrow                            # top border
        pad_ref[:, p + H:p + H + p, :] = zrow                # bottom border
        pad_ref[:, p:p + H, 0:p] = zcol                      # left border
        pad_ref[:, p:p + H, p + W:p + W + p] = zcol          # right border
        pad_ref[:, p:p + H, p:p + W] = pooled                # interior

    # ---- k x k conv, 2 in-channels -> 1 out-channel, 'same', no bias ---------
    # One lane-offset slice per (channel, dx) pair (14 total) is hoisted out of
    # the dy loop; the dy taps are sublane-only slices of that value.  Four
    # independent partial accumulators break the serial FMA chain.
    parts = [jnp.zeros((BT, H, W), f32) for _ in range(4)]
    for ci, pad_ref in enumerate((apad_ref, mpad_ref)):      # ci=0: avg, ci=1: max
        for dx in range(k):
            col = pad_ref[:, :, dx:dx + W]                   # (BT, H+2p, W)
            for dy in range(k):
                wgt = w_ref[(ci * k + dy) * k + dx]          # SMEM scalar read
                j = 2 * ci + (dy & 1)
                parts[j] = parts[j] + wgt * col[:, dy:dy + H, :]
    acc = (parts[0] + parts[1]) + (parts[2] + parts[3])

    # ---- sigmoid via tanh (EUP transcendental, no VPU divide) ----------------
    out_ref[...] = (0.5 * jnp.tanh(0.5 * acc) + 0.5).astype(out_ref.dtype)


def _pick_block_batch(B, cap=4):
    """Batch elements per grid step.

    Amortizes per-step overhead over several elements, but keeps >= 2 grid
    steps when B >= 2 so both v7x TensorCores receive work, and caps BT so the
    partial accumulators + hoisted conv slices stay within the register file.
    Always returns a divisor of B (no ragged last block).
    """
    cap = min(cap, max(1, B // 2))
    for bt in range(cap, 0, -1):
        if B % bt == 0:
            return bt
    return 1


def spatial_attention_forward(x_nchw, weight_oihw, block_batch=None):
    """x: (B, C, H, W), weight: (1, 2, k, k) PyTorch layout -> (B, 1, H, W)."""
    B, C, H, W = x_nchw.shape
    ksize = int(weight_oihw.shape[-1])
    p = ksize // 2
    BT = block_batch if block_batch is not None else _pick_block_batch(B)
    assert B % BT == 0, "block_batch must divide the batch size"

    w_flat = weight_oihw.reshape(-1).astype(jnp.float32)     # (2*k*k,) -> SMEM

    kernel = functools.partial(
        _spatial_attention_kernel, C=C, H=H, W=W, ksize=ksize)

    out = pl.pallas_call(
        kernel,
        # Channel-1 dim dropped: each element's H*W slab is contiguous in HBM;
        # the (B,1,H,W) module shape is restored by a free reshape below.
        out_shape=jax.ShapeDtypeStruct((B, H, W), jnp.float32),
        grid=(B // BT,),
        in_specs=[
            pl.BlockSpec((BT, C, H, W), lambda i: (i, 0, 0, 0)),
            pl.BlockSpec(memory_space=pltpu.MemorySpace.SMEM),
        ],
        out_specs=pl.BlockSpec((BT, H, W), lambda i: (i, 0, 0)),
        scratch_shapes=[
            pltpu.VMEM((BT, H + 2 * p, W + 2 * p), jnp.float32),
            pltpu.VMEM((BT, H + 2 * p, W + 2 * p), jnp.float32),
        ],
        compiler_params=pltpu.CompilerParams(
            dimension_semantics=("parallel",)),
    )(x_nchw, w_flat)
    return out.reshape(B, 1, H, W)


def spatial_attention_reference(x, weight_oihw):
    """Pure-JAX reference matching the PyTorch module."""
    avg = jnp.mean(x, axis=1, keepdims=True)
    mx = jnp.max(x, axis=1, keepdims=True)
    cat = jnp.concatenate([avg, mx], axis=1)                  # (B, 2, H, W)
    k = weight_oihw.shape[-1]
    p = k // 2
    z = jax.lax.conv_general_dilated(
        cat, weight_oihw, window_strides=(1, 1), padding=((p, p), (p, p)),
        dimension_numbers=("NCHW", "OIHW", "NCHW"))
    return jax.nn.sigmoid(z)


if __name__ == "__main__":
    B, C, H, W, KSIZE = 2, 4, 16, 16, 7
    key = jax.random.PRNGKey(0)
    kx, kw = jax.random.split(key)
    x = jax.random.normal(kx, (B, C, H, W), jnp.float32)
    weight = 0.3 * jax.random.normal(kw, (1, 2, KSIZE, KSIZE), jnp.float32)

    out = spatial_attention_forward(x, weight)
    out = jax.block_until_ready(out)

    ref = spatial_attention_reference(x, weight)
    assert out.shape == ref.shape == (B, 1, H, W)
    max_err = float(jnp.max(jnp.abs(out - ref)))
    if not jnp.allclose(out, ref, rtol=1e-4, atol=1e-4):
        raise AssertionError(f"mismatch vs reference, max abs err = {max_err}")
    print("KERNEL_OK")
</pallas_src>

<mosaic_0001>
module attributes {stable_mosaic.version = 11 : i64} {
  func.func @_spatial_attention_kernel(%arg0: i32, %arg1: memref<1x4x16x16xf32, #tpu.memory_space<vmem>>, %arg2: memref<98xf32, #tpu.memory_space<smem>>, %arg3: memref<1x16x16xf32, #tpu.memory_space<vmem>>, %arg4: memref<1x22x22xf32, #tpu.memory_space<vmem>>, %arg5: memref<1x22x22xf32, #tpu.memory_space<vmem>>) attributes {dimension_semantics = [#tpu.dimension_semantics<parallel>], iteration_bounds = array<i64: 2>, scalar_prefetch = 0 : i64, scratch_operands = 2 : i64, tpu.core_type = #tpu.core_type<tc>, window_params = [{transform_indices = @transform_0, window_bounds = array<i64: 1, 4, 16, 16>}, {transform_indices = @transform_1, window_bounds = array<i64: 98>}, {transform_indices = @transform_2, window_bounds = array<i64: 1, 16, 16>}]} {
    %c0 = arith.constant 0 : index
    %c0_0 = arith.constant 0 : index
    %c0_1 = arith.constant 0 : index
    %c0_2 = arith.constant 0 : index
    %0 = vector.load %arg1[%c0, %c0_0, %c0_1, %c0_2] : memref<1x4x16x16xf32, #tpu.memory_space<vmem>>, vector<1x1x16x16xf32>
    %1 = vector.shape_cast %0 : vector<1x1x16x16xf32> to vector<1x16x16xf32>
    %c0_3 = arith.constant 0 : index
    %c1 = arith.constant 1 : index
    %c0_4 = arith.constant 0 : index
    %c0_5 = arith.constant 0 : index
    %2 = vector.load %arg1[%c0_3, %c1, %c0_4, %c0_5] : memref<1x4x16x16xf32, #tpu.memory_space<vmem>>, vector<1x1x16x16xf32>
    %3 = vector.shape_cast %2 : vector<1x1x16x16xf32> to vector<1x16x16xf32>
    %4 = arith.addf %1, %3 : vector<1x16x16xf32>
    %5 = arith.maximumf %1, %3 : vector<1x16x16xf32>
    %c0_6 = arith.constant 0 : index
    %c2 = arith.constant 2 : index
    %c0_7 = arith.constant 0 : index
    %c0_8 = arith.constant 0 : index
    %6 = vector.load %arg1[%c0_6, %c2, %c0_7, %c0_8] : memref<1x4x16x16xf32, #tpu.memory_space<vmem>>, vector<1x1x16x16xf32>
    %7 = vector.shape_cast %6 : vector<1x1x16x16xf32> to vector<1x16x16xf32>
    %8 = arith.addf %4, %7 : vector<1x16x16xf32>
    %9 = arith.maximumf %5, %7 : vector<1x16x16xf32>
    %c0_9 = arith.constant 0 : index
    %c3 = arith.constant 3 : index
    %c0_10 = arith.constant 0 : index
    %c0_11 = arith.constant 0 : index
    %10 = vector.load %arg1[%c0_9, %c3, %c0_10, %c0_11] : memref<1x4x16x16xf32, #tpu.memory_space<vmem>>, vector<1x1x16x16xf32>
    %11 = vector.shape_cast %10 : vector<1x1x16x16xf32> to vector<1x16x16xf32>
    %12 = arith.addf %8, %11 : vector<1x16x16xf32>
    %13 = arith.maximumf %9, %11 : vector<1x16x16xf32>
    %cst = arith.constant 2.500000e-01 : f32
    %14 = vector.broadcast %cst : f32 to vector<1x16x16xf32>
    %15 = arith.mulf %12, %14 : vector<1x16x16xf32>
    %cst_12 = arith.constant 0.000000e+00 : f32
    %16 = vector.broadcast %cst_12 : f32 to vector<1x3x22xf32>
    %cst_13 = arith.constant 0.000000e+00 : f32
    %17 = vector.broadcast %cst_13 : f32 to vector<1x16x3xf32>
    %c0_14 = arith.constant 0 : index
    %c0_15 = arith.constant 0 : index
    %c0_16 = arith.constant 0 : index
    %18 = vector.load %arg4[%c0_14, %c0_15, %c0_16] : memref<1x22x22xf32, #tpu.memory_space<vmem>>, vector<1x3x22xf32>
    tpu.vector_store %arg4[%c0_14, %c0_15, %c0_16], %16 {strides = array<i32>} : memref<1x22x22xf32, #tpu.memory_space<vmem>>, vector<1x3x22xf32>,
    %c0_17 = arith.constant 0 : index
    %c19 = arith.constant 19 : index
    %c0_18 = arith.constant 0 : index
    %19 = vector.load %arg4[%c0_17, %c19, %c0_18] : memref<1x22x22xf32, #tpu.memory_space<vmem>>, vector<1x3x22xf32>
    tpu.vector_store %arg4[%c0_17, %c19, %c0_18], %16 {strides = array<i32>} : memref<1x22x22xf32, #tpu.memory_space<vmem>>, vector<1x3x22xf32>,
    %c0_19 = arith.constant 0 : index
    %c3_20 = arith.constant 3 : index
    %c0_21 = arith.constant 0 : index
    %20 = vector.load %arg4[%c0_19, %c3_20, %c0_21] : memref<1x22x22xf32, #tpu.memory_space<vmem>>, vector<1x16x3xf32>
    tpu.vector_store %arg4[%c0_19, %c3_20, %c0_21], %17 {strides = array<i32>} : memref<1x22x22xf32, #tpu.memory_space<vmem>>, vector<1x16x3xf32>,
    %c0_22 = arith.constant 0 : index
    %c3_23 = arith.constant 3 : index
    %c19_24 = arith.constant 19 : index
    %21 = vector.load %arg4[%c0_22, %c3_23, %c19_24] : memref<1x22x22xf32, #tpu.memory_space<vmem>>, vector<1x16x3xf32>
    tpu.vector_store %arg4[%c0_22, %c3_23, %c19_24], %17 {strides = array<i32>} : memref<1x22x22xf32, #tpu.memory_space<vmem>>, vector<1x16x3xf32>,
    %c0_25 = arith.constant 0 : index
    %c3_26 = arith.constant 3 : index
    %c3_27 = arith.constant 3 : index
    %22 = vector.load %arg4[%c0_25, %c3_26, %c3_27] : memref<1x22x22xf32, #tpu.memory_space<vmem>>, vector<1x16x16xf32>
    tpu.vector_store %arg4[%c0_25, %c3_26, %c3_27], %15 {strides = array<i32>} : memref<1x22x22xf32, #tpu.memory_space<vmem>>, vector<1x16x16xf32>,
    %c0_28 = arith.constant 0 : index
    %c0_29 = arith.constant 0 : index
    %c0_30 = arith.constant 0 : index
    %23 = vector.load %arg5[%c0_28, %c0_29, %c0_30] : memref<1x22x22xf32, #tpu.memory_space<vmem>>, vector<1x3x22xf32>
    tpu.vector_store %arg5[%c0_28, %c0_29, %c0_30], %16 {strides = array<i32>} : memref<1x22x22xf32, #tpu.memory_space<vmem>>, vector<1x3x22xf32>,
    %c0_31 = arith.constant 0 : index
    %c19_32 = arith.constant 19 : index
    %c0_33 = arith.constant 0 : index
    %24 = vector.load %arg5[%c0_31, %c19_32, %c0_33] : memref<1x22x22xf32, #tpu.memory_space<vmem>>, vector<1x3x22xf32>
    tpu.vector_store %arg5[%c0_31, %c19_32, %c0_33], %16 {strides = array<i32>} : memref<1x22x22xf32, #tpu.memory_space<vmem>>, vector<1x3x22xf32>,
    %c0_34 = arith.constant 0 : index
    %c3_35 = arith.constant 3 : index
    %c0_36 = arith.constant 0 : index
    %25 = vector.load %arg5[%c0_34, %c3_35, %c0_36] : memref<1x22x22xf32, #tpu.memory_space<vmem>>, vector<1x16x3xf32>
    tpu.vector_store %arg5[%c0_34, %c3_35, %c0_36], %17 {strides = array<i32>} : memref<1x22x22xf32, #tpu.memory_space<vmem>>, vector<1x16x3xf32>,
    %c0_37 = arith.constant 0 : index
    %c3_38 = arith.constant 3 : index
    %c19_39 = arith.constant 19 : index
    %26 = vector.load %arg5[%c0_37, %c3_38, %c19_39] : memref<1x22x22xf32, #tpu.memory_space<vmem>>, vector<1x16x3xf32>
    tpu.vector_store %arg5[%c0_37, %c3_38, %c19_39], %17 {strides = array<i32>} : memref<1x22x22xf32, #tpu.memory_space<vmem>>, vector<1x16x3xf32>,
    %c0_40 = arith.constant 0 : index
    %c3_41 = arith.constant 3 : index
    %c3_42 = arith.constant 3 : index
    %27 = vector.load %arg5[%c0_40, %c3_41, %c3_42] : memref<1x22x22xf32, #tpu.memory_space<vmem>>, vector<1x16x16xf32>
    tpu.vector_store %arg5[%c0_40, %c3_41, %c3_42], %13 {strides = array<i32>} : memref<1x22x22xf32, #tpu.memory_space<vmem>>, vector<1x16x16xf32>,
    %cst_43 = arith.constant 0.000000e+00 : f32
    %28 = vector.broadcast %cst_43 : f32 to vector<1x16x16xf32>
    %cst_44 = arith.constant 0.000000e+00 : f32
    %29 = vector.broadcast %cst_44 : f32 to vector<1x16x16xf32>
    %cst_45 = arith.constant 0.000000e+00 : f32
    %30 = vector.broadcast %cst_45 : f32 to vector<1x16x16xf32>
    %cst_46 = arith.constant 0.000000e+00 : f32
    %31 = vector.broadcast %cst_46 : f32 to vector<1x16x16xf32>
    %c0_47 = arith.constant 0 : index
    %c0_48 = arith.constant 0 : index
    %c0_49 = arith.constant 0 : index
    %32 = vector.load %arg4[%c0_47, %c0_48, %c0_49] : memref<1x22x22xf32, #tpu.memory_space<vmem>>, vector<1x22x16xf32>
    %c0_50 = arith.constant 0 : index
    %33 = memref.load %arg2[%c0_50] : memref<98xf32, #tpu.memory_space<smem>>
    %34 = vector.extract_strided_slice %32 {offsets = [0, 0, 0], sizes = [1, 16, 16], strides = [1, 1, 1]} : vector<1x22x16xf32> to vector<1x16x16xf32>
    %35 = vector.broadcast %33 : f32 to vector<1x16x16xf32>
    %36 = arith.mulf %35, %34 : vector<1x16x16xf32>
    %37 = arith.addf %28, %36 : vector<1x16x16xf32>
    %c7 = arith.constant 7 : index
    %38 = memref.load %arg2[%c7] : memref<98xf32, #tpu.memory_space<smem>>
    %39 = vector.extract_strided_slice %32 {offsets = [0, 1, 0], sizes = [1, 16, 16], strides = [1, 1, 1]} : vector<1x22x16xf32> to vector<1x16x16xf32>
    %40 = vector.broadcast %38 : f32 to vector<1x16x16xf32>
    %41 = arith.mulf %40, %39 : vector<1x16x16xf32>
    %42 = arith.addf %29, %41 : vector<1x16x16xf32>
    %c14 = arith.constant 14 : index
    %43 = memref.load %arg2[%c14] : memref<98xf32, #tpu.memory_space<smem>>
    %44 = vector.extract_strided_slice %32 {offsets = [0, 2, 0], sizes = [1, 16, 16], strides = [1, 1, 1]} : vector<1x22x16xf32> to vector<1x16x16xf32>
    %45 = vector.broadcast %43 : f32 to vector<1x16x16xf32>
    %46 = arith.mulf %45, %44 : vector<1x16x16xf32>
    %47 = arith.addf %37, %46 : vector<1x16x16xf32>
    %c21 = arith.constant 21 : index
    %48 = memref.load %arg2[%c21] : memref<98xf32, #tpu.memory_space<smem>>
    %49 = vector.extract_strided_slice %32 {offsets = [0, 3, 0], sizes = [1, 16, 16], strides = [1, 1, 1]} : vector<1x22x16xf32> to vector<1x16x16xf32>
    %50 = vector.broadcast %48 : f32 to vector<1x16x16xf32>
    %51 = arith.mulf %50, %49 : vector<1x16x16xf32>
    %52 = arith.addf %42, %51 : vector<1x16x16xf32>
    %c28 = arith.constant 28 : index
    %53 = memref.load %arg2[%c28] : memref<98xf32, #tpu.memory_space<smem>>
    %54 = vector.extract_strided_slice %32 {offsets = [0, 4, 0], sizes = [1, 16, 16], strides = [1, 1, 1]} : vector<1x22x16xf32> to vector<1x16x16xf32>
    %55 = vector.broadcast %53 : f32 to vector<1x16x16xf32>
    %56 = arith.mulf %55, %54 : vector<1x16x16xf32>
    %57 = arith.addf %47, %56 : vector<1x16x16xf32>
    %c35 = arith.constant 35 : index
    %58 = memref.load %arg2[%c35] : memref<98xf32, #tpu.memory_space<smem>>
    %59 = vector.extract_strided_slice %32 {offsets = [0, 5, 0], sizes = [1, 16, 16], strides = [1, 1, 1]} : vector<1x22x16xf32> to vector<1x16x16xf32>
    %60 = vector.broadcast %58 : f32 to vector<1x16x16xf32>
    %61 = arith.mulf %60, %59 : vector<1x16x16xf32>
    %62 = arith.addf %52, %61 : vector<1x16x16xf32>
    %c42 = arith.constant 42 : index
    %63 = memref.load %arg2[%c42] : memref<98xf32, #tpu.memory_space<smem>>
    %64 = vector.extract_strided_slice %32 {offsets = [0, 6, 0], sizes = [1, 16, 16], strides = [1, 1, 1]} : vector<1x22x16xf32> to vector<1x16x16xf32>
    %65 = vector.broadcast %63 : f32 to vector<1x16x16xf32>
    %66 = arith.mulf %65, %64 : vector<1x16x16xf32>
    %67 = arith.addf %57, %66 : vector<1x16x16xf32>
    %c0_51 = arith.constant 0 : index
    %c0_52 = arith.constant 0 : index
    %c1_53 = arith.constant 1 : index
    %68 = vector.load %arg4[%c0_51, %c0_52, %c1_53] : memref<1x22x22xf32, #tpu.memory_space<vmem>>, vector<1x22x16xf32>
    %c1_54 = arith.constant 1 : index
    %69 = memref.load %arg2[%c1_54] : memref<98xf32, #tpu.memory_space<smem>>
    %70 = vector.extract_strided_slice %68 {offsets = [0, 0, 0], sizes = [1, 16, 16], strides = [1, 1, 1]} : vector<1x22x16xf32> to vector<1x16x16xf32>
    %71 = vector.broadcast %69 : f32 to vector<1x16x16xf32>
    %72 = arith.mulf %71, %70 : vector<1x16x16xf32>
    %73 = arith.addf %67, %72 : vector<1x16x16xf32>
    %c8 = arith.constant 8 : index
    %74 = memref.load %arg2[%c8] : memref<98xf32, #tpu.memory_space<smem>>
    %75 = vector.extract_strided_slice %68 {offsets = [0, 1, 0], sizes = [1, 16, 16], strides = [1, 1, 1]} : vector<1x22x16xf32> to vector<1x16x16xf32>
    %76 = vector.broadcast %74 : f32 to vector<1x16x16xf32>
    %77 = arith.mulf %76, %75 : vector<1x16x16xf32>
    %78 = arith.addf %62, %77 : vector<1x16x16xf32>
    %c15 = arith.constant 15 : index
    %79 = memref.load %arg2[%c15] : memref<98xf32, #tpu.memory_space<smem>>
    %80 = vector.extract_strided_slice %68 {offsets = [0, 2, 0], sizes = [1, 16, 16], strides = [1, 1, 1]} : vector<1x22x16xf32> to vector<1x16x16xf32>
    %81 = vector.broadcast %79 : f32 to vector<1x16x16xf32>
    %82 = arith.mulf %81, %80 : vector<1x16x16xf32>
    %83 = arith.addf %73, %82 : vector<1x16x16xf32>
    %c22 = arith.constant 22 : index
    %84 = memref.load %arg2[%c22] : memref<98xf32, #tpu.memory_space<smem>>
    %85 = vector.extract_strided_slice %68 {offsets = [0, 3, 0], sizes = [1, 16, 16], strides = [1, 1, 1]} : vector<1x22x16xf32> to vector<1x16x16xf32>
    %86 = vector.broadcast %84 : f32 to vector<1x16x16xf32>
    %87 = arith.mulf %86, %85 : vector<1x16x16xf32>
    %88 = arith.addf %78, %87 : vector<1x16x16xf32>
    %c29 = arith.constant 29 : index
    %89 = memref.load %arg2[%c29] : memref<98xf32, #tpu.memory_space<smem>>
    %90 = vector.extract_strided_slice %68 {offsets = [0, 4, 0], sizes = [1, 16, 16], strides = [1, 1, 1]} : vector<1x22x16xf32> to vector<1x16x16xf32>
    %91 = vector.broadcast %89 : f32 to vector<1x16x16xf32>
    %92 = arith.mulf %91, %90 : vector<1x16x16xf32>
    %93 = arith.addf %83, %92 : vector<1x16x16xf32>
    %c36 = arith.constant 36 : index
    %94 = memref.load %arg2[%c36] : memref<98xf32, #tpu.memory_space<smem>>
    %95 = vector.extract_strided_slice %68 {offsets = [0, 5, 0], sizes = [1, 16, 16], strides = [1, 1, 1]} : vector<1x22x16xf32> to vector<1x16x16xf32>
    %96 = vector.broadcast %94 : f32 to vector<1x16x16xf32>
    %97 = arith.mulf %96, %95 : vector<1x16x16xf32>
    %98 = arith.addf %88, %97 : vector<1x16x16xf32>
    %c43 = arith.constant 43 : index
    %99 = memref.load %arg2[%c43] : memref<98xf32, #tpu.memory_space<smem>>
    %100 = vector.extract_strided_slice %68 {offsets = [0, 6, 0], sizes = [1, 16, 16], strides = [1, 1, 1]} : vector<1x22x16xf32> to vector<1x16x16xf32>
    %101 = vector.broadcast %99 : f32 to vector<1x16x16xf32>
    %102 = arith.mulf %101, %100 : vector<1x16x16xf32>
    %103 = arith.addf %93, %102 : vector<1x16x16xf32>
    %c0_55 = arith.constant 0 : index
    %c0_56 = arith.constant 0 : index
    %c2_57 = arith.constant 2 : index
    %104 = vector.load %arg4[%c0_55, %c0_56, %c2_57] : memref<1x22x22xf32, #tpu.memory_space<vmem>>, vector<1x22x16xf32>
    %c2_58 = arith.constant 2 : index
    %105 = memref.load %arg2[%c2_58] : memref<98xf32, #tpu.memory_space<smem>>
    %106 = vector.extract_strided_slice %104 {offsets = [0, 0, 0], sizes = [1, 16, 16], strides = [1, 1, 1]} : vector<1x22x16xf32> to vector<1x16x16xf32>
    %107 = vector.broadcast %105 : f32 to vector<1x16x16xf32>
    %108 = arith.mulf %107, %106 : vector<1x16x16xf32>
    %109 = arith.addf %103, %108 : vector<1x16x16xf32>
    %c9 = arith.constant 9 : index
    %110 = memref.load %arg2[%c9] : memref<98xf32, #tpu.memory_space<smem>>
    %111 = vector.extract_strided_slice %104 {offsets = [0, 1, 0], sizes = [1, 16, 16], strides = [1, 1, 1]} : vector<1x22x16xf32> to vector<1x16x16xf32>
    %112 = vector.broadcast %110 : f32 to vector<1x16x16xf32>
    %113 = arith.mulf %112, %111 : vector<1x16x16xf32>
    %114 = arith.addf %98, %113 : vector<1x16x16xf32>
    %c16 = arith.constant 16 : index
    %115 = memref.load %arg2[%c16] : memref<98xf32, #tpu.memory_space<smem>>
    %116 = vector.extract_strided_slice %104 {offsets = [0, 2, 0], sizes = [1, 16, 16], strides = [1, 1, 1]} : vector<1x22x16xf32> to vector<1x16x16xf32>
    %117 = vector.broadcast %115 : f32 to vector<1x16x16xf32>
    %118 = arith.mulf %117, %116 : vector<1x16x16xf32>
    %119 = arith.addf %109, %118 : vector<1x16x16xf32>
    %c23 = arith.constant 23 : index
    %120 = memref.load %arg2[%c23] : memref<98xf32, #tpu.memory_space<smem>>
    %121 = vector.extract_strided_slice %104 {offsets = [0, 3, 0], sizes = [1, 16, 16], strides = [1, 1, 1]} : vector<1x22x16xf32> to vector<1x16x16xf32>
    %122 = vector.broadcast %120 : f32 to vector<1x16x16xf32>
    %123 = arith.mulf %122, %121 : vector<1x16x16xf32>
    %124 = arith.addf %114, %123 : vector<1x16x16xf32>
    %c30 = arith.constant 30 : index
    %125 = memref.load %arg2[%c30] : memref<98xf32, #tpu.memory_space<smem>>
    %126 = vector.extract_strided_slice %104 {offsets = [0, 4, 0], sizes = [1, 16, 16], strides = [1, 1, 1]} : vector<1x22x16xf32> to vector<1x16x16xf32>
    %127 = vector.broadcast %125 : f32 to vector<1x16x16xf32>
    %128 = arith.mulf %127, %126 : vector<1x16x16xf32>
    %129 = arith.addf %119, %128 : vector<1x16x16xf32>
    %c37 = arith.constant 37 : index
    %130 = memref.load %arg2[%c37] : memref<98xf32, #tpu.memory_space<smem>>
    %131 = vector.extract_strided_slice %104 {offsets = [0, 5, 0], sizes = [1, 16, 16], strides = [1, 1, 1]} : vector<1x22x16xf32> to vector<1x16x16xf32>
    %132 = vector.broadcast %130 : f32 to vector<1x16x16xf32>
    %133 = arith.mulf %132, %131 : vector<1x16x16xf32>
    %134 = arith.addf %124, %133 : vector<1x16x16xf32>
    %c44 = arith.constant 44 : index
    %135 = memref.load %arg2[%c44] : memref<98xf32, #tpu.memory_space<smem>>
    %136 = vector.extract_strided_slice %104 {offsets = [0, 6, 0], sizes = [1, 16, 16], strides = [1, 1, 1]} : vector<1x22x16xf32> to vector<1x16x16xf32>
    %137 = vector.broadcast %135 : f32 to vector<1x16x16xf32>
    %138 = arith.mulf %137, %136 : vector<1x16x16xf32>
    %139 = arith.addf %129, %138 : vector<1x16x16xf32>
    %c0_59 = arith.constant 0 : index
    %c0_60 = arith.constant 0 : index
    %c3_61 = arith.constant 3 : index
    %140 = vector.load %arg4[%c0_59, %c0_60, %c3_61] : memref<1x22x22xf32, #tpu.memory_space<vmem>>, vector<1x22x16xf32>
    %c3_62 = arith.constant 3 : index
    %141 = memref.load %arg2[%c3_62] : memref<98xf32, #tpu.memory_space<smem>>
    %142 = vector.extract_strided_slice %140 {offsets = [0, 0, 0], sizes = [1, 16, 16], strides = [1, 1, 1]} : vector<1x22x16xf32> to vector<1x16x16xf32>
    %143 = vector.broadcast %141 : f32 to vector<1x16x16xf32>
    %144 = arith.mulf %143, %142 : vector<1x16x16xf32>
    %145 = arith.addf %139, %144 : vector<1x16x16xf32>
    %c10 = arith.constant 10 : index
    %146 = memref.load %arg2[%c10] : memref<98xf32, #tpu.memory_space<smem>>
    %147 = vector.extract_strided_slice %140 {offsets = [0, 1, 0], sizes = [1, 16, 16], strides = [1, 1, 1]} : vector<1x22x16xf32> to vector<1x16x16xf32>
    %148 = vector.broadcast %146 : f32 to vector<1x16x16xf32>
    %149 = arith.mulf %148, %147 : vector<1x16x16xf32>
    %150 = arith.addf %134, %149 : vector<1x16x16xf32>
    %c17 = arith.constant 17 : index
    %151 = memref.load %arg2[%c17] : memref<98xf32, #tpu.memory_space<smem>>
    %152 = vector.extract_strided_slice %140 {offsets = [0, 2, 0], sizes = [1, 16, 16], strides = [1, 1, 1]} : vector<1x22x16xf32> to vector<1x16x16xf32>
    %153 = vector.broadcast %151 : f32 to vector<1x16x16xf32>
    %154 = arith.mulf %153, %152 : vector<1x16x16xf32>
    %155 = arith.addf %145, %154 : vector<1x16x16xf32>
    %c24 = arith.constant 24 : index
    %156 = memref.load %arg2[%c24] : memref<98xf32, #tpu.memory_space<smem>>
    %157 = vector.extract_strided_slice %140 {offsets = [0, 3, 0], sizes = [1, 16, 16], strides = [1, 1, 1]} : vector<1x22x16xf32> to vector<1x16x16xf32>
    %158 = vector.broadcast %156 : f32 to vector<1x16x16xf32>
    %159 = arith.mulf %158, %157 : vector<1x16x16xf32>
    %160 = arith.addf %150, %159 : vector<1x16x16xf32>
    %c31 = arith.constant 31 : index
    %161 = memref.load %arg2[%c31] : memref<98xf32, #tpu.memory_space<smem>>
    %162 = vector.extract_strided_slice %140 {offsets = [0, 4, 0], sizes = [1, 16, 16], strides = [1, 1, 1]} : vector<1x22x16xf32> to vector<1x16x16xf32>
    %163 = vector.broadcast %161 : f32 to vector<1x16x16xf32>
    %164 = arith.mulf %163, %162 : vector<1x16x16xf32>
    %165 = arith.addf %155, %164 : vector<1x16x16xf32>
    %c38 = arith.constant 38 : index
    %166 = memref.load %arg2[%c38] : memref<98xf32, #tpu.memory_space<smem>>
    %167 = vector.extract_strided_slice %140 {offsets = [0, 5, 0], sizes = [1, 16, 16], strides = [1, 1, 1]} : vector<1x22x16xf32> to vector<1x16x16xf32>
    %168 = vector.broadcast %166 : f32 to vector<1x16x16xf32>
    %169 = arith.mulf %168, %167 : vector<1x16x16xf32>
    %170 = arith.addf %160, %169 : vector<1x16x16xf32>
    %c45 = arith.constant 45 : index
    %171 = memref.load %arg2[%c45] : memref<98xf32, #tpu.memory_space<smem>>
    %172 = vector.extract_strided_slice %140 {offsets = [0, 6, 0], sizes = [1, 16, 16], strides = [1, 1, 1]} : vector<1x22x16xf32> to vector<1x16x16xf32>
    %173 = vector.broadcast %171 : f32 to vector<1x16x16xf32>
    %174 = arith.mulf %173, %172 : vector<1x16x16xf32>
    %175 = arith.addf %165, %174 : vector<1x16x16xf32>
    %c0_63 = arith.constant 0 : index
    %c0_64 = arith.constant 0 : index
    %c4 = arith.constant 4 : index
    %176 = vector.load %arg4[%c0_63, %c0_64, %c4] : memref<1x22x22xf32, #tpu.memory_space<vmem>>, vector<1x22x16xf32>
    %c4_65 = arith.constant 4 : index
    %177 = memref.load %arg2[%c4_65] : memref<98xf32, #tpu.memory_space<smem>>
    %178 = vector.extract_strided_slice %176 {offsets = [0, 0, 0], sizes = [1, 16, 16], strides = [1, 1, 1]} : vector<1x22x16xf32> to vector<1x16x16xf32>
    %179 = vector.broadcast %177 : f32 to vector<1x16x16xf32>
    %180 = arith.mulf %179, %178 : vector<1x16x16xf32>
    %181 = arith.addf %175, %180 : vector<1x16x16xf32>
    %c11 = arith.constant 11 : index
    %182 = memref.load %arg2[%c11] : memref<98xf32, #tpu.memory_space<smem>>
    %183 = vector.extract_strided_slice %176 {offsets = [0, 1, 0], sizes = [1, 16, 16], strides = [1, 1, 1]} : vector<1x22x16xf32> to vector<1x16x16xf32>
    %184 = vector.broadcast %182 : f32 to vector<1x16x16xf32>
    %185 = arith.mulf %184, %183 : vector<1x16x16xf32>
    %186 = arith.addf %170, %185 : vector<1x16x16xf32>
    %c18 = arith.constant 18 : index
    %187 = memref.load %arg2[%c18] : memref<98xf32, #tpu.memory_space<smem>>
    %188 = vector.extract_strided_slice %176 {offsets = [0, 2, 0], sizes = [1, 16, 16], strides = [1, 1, 1]} : vector<1x22x16xf32> to vector<1x16x16xf32>
    %189 = vector.broadcast %187 : f32 to vector<1x16x16xf32>
    %190 = arith.mulf %189, %188 : vector<1x16x16xf32>
    %191 = arith.addf %181, %190 : vector<1x16x16xf32>
    %c25 = arith.constant 25 : index
    %192 = memref.load %arg2[%c25] : memref<98xf32, #tpu.memory_space<smem>>
    %193 = vector.extract_strided_slice %176 {offsets = [0, 3, 0], sizes = [1, 16, 16], strides = [1, 1, 1]} : vector<1x22x16xf32> to vector<1x16x16xf32>
    %194 = vector.broadcast %192 : f32 to vector<1x16x16xf32>
    %195 = arith.mulf %194, %193 : vector<1x16x16xf32>
    %196 = arith.addf %186, %195 : vector<1x16x16xf32>
    %c32 = arith.constant 32 : index
    %197 = memref.load %arg2[%c32] : memref<98xf32, #tpu.memory_space<smem>>
    %198 = vector.extract_strided_slice %176 {offsets = [0, 4, 0], sizes = [1, 16, 16], strides = [1, 1, 1]} : vector<1x22x16xf32> to vector<1x16x16xf32>
    %199 = vector.broadcast %197 : f32 to vector<1x16x16xf32>
    %200 = arith.mulf %199, %198 : vector<1x16x16xf32>
    %201 = arith.addf %191, %200 : vector<1x16x16xf32>
    %c39 = arith.constant 39 : index
    %202 = memref.load %arg2[%c39] : memref<98xf32, #tpu.memory_space<smem>>
    %203 = vector.extract_strided_slice %176 {offsets = [0, 5, 0], sizes = [1, 16, 16], strides = [1, 1, 1]} : vector<1x22x16xf32> to vector<1x16x16xf32>
    %204 = vector.broadcast %202 : f32 to vector<1x16x16xf32>
    %205 = arith.mulf %204, %203 : vector<1x16x16xf32>
    %206 = arith.addf %196, %205 : vector<1x16x16xf32>
    %c46 = arith.constant 46 : index
    %207 = memref.load %arg2[%c46] : memref<98xf32, #tpu.memory_space<smem>>
    %208 = vector.extract_strided_slice %176 {offsets = [0, 6, 0], sizes = [1, 16, 16], strides = [1, 1, 1]} : vector<1x22x16xf32> to vector<1x16x16xf32>
    %209 = vector.broadcast %207 : f32 to vector<1x16x16xf32>
    %210 = arith.mulf %209, %208 : vector<1x16x16xf32>
    %211 = arith.addf %201, %210 : vector<1x16x16xf32>
    %c0_66 = arith.constant 0 : index
    %c0_67 = arith.constant 0 : index
    %c5 = arith.constant 5 : index
    %212 = vector.load %arg4[%c0_66, %c0_67, %c5] : memref<1x22x22xf32, #tpu.memory_space<vmem>>, vector<1x22x16xf32>
    %c5_68 = arith.constant 5 : index
    %213 = memref.load %arg2[%c5_68] : memref<98xf32, #tpu.memory_space<smem>>
    %214 = vector.extract_strided_slice %212 {offsets = [0, 0, 0], sizes = [1, 16, 16], strides = [1, 1, 1]} : vector<1x22x16xf32> to vector<1x16x16xf32>
    %215 = vector.broadcast %213 : f32 to vector<1x16x16xf32>
    %216 = arith.mulf %215, %214 : vector<1x16x16xf32>
    %217 = arith.addf %211, %216 : vector<1x16x16xf32>
    %c12 = arith.constant 12 : index
    %218 = memref.load %arg2[%c12] : memref<98xf32, #tpu.memory_space<smem>>
    %219 = vector.extract_strided_slice %212 {offsets = [0, 1, 0], sizes = [1, 16, 16], strides = [1, 1, 1]} : vector<1x22x16xf32> to vector<1x16x16xf32>
    %220 = vector.broadcast %218 : f32 to vector<1x16x16xf32>
    %221 = arith.mulf %220, %219 : vector<1x16x16xf32>
    %222 = arith.addf %206, %221 : vector<1x16x16xf32>
    %c19_69 = arith.constant 19 : index
    %223 = memref.load %arg2[%c19_69] : memref<98xf32, #tpu.memory_space<smem>>
    %224 = vector.extract_strided_slice %212 {offsets = [0, 2, 0], sizes = [1, 16, 16], strides = [1, 1, 1]} : vector<1x22x16xf32> to vector<1x16x16xf32>
    %225 = vector.broadcast %223 : f32 to vector<1x16x16xf32>
    %226 = arith.mulf %225, %224 : vector<1x16x16xf32>
    %227 = arith.addf %217, %226 : vector<1x16x16xf32>
    %c26 = arith.constant 26 : index
    %228 = memref.load %arg2[%c26] : memref<98xf32, #tpu.memory_space<smem>>
    %229 = vector.extract_strided_slice %212 {offsets = [0, 3, 0], sizes = [1, 16, 16], strides = [1, 1, 1]} : vector<1x22x16xf32> to vector<1x16x16xf32>
    %230 = vector.broadcast %228 : f32 to vector<1x16x16xf32>
    %231 = arith.mulf %230, %229 : vector<1x16x16xf32>
    %232 = arith.addf %222, %231 : vector<1x16x16xf32>
    %c33 = arith.constant 33 : index
    %233 = memref.load %arg2[%c33] : memref<98xf32, #tpu.memory_space<smem>>
    %234 = vector.extract_strided_slice %212 {offsets = [0, 4, 0], sizes = [1, 16, 16], strides = [1, 1, 1]} : vector<1x22x16xf32> to vector<1x16x16xf32>
    %235 = vector.broadcast %233 : f32 to vector<1x16x16xf32>
    %236 = arith.mulf %235, %234 : vector<1x16x16xf32>
    %237 = arith.addf %227, %236 : vector<1x16x16xf32>
    %c40 = arith.constant 40 : index
    %238 = memref.load %arg2[%c40] : memref<98xf32, #tpu.memory_space<smem>>
    %239 = vector.extract_strided_slice %212 {offsets = [0, 5, 0], sizes = [1, 16, 16], strides = [1, 1, 1]} : vector<1x22x16xf32> to vector<1x16x16xf32>
    %240 = vector.broadcast %238 : f32 to vector<1x16x16xf32>
    %241 = arith.mulf %240, %239 : vector<1x16x16xf32>
    %242 = arith.addf %232, %241 : vector<1x16x16xf32>
    %c47 = arith.constant 47 : index
    %243 = memref.load %arg2[%c47] : memref<98xf32, #tpu.memory_space<smem>>
    %244 = vector.extract_strided_slice %212 {offsets = [0, 6, 0], sizes = [1, 16, 16], strides = [1, 1, 1]} : vector<1x22x16xf32> to vector<1x16x16xf32>
    %245 = vector.broadcast %243 : f32 to vector<1x16x16xf32>
    %246 = arith.mulf %245, %244 : vector<1x16x16xf32>
    %247 = arith.addf %237, %246 : vector<1x16x16xf32>
    %c0_70 = arith.constant 0 : index
    %c0_71 = arith.constant 0 : index
    %c6 = arith.constant 6 : index
    %248 = vector.load %arg4[%c0_70, %c0_71, %c6] : memref<1x22x22xf32, #tpu.memory_space<vmem>>, vector<1x22x16xf32>
    %c6_72 = arith.constant 6 : index
    %249 = memref.load %arg2[%c6_72] : memref<98xf32, #tpu.memory_space<smem>>
    %250 = vector.extract_strided_slice %248 {offsets = [0, 0, 0], sizes = [1, 16, 16], strides = [1, 1, 1]} : vector<1x22x16xf32> to vector<1x16x16xf32>
    %251 = vector.broadcast %249 : f32 to vector<1x16x16xf32>
    %252 = arith.mulf %251, %250 : vector<1x16x16xf32>
    %253 = arith.addf %247, %252 : vector<1x16x16xf32>
    %c13 = arith.constant 13 : index
    %254 = memref.load %arg2[%c13] : memref<98xf32, #tpu.memory_space<smem>>
    %255 = vector.extract_strided_slice %248 {offsets = [0, 1, 0], sizes = [1, 16, 16], strides = [1, 1, 1]} : vector<1x22x16xf32> to vector<1x16x16xf32>
    %256 = vector.broadcast %254 : f32 to vector<1x16x16xf32>
    %257 = arith.mulf %256, %255 : vector<1x16x16xf32>
    %258 = arith.addf %242, %257 : vector<1x16x16xf32>
    %c20 = arith.constant 20 : index
    %259 = memref.load %arg2[%c20] : memref<98xf32, #tpu.memory_space<smem>>
    %260 = vector.extract_strided_slice %248 {offsets = [0, 2, 0], sizes = [1, 16, 16], strides = [1, 1, 1]} : vector<1x22x16xf32> to vector<1x16x16xf32>
    %261 = vector.broadcast %259 : f32 to vector<1x16x16xf32>
    %262 = arith.mulf %261, %260 : vector<1x16x16xf32>
    %263 = arith.addf %253, %262 : vector<1x16x16xf32>
    %c27 = arith.constant 27 : index
    %264 = memref.load %arg2[%c27] : memref<98xf32, #tpu.memory_space<smem>>
    %265 = vector.extract_strided_slice %248 {offsets = [0, 3, 0], sizes = [1, 16, 16], strides = [1, 1, 1]} : vector<1x22x16xf32> to vector<1x16x16xf32>
    %266 = vector.broadcast %264 : f32 to vector<1x16x16xf32>
    %267 = arith.mulf %266, %265 : vector<1x16x16xf32>
    %268 = arith.addf %258, %267 : vector<1x16x16xf32>
    %c34 = arith.constant 34 : index
    %269 = memref.load %arg2[%c34] : memref<98xf32, #tpu.memory_space<smem>>
    %270 = vector.extract_strided_slice %248 {offsets = [0, 4, 0], sizes = [1, 16, 16], strides = [1, 1, 1]} : vector<1x22x16xf32> to vector<1x16x16xf32>
    %271 = vector.broadcast %269 : f32 to vector<1x16x16xf32>
    %272 = arith.mulf %271, %270 : vector<1x16x16xf32>
    %273 = arith.addf %263, %272 : vector<1x16x16xf32>
    %c41 = arith.constant 41 : index
    %274 = memref.load %arg2[%c41] : memref<98xf32, #tpu.memory_space<smem>>
    %275 = vector.extract_strided_slice %248 {offsets = [0, 5, 0], sizes = [1, 16, 16], strides = [1, 1, 1]} : vector<1x22x16xf32> to vector<1x16x16xf32>
    %276 = vector.broadcast %274 : f32 to vector<1x16x16xf32>
    %277 = arith.mulf %276, %275 : vector<1x16x16xf32>
    %278 = arith.addf %268, %277 : vector<1x16x16xf32>
    %c48 = arith.constant 48 : index
    %279 = memref.load %arg2[%c48] : memref<98xf32, #tpu.memory_space<smem>>
    %280 = vector.extract_strided_slice %248 {offsets = [0, 6, 0], sizes = [1, 16, 16], strides = [1, 1, 1]} : vector<1x22x16xf32> to vector<1x16x16xf32>
    %281 = vector.broadcast %279 : f32 to vector<1x16x16xf32>
    %282 = arith.mulf %281, %280 : vector<1x16x16xf32>
    %283 = arith.addf %273, %282 : vector<1x16x16xf32>
    %c0_73 = arith.constant 0 : index
    %c0_74 = arith.constant 0 : index
    %c0_75 = arith.constant 0 : index
    %284 = vector.load %arg5[%c0_73, %c0_74, %c0_75] : memref<1x22x22xf32, #tpu.memory_space<vmem>>, vector<1x22x16xf32>
    %c49 = arith.constant 49 : index
    %285 = memref.load %arg2[%c49] : memref<98xf32, #tpu.memory_space<smem>>
    %286 = vector.extract_strided_slice %284 {offsets = [0, 0, 0], sizes = [1, 16, 16], strides = [1, 1, 1]} : vector<1x22x16xf32> to vector<1x16x16xf32>
    %287 = vector.broadcast %285 : f32 to vector<1x16x16xf32>
    %288 = arith.mulf %287, %286 : vector<1x16x16xf32>
    %289 = arith.addf %30, %288 : vector<1x16x16xf32>
    %c56 = arith.constant 56 : index
    %290 = memref.load %arg2[%c56] : memref<98xf32, #tpu.memory_space<smem>>
    %291 = vector.extract_strided_slice %284 {offsets = [0, 1, 0], sizes = [1, 16, 16], strides = [1, 1, 1]} : vector<1x22x16xf32> to vector<1x16x16xf32>
    %292 = vector.broadcast %290 : f32 to vector<1x16x16xf32>
    %293 = arith.mulf %292, %291 : vector<1x16x16xf32>
    %294 = arith.addf %31, %293 : vector<1x16x16xf32>
    %c63 = arith.constant 63 : index
    %295 = memref.load %arg2[%c63] : memref<98xf32, #tpu.memory_space<smem>>
    %296 = vector.extract_strided_slice %284 {offsets = [0, 2, 0], sizes = [1, 16, 16], strides = [1, 1, 1]} : vector<1x22x16xf32> to vector<1x16x16xf32>
    %297 = vector.broadcast %295 : f32 to vector<1x16x16xf32>
    %298 = arith.mulf %297, %296 : vector<1x16x16xf32>
    %299 = arith.addf %289, %298 : vector<1x16x16xf32>
    %c70 = arith.constant 70 : index
    %300 = memref.load %arg2[%c70] : memref<98xf32, #tpu.memory_space<smem>>
    %301 = vector.extract_strided_slice %284 {offsets = [0, 3, 0], sizes = [1, 16, 16], strides = [1, 1, 1]} : vector<1x22x16xf32> to vector<1x16x16xf32>
    %302 = vector.broadcast %300 : f32 to vector<1x16x16xf32>
    %303 = arith.mulf %302, %301 : vector<1x16x16xf32>
    %304 = arith.addf %294, %303 : vector<1x16x16xf32>
    %c77 = arith.constant 77 : index
    %305 = memref.load %arg2[%c77] : memref<98xf32, #tpu.memory_space<smem>>
    %306 = vector.extract_strided_slice %284 {offsets = [0, 4, 0], sizes = [1, 16, 16], strides = [1, 1, 1]} : vector<1x22x16xf32> to vector<1x16x16xf32>
    %307 = vector.broadcast %305 : f32 to vector<1x16x16xf32>
    %308 = arith.mulf %307, %306 : vector<1x16x16xf32>
    %309 = arith.addf %299, %308 : vector<1x16x16xf32>
    %c84 = arith.constant 84 : index
    %310 = memref.load %arg2[%c84] : memref<98xf32, #tpu.memory_space<smem>>
    %311 = vector.extract_strided_slice %284 {offsets = [0, 5, 0], sizes = [1, 16, 16], strides = [1, 1, 1]} : vector<1x22x16xf32> to vector<1x16x16xf32>
    %312 = vector.broadcast %310 : f32 to vector<1x16x16xf32>
    %313 = arith.mulf %312, %311 : vector<1x16x16xf32>
    %314 = arith.addf %304, %313 : vector<1x16x16xf32>
    %c91 = arith.constant 91 : index
    %315 = memref.load %arg2[%c91] : memref<98xf32, #tpu.memory_space<smem>>
    %316 = vector.extract_strided_slice %284 {offsets = [0, 6, 0], sizes = [1, 16, 16], strides = [1, 1, 1]} : vector<1x22x16xf32> to vector<1x16x16xf32>
    %317 = vector.broadcast %315 : f32 to vector<1x16x16xf32>
    %318 = arith.mulf %317, %316 : vector<1x16x16xf32>
    %319 = arith.addf %309, %318 : vector<1x16x16xf32>
    %c0_76 = arith.constant 0 : index
    %c0_77 = arith.constant 0 : index
    %c1_78 = arith.constant 1 : index
    %320 = vector.load %arg5[%c0_76, %c0_77, %c1_78] : memref<1x22x22xf32, #tpu.memory_space<vmem>>, vector<1x22x16xf32>
    %c50 = arith.constant 50 : index
    %321 = memref.load %arg2[%c50] : memref<98xf32, #tpu.memory_space<smem>>
    %322 = vector.extract_strided_slice %320 {offsets = [0, 0, 0], sizes = [1, 16, 16], strides = [1, 1, 1]} : vector<1x22x16xf32> to vector<1x16x16xf32>
    %323 = vector.broadcast %321 : f32 to vector<1x16x16xf32>
    %324 = arith.mulf %323, %322 : vector<1x16x16xf32>
    %325 = arith.addf %319, %324 : vector<1x16x16xf32>
    %c57 = arith.constant 57 : index
    %326 = memref.load %arg2[%c57] : memref<98xf32, #tpu.memory_space<smem>>
    %327 = vector.extract_strided_slice %320 {offsets = [0, 1, 0], sizes = [1, 16, 16], strides = [1, 1, 1]} : vector<1x22x16xf32> to vector<1x16x16xf32>
    %328 = vector.broadcast %326 : f32 to vector<1x16x16xf32>
    %329 = arith.mulf %328, %327 : vector<1x16x16xf32>
    %330 = arith.addf %314, %329 : vector<1x16x16xf32>
    %c64 = arith.constant 64 : index
    %331 = memref.load %arg2[%c64] : memref<98xf32, #tpu.memory_space<smem>>
    %332 = vector.extract_strided_slice %320 {offsets = [0, 2, 0], sizes = [1, 16, 16], strides = [1, 1, 1]} : vector<1x22x16xf32> to vector<1x16x16xf32>
    %333 = vector.broadcast %331 : f32 to vector<1x16x16xf32>
    %334 = arith.mulf %333, %332 : vector<1x16x16xf32>
    %335 = arith.addf %325, %334 : vector<1x16x16xf32>
    %c71 = arith.constant 71 : index
    %336 = memref.load %arg2[%c71] : memref<98xf32, #tpu.memory_space<smem>>
    %337 = vector.extract_strided_slice %320 {offsets = [0, 3, 0], sizes = [1, 16, 16], strides = [1, 1, 1]} : vector<1x22x16xf32> to vector<1x16x16xf32>
    %338 = vector.broadcast %336 : f32 to vector<1x16x16xf32>
    %339 = arith.mulf %338, %337 : vector<1x16x16xf32>
    %340 = arith.addf %330, %339 : vector<1x16x16xf32>
    %c78 = arith.constant 78 : index
    %341 = memref.load %arg2[%c78] : memref<98xf32, #tpu.memory_space<smem>>
    %342 = vector.extract_strided_slice %320 {offsets = [0, 4, 0], sizes = [1, 16, 16], strides = [1, 1, 1]} : vector<1x22x16xf32> to vector<1x16x16xf32>
    %343 = vector.broadcast %341 : f32 to vector<1x16x16xf32>
    %344 = arith.mulf %343, %342 : vector<1x16x16xf32>
    %345 = arith.addf %335, %344 : vector<1x16x16xf32>
    %c85 = arith.constant 85 : index
    %346 = memref.load %arg2[%c85] : memref<98xf32, #tpu.memory_space<smem>>
    %347 = vector.extract_strided_slice %320 {offsets = [0, 5, 0], sizes = [1, 16, 16], strides = [1, 1, 1]} : vector<1x22x16xf32> to vector<1x16x16xf32>
    %348 = vector.broadcast %346 : f32 to vector<1x16x16xf32>
    %349 = arith.mulf %348, %347 : vector<1x16x16xf32>
    %350 = arith.addf %340, %349 : vector<1x16x16xf32>
    %c92 = arith.constant 92 : index
    %351 = memref.load %arg2[%c92] : memref<98xf32, #tpu.memory_space<smem>>
    %352 = vector.extract_strided_slice %320 {offsets = [0, 6, 0], sizes = [1, 16, 16], strides = [1, 1, 1]} : vector<1x22x16xf32> to vector<1x16x16xf32>
    %353 = vector.broadcast %351 : f32 to vector<1x16x16xf32>
    %354 = arith.mulf %353, %352 : vector<1x16x16xf32>
    %355 = arith.addf %345, %354 : vector<1x16x16xf32>
    %c0_79 = arith.constant 0 : index
    %c0_80 = arith.constant 0 : index
    %c2_81 = arith.constant 2 : index
    %356 = vector.load %arg5[%c0_79, %c0_80, %c2_81] : memref<1x22x22xf32, #tpu.memory_space<vmem>>, vector<1x22x16xf32>
    %c51 = arith.constant 51 : index
    %357 = memref.load %arg2[%c51] : memref<98xf32, #tpu.memory_space<smem>>
    %358 = vector.extract_strided_slice %356 {offsets = [0, 0, 0], sizes = [1, 16, 16], strides = [1, 1, 1]} : vector<1x22x16xf32> to vector<1x16x16xf32>
    %359 = vector.broadcast %357 : f32 to vector<1x16x16xf32>
    %360 = arith.mulf %359, %358 : vector<1x16x16xf32>
    %361 = arith.addf %355, %360 : vector<1x16x16xf32>
    %c58 = arith.constant 58 : index
    %362 = memref.load %arg2[%c58] : memref<98xf32, #tpu.memory_space<smem>>
    %363 = vector.extract_strided_slice %356 {offsets = [0, 1, 0], sizes = [1, 16, 16], strides = [1, 1, 1]} : vector<1x22x16xf32> to vector<1x16x16xf32>
    %364 = vector.broadcast %362 : f32 to vector<1x16x16xf32>
    %365 = arith.mulf %364, %363 : vector<1x16x16xf32>
    %366 = arith.addf %350, %365 : vector<1x16x16xf32>
    %c65 = arith.constant 65 : index
    %367 = memref.load %arg2[%c65] : memref<98xf32, #tpu.memory_space<smem>>
    %368 = vector.extract_strided_slice %356 {offsets = [0, 2, 0], sizes = [1, 16, 16], strides = [1, 1, 1]} : vector<1x22x16xf32> to vector<1x16x16xf32>
    %369 = vector.broadcast %367 : f32 to vector<1x16x16xf32>
    %370 = arith.mulf %369, %368 : vector<1x16x16xf32>
    %371 = arith.addf %361, %370 : vector<1x16x16xf32>
    %c72 = arith.constant 72 : index
    %372 = memref.load %arg2[%c72] : memref<98xf32, #tpu.memory_space<smem>>
    %373 = vector.extract_strided_slice %356 {offsets = [0, 3, 0], sizes = [1, 16, 16], strides = [1, 1, 1]} : vector<1x22x16xf32> to vector<1x16x16xf32>
    %374 = vector.broadcast %372 : f32 to vector<1x16x16xf32>
    %375 = arith.mulf %374, %373 : vector<1x16x16xf32>
    %376 = arith.addf %366, %375 : vector<1x16x16xf32>
    %c79 = arith.constant 79 : index
    %377 = memref.load %arg2[%c79] : memref<98xf32, #tpu.memory_space<smem>>
    %378 = vector.extract_strided_slice %356 {offsets = [0, 4, 0], sizes = [1, 16, 16], strides = [1, 1, 1]} : vector<1x22x16xf32> to vector<1x16x16xf32>
    %379 = vector.broadcast %377 : f32 to vector<1x16x16xf32>
    %380 = arith.mulf %379, %378 : vector<1x16x16xf32>
    %381 = arith.addf %371, %380 : vector<1x16x16xf32>
    %c86 = arith.constant 86 : index
    %382 = memref.load %arg2[%c86] : memref<98xf32, #tpu.memory_space<smem>>
    %383 = vector.extract_strided_slice %356 {offsets = [0, 5, 0], sizes = [1, 16, 16], strides = [1, 1, 1]} : vector<1x22x16xf32> to vector<1x16x16xf32>
    %384 = vector.broadcast %382 : f32 to vector<1x16x16xf32>
    %385 = arith.mulf %384, %383 : vector<1x16x16xf32>
    %386 = arith.addf %376, %385 : vector<1x16x16xf32>
    %c93 = arith.constant 93 : index
    %387 = memref.load %arg2[%c93] : memref<98xf32, #tpu.memory_space<smem>>
    %388 = vector.extract_strided_slice %356 {offsets = [0, 6, 0], sizes = [1, 16, 16], strides = [1, 1, 1]} : vector<1x22x16xf32> to vector<1x16x16xf32>
    %389 = vector.broadcast %387 : f32 to vector<1x16x16xf32>
    %390 = arith.mulf %389, %388 : vector<1x16x16xf32>
    %391 = arith.addf %381, %390 : vector<1x16x16xf32>
    %c0_82 = arith.constant 0 : index
    %c0_83 = arith.constant 0 : index
    %c3_84 = arith.constant 3 : index
    %392 = vector.load %arg5[%c0_82, %c0_83, %c3_84] : memref<1x22x22xf32, #tpu.memory_space<vmem>>, vector<1x22x16xf32>
    %c52 = arith.constant 52 : index
    %393 = memref.load %arg2[%c52] : memref<98xf32, #tpu.memory_space<smem>>
    %394 = vector.extract_strided_slice %392 {offsets = [0, 0, 0], sizes = [1, 16, 16], strides = [1, 1, 1]} : vector<1x22x16xf32> to vector<1x16x16xf32>
    %395 = vector.broadcast %393 : f32 to vector<1x16x16xf32>
    %396 = arith.mulf %395, %394 : vector<1x16x16xf32>
    %397 = arith.addf %391, %396 : vector<1x16x16xf32>
    %c59 = arith.constant 59 : index
    %398 = memref.load %arg2[%c59] : memref<98xf32, #tpu.memory_space<smem>>
    %399 = vector.extract_strided_slice %392 {offsets = [0, 1, 0], sizes = [1, 16, 16], strides = [1, 1, 1]} : vector<1x22x16xf32> to vector<1x16x16xf32>
    %400 = vector.broadcast %398 : f32 to vector<1x16x16xf32>
    %401 = arith.mulf %400, %399 : vector<1x16x16xf32>
    %402 = arith.addf %386, %401 : vector<1x16x16xf32>
    %c66 = arith.constant 66 : index
    %403 = memref.load %arg2[%c66] : memref<98xf32, #tpu.memory_space<smem>>
    %404 = vector.extract_strided_slice %392 {offsets = [0, 2, 0], sizes = [1, 16, 16], strides = [1, 1, 1]} : vector<1x22x16xf32> to vector<1x16x16xf32>
    %405 = vector.broadcast %403 : f32 to vector<1x16x16xf32>
    %406 = arith.mulf %405, %404 : vector<1x16x16xf32>
    %407 = arith.addf %397, %406 : vector<1x16x16xf32>
    %c73 = arith.constant 73 : index
    %408 = memref.load %arg2[%c73] : memref<98xf32, #tpu.memory_space<smem>>
    %409 = vector.extract_strided_slice %392 {offsets = [0, 3, 0], sizes = [1, 16, 16], strides = [1, 1, 1]} : vector<1x22x16xf32> to vector<1x16x16xf32>
    %410 = vector.broadcast %408 : f32 to vector<1x16x16xf32>
    %411 = arith.mulf %410, %409 : vector<1x16x16xf32>
    %412 = arith.addf %402, %411 : vector<1x16x16xf32>
    %c80 = arith.constant 80 : index
    %413 = memref.load %arg2[%c80] : memref<98xf32, #tpu.memory_space<smem>>
    %414 = vector.extract_strided_slice %392 {offsets = [0, 4, 0], sizes = [1, 16, 16], strides = [1, 1, 1]} : vector<1x22x16xf32> to vector<1x16x16xf32>
    %415 = vector.broadcast %413 : f32 to vector<1x16x16xf32>
    %416 = arith.mulf %415, %414 : vector<1x16x16xf32>
    %417 = arith.addf %407, %416 : vector<1x16x16xf32>
    %c87 = arith.constant 87 : index
    %418 = memref.load %arg2[%c87] : memref<98xf32, #tpu.memory_space<smem>>
    %419 = vector.extract_strided_slice %392 {offsets = [0, 5, 0], sizes = [1, 16, 16], strides = [1, 1, 1]} : vector<1x22x16xf32> to vector<1x16x16xf32>
    %420 = vector.broadcast %418 : f32 to vector<1x16x16xf32>
    %421 = arith.mulf %420, %419 : vector<1x16x16xf32>
    %422 = arith.addf %412, %421 : vector<1x16x16xf32>
    %c94 = arith.constant 94 : index
    %423 = memref.load %arg2[%c94] : memref<98xf32, #tpu.memory_space<smem>>
    %424 = vector.extract_strided_slice %392 {offsets = [0, 6, 0], sizes = [1, 16, 16], strides = [1, 1, 1]} : vector<1x22x16xf32> to vector<1x16x16xf32>
    %425 = vector.broadcast %423 : f32 to vector<1x16x16xf32>
    %426 = arith.mulf %425, %424 : vector<1x16x16xf32>
    %427 = arith.addf %417, %426 : vector<1x16x16xf32>
    %c0_85 = arith.constant 0 : index
    %c0_86 = arith.constant 0 : index
    %c4_87 = arith.constant 4 : index
    %428 = vector.load %arg5[%c0_85, %c0_86, %c4_87] : memref<1x22x22xf32, #tpu.memory_space<vmem>>, vector<1x22x16xf32>
    %c53 = arith.constant 53 : index
    %429 = memref.load %arg2[%c53] : memref<98xf32, #tpu.memory_space<smem>>
    %430 = vector.extract_strided_slice %428 {offsets = [0, 0, 0], sizes = [1, 16, 16], strides = [1, 1, 1]} : vector<1x22x16xf32> to vector<1x16x16xf32>
    %431 = vector.broadcast %429 : f32 to vector<1x16x16xf32>
    %432 = arith.mulf %431, %430 : vector<1x16x16xf32>
    %433 = arith.addf %427, %432 : vector<1x16x16xf32>
    %c60 = arith.constant 60 : index
    %434 = memref.load %arg2[%c60] : memref<98xf32, #tpu.memory_space<smem>>
    %435 = vector.extract_strided_slice %428 {offsets = [0, 1, 0], sizes = [1, 16, 16], strides = [1, 1, 1]} : vector<1x22x16xf32> to vector<1x16x16xf32>
    %436 = vector.broadcast %434 : f32 to vector<1x16x16xf32>
    %437 = arith.mulf %436, %435 : vector<1x16x16xf32>
    %438 = arith.addf %422, %437 : vector<1x16x16xf32>
    %c67 = arith.constant 67 : index
    %439 = memref.load %arg2[%c67] : memref<98xf32, #tpu.memory_space<smem>>
    %440 = vector.extract_strided_slice %428 {offsets = [0, 2, 0], sizes = [1, 16, 16], strides = [1, 1, 1]} : vector<1x22x16xf32> to vector<1x16x16xf32>
    %441 = vector.broadcast %439 : f32 to vector<1x16x16xf32>
    %442 = arith.mulf %441, %440 : vector<1x16x16xf32>
    %443 = arith.addf %433, %442 : vector<1x16x16xf32>
    %c74 = arith.constant 74 : index
    %444 = memref.load %arg2[%c74] : memref<98xf32, #tpu.memory_space<smem>>
    %445 = vector.extract_strided_slice %428 {offsets = [0, 3, 0], sizes = [1, 16, 16], strides = [1, 1, 1]} : vector<1x22x16xf32> to vector<1x16x16xf32>
    %446 = vector.broadcast %444 : f32 to vector<1x16x16xf32>
    %447 = arith.mulf %446, %445 : vector<1x16x16xf32>
    %448 = arith.addf %438, %447 : vector<1x16x16xf32>
    %c81 = arith.constant 81 : index
    %449 = memref.load %arg2[%c81] : memref<98xf32, #tpu.memory_space<smem>>
    %450 = vector.extract_strided_slice %428 {offsets = [0, 4, 0], sizes = [1, 16, 16], strides = [1, 1, 1]} : vector<1x22x16xf32> to vector<1x16x16xf32>
    %451 = vector.broadcast %449 : f32 to vector<1x16x16xf32>
    %452 = arith.mulf %451, %450 : vector<1x16x16xf32>
    %453 = arith.addf %443, %452 : vector<1x16x16xf32>
    %c88 = arith.constant 88 : index
    %454 = memref.load %arg2[%c88] : memref<98xf32, #tpu.memory_space<smem>>
    %455 = vector.extract_strided_slice %428 {offsets = [0, 5, 0], sizes = [1, 16, 16], strides = [1, 1, 1]} : vector<1x22x16xf32> to vector<1x16x16xf32>
    %456 = vector.broadcast %454 : f32 to vector<1x16x16xf32>
    %457 = arith.mulf %456, %455 : vector<1x16x16xf32>
    %458 = arith.addf %448, %457 : vector<1x16x16xf32>
    %c95 = arith.constant 95 : index
    %459 = memref.load %arg2[%c95] : memref<98xf32, #tpu.memory_space<smem>>
    %460 = vector.extract_strided_slice %428 {offsets = [0, 6, 0], sizes = [1, 16, 16], strides = [1, 1, 1]} : vector<1x22x16xf32> to vector<1x16x16xf32>
    %461 = vector.broadcast %459 : f32 to vector<1x16x16xf32>
    %462 = arith.mulf %461, %460 : vector<1x16x16xf32>
    %463 = arith.addf %453, %462 : vector<1x16x16xf32>
    %c0_88 = arith.constant 0 : index
    %c0_89 = arith.constant 0 : index
    %c5_90 = arith.constant 5 : index
    %464 = vector.load %arg5[%c0_88, %c0_89, %c5_90] : memref<1x22x22xf32, #tpu.memory_space<vmem>>, vector<1x22x16xf32>
    %c54 = arith.constant 54 : index
    %465 = memref.load %arg2[%c54] : memref<98xf32, #tpu.memory_space<smem>>
    %466 = vector.extract_strided_slice %464 {offsets = [0, 0, 0], sizes = [1, 16, 16], strides = [1, 1, 1]} : vector<1x22x16xf32> to vector<1x16x16xf32>
    %467 = vector.broadcast %465 : f32 to vector<1x16x16xf32>
    %468 = arith.mulf %467, %466 : vector<1x16x16xf32>
    %469 = arith.addf %463, %468 : vector<1x16x16xf32>
    %c61 = arith.constant 61 : index
    %470 = memref.load %arg2[%c61] : memref<98xf32, #tpu.memory_space<smem>>
    %471 = vector.extract_strided_slice %464 {offsets = [0, 1, 0], sizes = [1, 16, 16], strides = [1, 1, 1]} : vector<1x22x16xf32> to vector<1x16x16xf32>
    %472 = vector.broadcast %470 : f32 to vector<1x16x16xf32>
    %473 = arith.mulf %472, %471 : vector<1x16x16xf32>
    %474 = arith.addf %458, %473 : vector<1x16x16xf32>
    %c68 = arith.constant 68 : index
    %475 = memref.load %arg2[%c68] : memref<98xf32, #tpu.memory_space<smem>>
    %476 = vector.extract_strided_slice %464 {offsets = [0, 2, 0], sizes = [1, 16, 16], strides = [1, 1, 1]} : vector<1x22x16xf32> to vector<1x16x16xf32>
    %477 = vector.broadcast %475 : f32 to vector<1x16x16xf32>
    %478 = arith.mulf %477, %476 : vector<1x16x16xf32>
    %479 = arith.addf %469, %478 : vector<1x16x16xf32>
    %c75 = arith.constant 75 : index
    %480 = memref.load %arg2[%c75] : memref<98xf32, #tpu.memory_space<smem>>
    %481 = vector.extract_strided_slice %464 {offsets = [0, 3, 0], sizes = [1, 16, 16], strides = [1, 1, 1]} : vector<1x22x16xf32> to vector<1x16x16xf32>
    %482 = vector.broadcast %480 : f32 to vector<1x16x16xf32>
    %483 = arith.mulf %482, %481 : vector<1x16x16xf32>
    %484 = arith.addf %474, %483 : vector<1x16x16xf32>
    %c82 = arith.constant 82 : index
    %485 = memref.load %arg2[%c82] : memref<98xf32, #tpu.memory_space<smem>>
    %486 = vector.extract_strided_slice %464 {offsets = [0, 4, 0], sizes = [1, 16, 16], strides = [1, 1, 1]} : vector<1x22x16xf32> to vector<1x16x16xf32>
    %487 = vector.broadcast %485 : f32 to vector<1x16x16xf32>
    %488 = arith.mulf %487, %486 : vector<1x16x16xf32>
    %489 = arith.addf %479, %488 : vector<1x16x16xf32>
    %c89 = arith.constant 89 : index
    %490 = memref.load %arg2[%c89] : memref<98xf32, #tpu.memory_space<smem>>
    %491 = vector.extract_strided_slice %464 {offsets = [0, 5, 0], sizes = [1, 16, 16], strides = [1, 1, 1]} : vector<1x22x16xf32> to vector<1x16x16xf32>
    %492 = vector.broadcast %490 : f32 to vector<1x16x16xf32>
    %493 = arith.mulf %492, %491 : vector<1x16x16xf32>
    %494 = arith.addf %484, %493 : vector<1x16x16xf32>
    %c96 = arith.constant 96 : index
    %495 = memref.load %arg2[%c96] : memref<98xf32, #tpu.memory_space<smem>>
    %496 = vector.extract_strided_slice %464 {offsets = [0, 6, 0], sizes = [1, 16, 16], strides = [1, 1, 1]} : vector<1x22x16xf32> to vector<1x16x16xf32>
    %497 = vector.broadcast %495 : f32 to vector<1x16x16xf32>
    %498 = arith.mulf %497, %496 : vector<1x16x16xf32>
    %499 = arith.addf %489, %498 : vector<1x16x16xf32>
    %c0_91 = arith.constant 0 : index
    %c0_92 = arith.constant 0 : index
    %c6_93 = arith.constant 6 : index
    %500 = vector.load %arg5[%c0_91, %c0_92, %c6_93] : memref<1x22x22xf32, #tpu.memory_space<vmem>>, vector<1x22x16xf32>
    %c55 = arith.constant 55 : index
    %501 = memref.load %arg2[%c55] : memref<98xf32, #tpu.memory_space<smem>>
    %502 = vector.extract_strided_slice %500 {offsets = [0, 0, 0], sizes = [1, 16, 16], strides = [1, 1, 1]} : vector<1x22x16xf32> to vector<1x16x16xf32>
    %503 = vector.broadcast %501 : f32 to vector<1x16x16xf32>
    %504 = arith.mulf %503, %502 : vector<1x16x16xf32>
    %505 = arith.addf %499, %504 : vector<1x16x16xf32>
    %c62 = arith.constant 62 : index
    %506 = memref.load %arg2[%c62] : memref<98xf32, #tpu.memory_space<smem>>
    %507 = vector.extract_strided_slice %500 {offsets = [0, 1, 0], sizes = [1, 16, 16], strides = [1, 1, 1]} : vector<1x22x16xf32> to vector<1x16x16xf32>
    %508 = vector.broadcast %506 : f32 to vector<1x16x16xf32>
    %509 = arith.mulf %508, %507 : vector<1x16x16xf32>
    %510 = arith.addf %494, %509 : vector<1x16x16xf32>
    %c69 = arith.constant 69 : index
    %511 = memref.load %arg2[%c69] : memref<98xf32, #tpu.memory_space<smem>>
    %512 = vector.extract_strided_slice %500 {offsets = [0, 2, 0], sizes = [1, 16, 16], strides = [1, 1, 1]} : vector<1x22x16xf32> to vector<1x16x16xf32>
    %513 = vector.broadcast %511 : f32 to vector<1x16x16xf32>
    %514 = arith.mulf %513, %512 : vector<1x16x16xf32>
    %515 = arith.addf %505, %514 : vector<1x16x16xf32>
    %c76 = arith.constant 76 : index
    %516 = memref.load %arg2[%c76] : memref<98xf32, #tpu.memory_space<smem>>
    %517 = vector.extract_strided_slice %500 {offsets = [0, 3, 0], sizes = [1, 16, 16], strides = [1, 1, 1]} : vector<1x22x16xf32> to vector<1x16x16xf32>
    %518 = vector.broadcast %516 : f32 to vector<1x16x16xf32>
    %519 = arith.mulf %518, %517 : vector<1x16x16xf32>
    %520 = arith.addf %510, %519 : vector<1x16x16xf32>
    %c83 = arith.constant 83 : index
    %521 = memref.load %arg2[%c83] : memref<98xf32, #tpu.memory_space<smem>>
    %522 = vector.extract_strided_slice %500 {offsets = [0, 4, 0], sizes = [1, 16, 16], strides = [1, 1, 1]} : vector<1x22x16xf32> to vector<1x16x16xf32>
    %523 = vector.broadcast %521 : f32 to vector<1x16x16xf32>
    %524 = arith.mulf %523, %522 : vector<1x16x16xf32>
    %525 = arith.addf %515, %524 : vector<1x16x16xf32>
    %c90 = arith.constant 90 : index
    %526 = memref.load %arg2[%c90] : memref<98xf32, #tpu.memory_space<smem>>
    %527 = vector.extract_strided_slice %500 {offsets = [0, 5, 0], sizes = [1, 16, 16], strides = [1, 1, 1]} : vector<1x22x16xf32> to vector<1x16x16xf32>
    %528 = vector.broadcast %526 : f32 to vector<1x16x16xf32>
    %529 = arith.mulf %528, %527 : vector<1x16x16xf32>
    %530 = arith.addf %520, %529 : vector<1x16x16xf32>
    %c97 = arith.constant 97 : index
    %531 = memref.load %arg2[%c97] : memref<98xf32, #tpu.memory_space<smem>>
    %532 = vector.extract_strided_slice %500 {offsets = [0, 6, 0], sizes = [1, 16, 16], strides = [1, 1, 1]} : vector<1x22x16xf32> to vector<1x16x16xf32>
    %533 = vector.broadcast %531 : f32 to vector<1x16x16xf32>
    %534 = arith.mulf %533, %532 : vector<1x16x16xf32>
    %535 = arith.addf %525, %534 : vector<1x16x16xf32>
    %536 = arith.addf %283, %278 : vector<1x16x16xf32>
    %537 = arith.addf %535, %530 : vector<1x16x16xf32>
    %538 = arith.addf %536, %537 : vector<1x16x16xf32>
    %cst_94 = arith.constant 5.000000e-01 : f32
    %539 = vector.broadcast %cst_94 : f32 to vector<1x16x16xf32>
    %540 = arith.mulf %539, %538 : vector<1x16x16xf32>
    %541 = math.tanh %540 : vector<1x16x16xf32>
    %cst_95 = arith.constant 5.000000e-01 : f32
    %542 = vector.broadcast %cst_95 : f32 to vector<1x16x16xf32>
    %543 = arith.mulf %542, %541 : vector<1x16x16xf32>
    %cst_96 = arith.constant 5.000000e-01 : f32
    %544 = vector.broadcast %cst_96 : f32 to vector<1x16x16xf32>
    %545 = arith.addf %543, %544 : vector<1x16x16xf32>
    %c0_97 = arith.constant 0 : index
    %c0_98 = arith.constant 0 : index
    %c0_99 = arith.constant 0 : index
    %546 = vector.load %arg3[%c0_97, %c0_98, %c0_99] : memref<1x16x16xf32, #tpu.memory_space<vmem>>, vector<1x16x16xf32>
    tpu.vector_store %arg3[%c0_97, %c0_98, %c0_99], %545 {strides = array<i32>} : memref<1x16x16xf32, #tpu.memory_space<vmem>>, vector<1x16x16xf32>,
    return
  }
  func.func @transform_0(%arg0: i32) -> (i32, i32, i32, i32) {
    %c0_i32 = arith.constant 0 : i32
    %c0_i32_0 = arith.constant 0 : i32
    %c0_i32_1 = arith.constant 0 : i32
    %c0_i32_2 = arith.constant 0 : i32
    return %arg0, %c0_i32, %c0_i32_0, %c0_i32_1 : i32, i32, i32, i32
  }
  func.func @transform_1(%arg0: i32) -> i32 {
    %c0_i32 = arith.constant 0 : i32
    %c0_i32_0 = arith.constant 0 : i32
    return %c0_i32 : i32
  }
  func.func @transform_2(%arg0: i32) -> (i32, i32, i32) {
    %c0_i32 = arith.constant 0 : i32
    %c0_i32_0 = arith.constant 0 : i32
    %c0_i32_1 = arith.constant 0 : i32
    return %arg0, %c0_i32, %c0_i32_0 : i32, i32, i32
  }
}

</mosaic_0001>

<bundles_post_ra>
// kernel: tpu_custom_call.1
= control target key start
LH: loop header
LB: loop body
LE: loop exit
PB: predicated region body
PF: predicated region fallthrough
CT: control target
= control target key end

     0   :  { %7 = vsyncpa [#allocation5], 0  ;;  %s4137_s0 = inlined_call_operand.hbm [shape: f32[2,4,16,16], index: 0, kind: input, shape index: {}]   ;;  %s4138_s1 = inlined_call_operand.vmem [shape: f32[98], index: 1, kind: input, shape index: {}]   ;;  %s4139_s2 = inlined_call_operand.hbm [shape: f32[2,16,16], index: 2, kind: output, shape index: {}]  }
   0x1   :  { %9 = vsyncpa [#allocation5 + $0x1], 0 }
   0x2   :  { %10 = vsyncpa [#allocation7], 0 }
   0x3   :  { %11 = vsyncpa [#allocation6], 0 }
   0x4   :  { %13 = vsyncpa [#allocation6 + $0x1], 0  ;;  %s2700_s9 = smov 0   ;;  %s2702_s10 = smov 0  }
   0x5   :  { %s2704_s11 = smov 0   ;;  %s2706_s12 = smov 0  }
   0x6 LB: > { %s2721_s13 = sadd.s32 4294967295, %s2668_s12   ;;  %s2353_s14 = sadd.s32 4294967294, %s2668_s12   ;;  %s2668_s12 = sphi %s2706_s12, %s4329_s12   ;;  %s2664_s11 = sphi %s2704_s11, %s4328_s11   ;;  %s2660_s10 = sphi %s2702_s10, %s4327_s10   ;;  %s2656_s9 = sphi %s2700_s9, %s4326_s9  }
   0x7   : > { %s2725_s15 = sadd.s32 1, %s2668_s12   ;;  %s26_s16 = sadd.s32 1, %s2664_s11 }
   0x8   : > { %s23_s17 = ssub.s32 %s2668_s12, %s2725_s15  ;;  %p33_p0 = scmp.ne.s32.totalorder %s2664_s11, %s2660_s10 }
   0x9   : > { %p24_p1 = scmp.eq.s32.totalorder %s23_s17, 0  ;;  %p34_p2 = scmp.eq.s32.totalorder %s2668_s12, 0 }
   0xa   : > { %p39_p3 = scmp.ne.s32.totalorder %s2660_s10, %s2656_s9  ;;  %p4141_p4 = scmp.eq.s32.totalorder %s2721_s13, 0 }
   0xb   : > { %s2737_s18 = scalar_select %p24_p1, %s2664_s11, %s26_s16  }
   0xc   : > { %p2739_p5 = por %p34_p2, %p33_p0  ;;  %p2745_p6 = por %p4141_p4, %p39_p3 }
   0xd   : > { %p84_p7 = scmp.eq.s32.totalorder %s2721_s13, 1  ;;  %p90_p8 = scmp.eq.s32.totalorder %s2353_s14, 1 }
   0xe   : > { %s4144_s20 = scalar_select %p2745_p6, 1, 0 }
   0xf   : > { %p2354_p9 = scmp.ge.s32.totalorder %s2668_s12, 1  ;;  %p97_p10 = scmp.lt.s32.totalorder %s2668_s12, 3 }
  0x10   : > { %p2752_p11 = por %p84_p7, %p33_p0  ;;  %p2756_p12 = por %p90_p8, %p39_p3 }
  0x11   : > { %p2760_p13 = pnand %p2354_p9, %p97_p10  ;;  %s110_s26 = sshll.u32 %s4138_s1, 4  ;;  %s111_s26 = int_to_ptr.vmem [resolvable:$true] %s110_s26 }
  0x12   : > { %s4145_s21 = scalar_select %p2752_p11, 1, 0 }
  0x13   : > { %s4146_s22 = scalar_select %p2756_p12, 1, 0 }
  0x14   : > { %p2482_p1 = pneg %p2760_p13  ;;  %p2495_p2 = scmp.lt.s32.totalorder %s2668_s12, 2 }
  0x15   : > { %s121_s28 = sand.u32 1, %s2664_s11   ;;  %s2553_s3 = scalar_lea.vmem %s111_s26, 16 }
  0x16   : > { %p2773_p7 = pnand %p2482_p1, %p4141_p4  ;;  %p2780_p3 = pnand %p2495_p2, %p2739_p5 }
  0x17   : > { %s2357_s30 = sshll.u32 %s121_s28, 6  ;;  %p2554_p8 = scmp.ne.s32.totalorder %s111_s26, %s2553_s3 }
  0x18   : > { %p2555_p9 = pneg %p2773_p7  ;;  %p2561_p12 = scmp.lt.s32.totalorder %s111_s26, %s111_s26 }
  0x19   : > { %p2562_p11 = scmp.lt.s32.totalorder %s2553_s3, %s2553_s3 }
  0x1a   : > { %p2556_p10 = pnand %p2555_p9, %p2554_p8 }
  0x1b   : > { %p2563_p1 = por %p2562_p11, %p2561_p12 }
  0x1c   : > { %p2557_p0 = pneg %p2556_p10 }
  0x1e   : > { %p2564_p4 = pnand %p2563_p1, %p2557_p0 }
  0x20   : > { %2567 = shalt.err (!%p2564_p4)
}
  0x21   : > { %s2670_s4 = smov [#allocation8]   ;;  %s2472_s5 = sshll.u32 %s2668_s12, 10 }
  0x22   : > { %2485 = dma.vmem_to_smem (!%p2773_p7), %s111_s26, 16, %s2670_s4, [#allocation7]  }
  0x23   : > { %s125_s6 = scalar_lea.vmem [#allocation4], %s2357_s30  ;;  %s2792_s16 = scalar_lea.hbm %s4137_s0, %s2472_s5 }
  0x24   : > { %s132_s7 = sshll.u32 %s125_s6, 4  ;;  %s2796_s17 = scalar_lea.sflag [#allocation5], %s121_s28  ;;  %s2794_s7 = int_to_ptr.vmem [resolvable:$true] %s132_s7 }
  0x25   : > { %s2568_s19 = scalar_lea.hbm %s2792_s16, 1024  ;;  %p2570_p5 = pneg %p2780_p3 }
  0x26   : > { %p2569_p4 = scmp.ne.s32.totalorder %s2792_s16, %s2568_s19  ;;  %s2573_s26 = scalar_lea.hbm %s4137_s0, 2048 }
  0x27   : > { %p2574_p0 = scmp.lt.u32.totalorder %s2792_s16, %s4137_s0  ;;  %p2575_p2 = scmp.lt.u32.totalorder %s2573_s26, %s2568_s19 }
  0x28   : > { %p2571_p11 = pnand %p2570_p5, %p2569_p4  ;;  %p2577_p8 = scmp.lt.u32.totalorder %s2568_s19, %s2792_s16 }
  0x29   : > { %p2576_p7 = por %p2575_p2, %p2574_p0 }
  0x2a   : > { %p2572_p12 = pneg %p2571_p11 }
  0x2b   : > { %p2578_p9 = por %p2577_p8, %p2576_p7 }
  0x2d   : > { %p2579_p10 = pnand %p2578_p9, %p2572_p12 }
  0x2f   : > { %2582 = shalt.err (!%p2579_p10)
}
  0x30   : > { %s2583_s28 = scalar_lea.vmem %s2794_s7, 1024  ;;  %s2671_s3 = smov [#allocation4]  }
  0x31   : > { %p2584_p1 = scmp.ne.s32.totalorder %s2794_s7, %s2583_s28  ;;  %s2588_s4 = sshll.u32 %s2671_s3, 4  ;;  %s2589_s4 = int_to_ptr.vmem [resolvable:$false] %s2588_s4 }
  0x32   : > { %s2590_s5 = scalar_lea.vmem %s2589_s4, 2048  ;;  %p2591_p6 = scmp.lt.s32.totalorder %s2794_s7, %s2589_s4 }
  0x33   : > { %p2586_p4 = pnand %p2584_p1, %p2570_p5  ;;  %p2592_p0 = scmp.lt.s32.totalorder %s2590_s5, %s2583_s28 }
  0x35   : > { %p2587_p11 = pneg %p2586_p4  ;;  %p2593_p2 = por %p2592_p0, %p2591_p6 }
  0x37   : > { %p2594_p7 = pnand %p2593_p2, %p2587_p11 }
  0x39   : > { %2597 = shalt.err (!%p2594_p7)
}
  0x3a   : > { %s2672_s6 = smov 128   ;;  %s2673_s8 = smov 8  }
  0x3b   : > { %2489 = dma.hbm_to_vmem [thread:$0]  (!%p2780_p3), %s2792_s16, 1024, %s2794_s7, %s2796_s17, %s2672_s6, %s2672_s6, %s2673_s8  }
  0x3c   : > { %144 = sbr.rel (%p2760_p13) target bundleno = 772 (0x304), region = 28 }
  0x43   : > { %s2827_s14 = sand.u32 1, %s2660_s10   ;;  %p4150_p6 = scmp.ne.s32.totalorder %s4144_s20, 0 }
  0x44   : > { %s2361_s19 = sshll.u32 %s2827_s14, 6  ;;  %s147_s24 = scalar_lea.sflag [#allocation5], %s2827_s14 }
  0x45   : > { %s150_s25 = scalar_lea.vmem [#allocation4], %s2361_s19 }
  0x46   : > { %2643 = dma.done.wait (%p4150_p6), %s147_s24, 1024  }
  0x47   : > { %2645 = vsyncadd (%p4150_p6), %s147_s24, 4294966272  ;;  %p4151_p5 = scmp.eq.s32.totalorder %s2721_s13, 0 }
  0x49   : > { %2647 = dma.done.wait (%p4151_p5), [#allocation7], 16   ;;  %p4152_p3 = pmov %p4151_p5 }
  0x4b   : > { %2649 = vsyncadd (%p4152_p3), [#allocation7], 4294967280 }
  0x4c   : > { %159 = sfence }
  0x4d   : > { %v176_v0 = vld [vmem:[%s150_s25] sm:$0xff]  ;;  %v2364_v1 = vld [vmem:[%s150_s25 + $0x10] sm:$0xff]  ;;  %vm201_vm0 = vcmask 174080   ;;  %v177_v4 = vld [vmem:[%s150_s25 + $0x8] sm:$0xff]  ;;  %v2674_v7 = vmov 0.0   ;;  %vm204_vm1 = vcmask 23552  }
  0x4e   : > { %v2366_v2 = vld [vmem:[%s150_s25 + $0x20] sm:$0xff]  ;;  %v181_v3 = vadd.f32 %v2364_v1, %v176_v0  ;;  %v2365_v5 = vld [vmem:[%s150_s25 + $0x18] sm:$0xff]  ;;  %v183_v6 = vmax.f32 %v176_v0, %v2364_v1  ;;  %202 = vst.msk [vmem:[#allocation2] sm:$0x7] %vm201_vm0, %v2674_v7  ;;  %203 = vst.msk [vmem:[#allocation2 + $0x13] sm:$0x7] %vm201_vm0, %v2674_v7 }
  0x4f   : > { %vm207_vm2 = vcmask 179352   ;;  %221 = vst.msk [vmem:[#allocation3] sm:$0x7] %vm201_vm0, %v2674_v7  ;;  %222 = vst.msk [vmem:[#allocation3 + $0x13] sm:$0x7] %vm201_vm0, %v2674_v7  ;;  %v2368_v8 = vld [vmem:[%s150_s25 + $0x30] sm:$0xff]  ;;  %v182_v9 = vadd.f32 %v2365_v5, %v177_v4  ;;  %v184_v11 = vmax.f32 %v177_v4, %v2365_v5 }
  0x50   : > { %v2367_v10 = vld [vmem:[%s150_s25 + $0x28] sm:$0xff]  ;;  %205 = vst.msk [vmem:[#allocation2 + $0x3] sm:$0xff] %vm204_vm1, %v2674_v7  ;;  %206 = vst.msk [vmem:[#allocation2 + $0xb] sm:$0xff] %vm204_vm1, %v2674_v7  ;;  %v188_v12 = vadd.f32 %v2366_v2, %v181_v3  ;;  %v2369_v13 = vld [vmem:[%s150_s25 + $0x38] sm:$0xff]  ;;  %v190_v14 = vmax.f32 %v183_v6, %v2366_v2  ;;  %s2675_s20 = smov 3   ;;  %vm218_vm3 = vcmask 154648  }
  0x51   : > { %223 = vst.msk [vmem:[#allocation3 + $0x3] sm:$0xff] %vm204_vm1, %v2674_v7  ;;  %224 = vst.msk [vmem:[#allocation3 + $0xb] sm:$0xff] %vm204_vm1, %v2674_v7  ;;  %v189_v15 = vadd.f32 %v2367_v10, %v182_v9  ;;  %v191_v16 = vmax.f32 %v184_v11, %v2367_v10  ;;  %s2376_s23 = sld [smem:[#allocation8 + $0x1]]  ;;  %s2377_s29 = sld [smem:[#allocation8 + $0x8]]  ;;  %vm262_vm4 = vcmask 1045504   ;;  %vm299_vm5 = vcmask 1043456  }
  0x52   : > { %208 = vst.msk [vmem:[#allocation2 + $0x3] sm:$0xff] %vm207_vm2, %v2674_v7  ;;  %209 = vst.msk [vmem:[#allocation2 + $0xb] sm:$0xff] %vm207_vm2, %v2674_v7  ;;  %v195_v17 = vadd.f32 %v2368_v8, %v188_v12  ;;  %v197_v18 = vmax.f32 %v190_v14, %v2368_v8  ;;  %s2383_s7 = sld [smem:[#allocation8 + $0x2]]  ;;  %s2676_s16 = smov 127   ;;  %vm336_vm6 = vcmask 1041408   ;;  %vm2219_vm7 = vcmask 1046528  }
  0x53   : > { %225 = vst.msk [vmem:[#allocation3 + $0x3] sm:$0xff] %vm207_vm2, %v2674_v7  ;;  %226 = vst.msk [vmem:[#allocation3 + $0xb] sm:$0xff] %vm207_vm2, %v2674_v7  ;;  %v196_v19 = vadd.f32 %v2369_v13, %v189_v15  ;;  %v198_v21 = vmax.f32 %v191_v16, %v2369_v13  ;;  %s2384_s17 = sld [smem:[#allocation8 + $0x9]]  ;;  %s2390_s26 = sld [smem:[#allocation8 + $0x3]]  ;;  %vm2251_vm8 = vcmask 130048  }
  0x54   : > { %v199_v20 = vmul.f32 0.25, %v195_v17  ;;  %229 = vrot.lane.b32.xlu1 %v197_v18, %s2675_s20  ;;  %s2391_s27 = sld [smem:[#allocation8 + $0xa]]  ;;  %s2677_s30 = smov 126  }
  0x55   : > { %v200_v22 = vmul.f32 0.25, %v196_v19  ;;  %s2397_s28 = sld [smem:[#allocation8 + $0x4]]  ;;  %s2678_s3 = smov 125  }
  0x56   : > { %212 = vrot.lane.b32.xlu0 %v199_v20, %s2675_s20  ;;  %s2398_s4 = sld [smem:[#allocation8 + $0xb]]  ;;  %s2381_s5 = sld [smem:[#allocation8 + $0x24]] }
  0x57   : > { %v347_v27 = vstv %s2376_s23  ;;  %v361_v30 = vstv %s2377_s29  ;;  %s2386_s6 = sld [smem:[#allocation8 + $0x17]]  ;;  %s2379_s8 = sld [smem:[#allocation8 + $0x16]] }
  0x58   : > { %231 = vrot.lane.b32.xlu1 %v198_v21, %s2675_s20  ;;  %v494_v37 = vstv %s2383_s7  ;;  %s2679_s19 = smov 124   ;;  %s2395_s24 = sld [smem:[#allocation8 + $0x26]] }
  0x59   : > { %v508_v40 = vstv %s2384_s17  ;;  %v641_v43 = vstv %s2390_s26  ;;  %s2388_s25 = sld [smem:[#allocation8 + $0x25]]  ;;  %s2393_s23 = sld [smem:[#allocation8 + $0x18]] }
  0x5a   : > { %214 = vrot.lane.b32.xlu0 %v200_v22, %s2675_s20  ;;  %v655_v46 = vstv %s2391_s27  ;;  %s2400_s20 = sld [smem:[#allocation8 + $0x19]]  ;;  %s2378_s29 = sld [smem:[#allocation8 + $0xf]] }
  0x5b   : > { %v788_v51 = vstv %s2397_s28  ;;  %s2402_s7 = sld [smem:[#allocation8 + $0x27]]  ;;  %s2380_s17 = sld [smem:[#allocation8 + $0x1d]] }
  0x5c   : > { %v802_v54 = vstv %s2398_s4  ;;  %v2883_v55 = vstv %s2381_s5  ;;  %s2382_s26 = sld [smem:[#allocation8 + $0x2b]]  ;;  %s2385_s27 = sld [smem:[#allocation8 + $0x10]] }
  0x5d   : > { %v2893_v59 = vstv %s2386_s6  ;;  %v402_v60 = vstv %s2379_s8  ;;  %s2387_s28 = sld [smem:[#allocation8 + $0x1e]]  ;;  %s2389_s4 = sld [smem:[#allocation8 + $0x2c]] }
  0x5e   : > { %v2906_v1 = vstv %s2395_s24  ;;  %s2392_s5 = sld [smem:[#allocation8 + $0x11]]  ;;  %s2394_s6 = sld [smem:[#allocation8 + $0x1f]] }
  0x5f   : > { %v2908_v2 = vstv %s2388_s25  ;;  %v2927_v9 = vstv %s2393_s23  ;;  %s2396_s8 = sld [smem:[#allocation8 + $0x2d]]  ;;  %s2399_s24 = sld [smem:[#allocation8 + $0x12]] }
  0x60   : > { %v2910_v3 = vstv %s2400_s20  ;;  %v381_v10 = vstv %s2378_s29  ;;  %s2401_s25 = sld [smem:[#allocation8 + $0x20]]  ;;  %s2403_s20 = sld [smem:[#allocation8 + $0x2e]] }
  0x61   : > { %v2939_v15 = vstv %s2402_s7  ;;  %s3118_s23 = sld [smem:[#allocation8 + $0x5]]  ;;  %s2405_s29 = sld [smem:[#allocation8 + $0xc]] }
  0x62   : > { %s2406_s7 = sld [smem:[#allocation8 + $0x13]]  ;;  %p4323_p12 = scmp.ne.s32.totalorder %s4145_s21, 0 }
  0xc6   : > { %v230_v23 = vpop.permute.xlu1 %229 }
  0xc7   : > { %235 = vst.msk [vmem:[#allocation3 + $0x3] sm:$0xff] %vm218_vm3, %v230_v23 }
  0xc8   : > { %v213_v24 = vpop.permute.xlu0 %212 }
  0xc9   : > { %219 = vst.msk [vmem:[#allocation2 + $0x3] sm:$0xff] %vm218_vm3, %v213_v24 }
  0xca   : > { %v232_v25 = vpop.permute.xlu1 %231 }
  0xcb   : > { %236 = vst.msk [vmem:[#allocation3 + $0xb] sm:$0xff] %vm218_vm3, %v232_v25 }
  0xcc   : > { %v215_v26 = vpop.permute.xlu0 %214 }
  0xcd   : > { %220 = vst.msk [vmem:[#allocation2 + $0xb] sm:$0xff] %vm218_vm3, %v215_v26 }
  0xd0   : > { %v2843_v28 = vld [vmem:[#allocation2] sm:$0xff] }
  0xd1   : > { %v348_v29 = vmul.f32 %v347_v27, %v2843_v28  ;;  %v362_v32 = vmul.f32 %v361_v30, %v2843_v28  ;;  %v495_v39 = vmul.f32 %v494_v37, %v2843_v28  ;;  %v509_v42 = vmul.f32 %v508_v40, %v2843_v28 }
  0xd2   : > { %v642_v44 = vmul.f32 %v641_v43, %v2843_v28  ;;  %v656_v47 = vmul.f32 %v655_v46, %v2843_v28  ;;  %v789_v53 = vmul.f32 %v788_v51, %v2843_v28  ;;  %v803_v57 = vmul.f32 %v802_v54, %v2843_v28 }
  0xd3   : > { %352 = vrot.lane.b32.xlu0 %v348_v29, %s2676_s16  ;;  %v382_v29 = vmul.f32 %v381_v10, %v2843_v28 }
  0xd4   : > { %v2847_v31 = vld [vmem:[#allocation2 + $0x8] sm:$0xff]  ;;  %v2851_v34 = vld [vmem:[#allocation2 + $0x10] sm:$0x3f] }
  0xd5   : > { %v349_v33 = vmul.f32 %v347_v27, %v2847_v31  ;;  %v364_v35 = vmul.f32 %v361_v30, %v2851_v34  ;;  %v363_v36 = vmul.f32 %v361_v30, %v2847_v31  ;;  %v496_v38 = vmul.f32 %v494_v37, %v2847_v31 }
  0xd6   : > { %v510_v41 = vmul.f32 %v508_v40, %v2847_v31  ;;  %v511_v45 = vmul.f32 %v508_v40, %v2851_v34  ;;  %v643_v48 = vmul.f32 %v641_v43, %v2847_v31  ;;  %v658_v49 = vmul.f32 %v655_v46, %v2851_v34 }
  0xd7   : > { %368 = vrot.lane.b32.xlu0 %v362_v32, %s2676_s16  ;;  %354 = vrot.lane.b32.xlu1 %v349_v33, %s2676_s16  ;;  %v657_v50 = vmul.f32 %v655_v46, %v2847_v31  ;;  %v790_v52 = vmul.f32 %v788_v51, %v2847_v31  ;;  %v804_v56 = vmul.f32 %v802_v54, %v2847_v31  ;;  %v427_v30 = vstv %s2380_s17  ;;  %s2407_s17 = sld [smem:[#allocation8 + $0x1a]] }
  0xd8   : > { %v2889_v58 = vmul.f32 %v2883_v55, %v2851_v34  ;;  %v805_v62 = vmul.f32 %v802_v54, %v2851_v34  ;;  %v2899_v63 = vmul.f32 %v2893_v59, %v2851_v34  ;;  %v405_v0 = vmul.f32 %v402_v60, %v2851_v34 }
  0xd9   : > { %v2915_v6 = vmul.f32 %v2906_v1, %v2851_v34  ;;  %v2919_v7 = vmul.f32 %v2908_v2, %v2851_v34  ;;  %v846_v8 = vmul.f32 %v2910_v3, %v2851_v34  ;;  %v2931_v11 = vmul.f32 %v2910_v3, %v2847_v31 }
  0xda   : > { %v458_v61 = vrot.slane %v2889_v58, 4  ;;  %v559_v4 = vrot.slane %v2899_v63, 2  ;;  %v412_v5 = vrot.slane %v405_v0, 2  ;;  %v2937_v14 = vmul.f32 %v2927_v9, %v2851_v34 }
  0xdb   : > { %372 = vrot.lane.b32.xlu0 %v364_v35, %s2676_s16  ;;  %370 = vrot.lane.b32.xlu1 %v363_v36, %s2676_s16  ;;  %v752_v12 = vrot.slane %v2915_v6, 4  ;;  %v605_v13 = vrot.slane %v2919_v7, 4  ;;  %v853_v16 = vrot.slane %v846_v8, 2  ;;  %v383_v17 = vmul.f32 %v381_v10, %v2847_v31 }
  0xdc   : > { %v384_v18 = vmul.f32 %v381_v10, %v2851_v34  ;;  %v851_v19 = vrot.slane %v2931_v11, 2  ;;  %v892_v20 = vmul.f32 %v2939_v15, %v2851_v34  ;;  %v706_v21 = vrot.slane %v2937_v14, 2 }
  0xdd   : > { %v389_v22 = vrot.slane %v383_v17, 2  ;;  %v404_v24 = vmul.f32 %v402_v60, %v2847_v31  ;;  %v2965_v27 = vmul.f32 %v2939_v15, %v2847_v31  ;;  %v429_v36 = vmul.f32 %v427_v30, %v2847_v31 }
  0xde   : > { %v391_v23 = vrot.slane %v384_v18, 2  ;;  %v2957_v25 = vsel %vm262_vm4, %v851_v19, %v853_v16  ;;  %v899_v26 = vrot.slane %v892_v20, 4  ;;  %v403_v37 = vmul.f32 %v402_v60, %v2843_v28 }
  0xdf   : > { %501 = vrot.lane.b32.xlu0 %v496_v38, %s2677_s30  ;;  %499 = vrot.lane.b32.xlu1 %v495_v39, %s2677_s30  ;;  %v897_v32 = vrot.slane %v2965_v27, 4  ;;  %v410_v35 = vrot.slane %v404_v24, 2  ;;  %v388_v39 = vrot.slane %v382_v29, 2  ;;  %v428_v40 = vmul.f32 %v427_v30, %v2843_v28 }
  0xe0   : > { %v392_v33 = vsel %vm262_vm4, %v389_v22, %v391_v23  ;;  %v409_v46 = vrot.slane %v403_v37, 2  ;;  %v473_v51 = vstv %s2382_s26  ;;  %v528_v60 = vstv %s2385_s27  ;;  %s2680_s26 = smov 123   ;;  %s2408_s27 = sld [smem:[#allocation8 + $0x21]] }
  0xe1   : > { %v2977_v38 = vsel %vm299_vm5, %v897_v32, %v899_v26  ;;  %v390_v43 = vsel %vm262_vm4, %v388_v39, %v389_v22  ;;  %v475_v54 = vmul.f32 %v473_v51, %v2847_v31  ;;  %v530_v8 = vmul.f32 %v528_v60, %v2847_v31 }
  0xe2   : > { %v474_v10 = vmul.f32 %v473_v51, %v2843_v28  ;;  %v551_v22 = vmul.f32 %v2893_v59, %v2847_v31  ;;  %v531_v23 = vmul.f32 %v528_v60, %v2851_v34  ;;  %v550_v29 = vmul.f32 %v2893_v59, %v2843_v28 }
  0xe3   : > { %517 = vrot.lane.b32.xlu0 %v510_v41, %s2677_s30  ;;  %515 = vrot.lane.b32.xlu1 %v509_v42, %s2677_s30  ;;  %v450_v41 = vmul.f32 %v2883_v55, %v2847_v31  ;;  %v413_v42 = vsel %vm262_vm4, %v410_v35, %v412_v5  ;;  %v481_v0 = vrot.slane %v475_v54, 6  ;;  %v536_v20 = vrot.slane %v530_v8, 2 }
  0xe4   : > { %v480_v24 = vrot.slane %v474_v10, 6  ;;  %v574_v58 = vstv %s2387_s28  ;;  %v556_v39 = vrot.slane %v550_v29, 2  ;;  %s2409_s28 = sld [smem:[#allocation8 + $0x28]] }
  0xe5   : > { %v577_v37 = vmul.f32 %v574_v58, %v2851_v34 }
  0xe7   : > { %646 = vrot.lane.b32.xlu0 %v642_v44, %s2678_s3  ;;  %519 = vrot.lane.b32.xlu1 %v511_v45, %s2677_s30  ;;  %v435_v44 = vrot.slane %v429_v36, 4  ;;  %v430_v45 = vmul.f32 %v427_v30, %v2851_v34  ;;  %v576_v30 = vmul.f32 %v574_v58, %v2847_v31  ;;  %v538_v36 = vrot.slane %v531_v23, 2 }
  0xeb   : > { %662 = vrot.lane.b32.xlu0 %v656_v47, %s2678_s3  ;;  %648 = vrot.lane.b32.xlu1 %v643_v48, %s2678_s3  ;;  %v449_v47 = vmul.f32 %v2883_v55, %v2843_v28  ;;  %v434_v48 = vrot.slane %v428_v40, 4  ;;  %v582_v40 = vrot.slane %v576_v30, 4  ;;  %v744_v30 = vmul.f32 %v2906_v1, %v2847_v31 }
  0xef   : > { %666 = vrot.lane.b32.xlu0 %v658_v49, %s2678_s3  ;;  %664 = vrot.lane.b32.xlu1 %v657_v50, %s2678_s3  ;;  %v411_v49 = vsel %vm262_vm4, %v409_v46, %v410_v35  ;;  %v456_v50 = vrot.slane %v450_v41, 4  ;;  %v557_v35 = vrot.slane %v551_v22, 2  ;;  %v539_v41 = vsel %vm262_vm4, %v536_v20, %v538_v36 }
  0xf1   : > { %v459_v17 = vsel %vm299_vm5, %v456_v50, %v458_v61  ;;  %v558_v59 = vsel %vm262_vm4, %v556_v39, %v557_v35 }
  0xf3   : > { %795 = vrot.lane.b32.xlu0 %v790_v52, %s2679_s19  ;;  %793 = vrot.lane.b32.xlu1 %v789_v53, %s2679_s19  ;;  %v436_v52 = vsel %vm299_vm5, %v434_v48, %v435_v44  ;;  %v437_v53 = vrot.slane %v430_v45, 4  ;;  %v620_v45 = vstv %s2389_s4  ;;  %s2410_s4 = sld [smem:[#allocation8 + $0x2f]] }
  0xf7   : > { %811 = vrot.lane.b32.xlu0 %v804_v56, %s2679_s19  ;;  %809 = vrot.lane.b32.xlu1 %v803_v57, %s2679_s19  ;;  %v476_v56 = vmul.f32 %v473_v51, %v2851_v34  ;;  %v455_v57 = vrot.slane %v449_v47, 4  ;;  %v560_v47 = vsel %vm262_vm4, %v557_v35, %v559_v4  ;;  %v621_v51 = vmul.f32 %v620_v45, %v2843_v28 }
  0xf9   : > { %v457_v55 = vsel %vm299_vm5, %v455_v57, %v456_v50 }
  0xfb   : > { %464 = vrot.lane.b32.xlu0 %v458_v61, %s2676_s16  ;;  %813 = vrot.lane.b32.xlu1 %v805_v62, %s2679_s19  ;;  %v438_v62 = vsel %vm299_vm5, %v435_v44, %v437_v53  ;;  %v482_v61 = vsel %vm336_vm6, %v480_v24, %v481_v0  ;;  %v575_v44 = vmul.f32 %v574_v58, %v2843_v28  ;;  %v675_v53 = vstv %s2392_s5  ;;  %s2411_s5 = sld [smem:[#allocation8 + $0x6]] }
  0xfc   : > { %v677_v63 = vmul.f32 %v675_v53, %v2847_v31  ;;  %v678_v57 = vmul.f32 %v675_v53, %v2851_v34  ;;  %v676_v10 = vmul.f32 %v675_v53, %v2843_v28 }
  0xfd   : > { %v581_v50 = vrot.slane %v575_v44, 4 }
  0xfe   : > { %v682_v24 = vrot.slane %v676_v10, 2 }
  0xff   : > { %565 = vrot.lane.b32.xlu0 %v559_v4, %s2677_s30  ;;  %418 = vrot.lane.b32.xlu1 %v412_v5, %s2676_s16  ;;  %v483_v5 = vrot.slane %v476_v56, 6  ;;  %v583_v54 = vsel %vm299_vm5, %v581_v50, %v582_v40 }
 0x101   : > { %v484_v18 = vsel %vm336_vm6, %v481_v0, %v483_v5  ;;  %v698_v0 = vmul.f32 %v2927_v9, %v2847_v31 }
 0x103   : > { %758 = vrot.lane.b32.xlu0 %v752_v12, %s2678_s3  ;;  %611 = vrot.lane.b32.xlu1 %v605_v13, %s2677_s30  ;;  %v704_v22 = vrot.slane %v698_v0, 2 }
 0x105   : > { %v707_v58 = vsel %vm262_vm4, %v704_v22, %v706_v21 }
 0x107   : > { %859 = vrot.lane.b32.xlu0 %v853_v16, %s2679_s19  ;;  %712 = vrot.lane.b32.xlu1 %v706_v21, %s2678_s3  ;;  %v529_v16 = vmul.f32 %v528_v60, %v2843_v28 }
 0x10b   : > { %395 = vrot.lane.b32.xlu0 %v392_v33, %s2676_s16  ;;  %905 = vrot.lane.b32.xlu1 %v899_v26, %s2679_s19  ;;  %v535_v26 = vrot.slane %v529_v16, 2  ;;  %v721_v16 = vstv %s2394_s6  ;;  %s2413_s6 = sld [smem:[#allocation8 + $0x14]] }
 0x10c   : > { %v722_v23 = vmul.f32 %v721_v16, %v2843_v28 }
 0x10d   : > { %v537_v33 = vsel %vm262_vm4, %v535_v26, %v536_v20  ;;  %v697_v26 = vmul.f32 %v2927_v9, %v2843_v28  ;;  %v743_v9 = vmul.f32 %v2906_v1, %v2843_v28 }
 0x10e   : > { %v728_v35 = vrot.slane %v722_v23, 4  ;;  %v890_v23 = vmul.f32 %v2939_v15, %v2843_v28 }
 0x10f   : > { %416 = vrot.lane.b32.xlu0 %v413_v42, %s2676_s16  ;;  %393 = vrot.lane.b32.xlu1 %v390_v43, %s2676_s16  ;;  %v584_v42 = vrot.slane %v577_v37, 4  ;;  %v597_v43 = vmul.f32 %v2908_v2, %v2847_v31  ;;  %v703_v36 = vrot.slane %v697_v26, 2  ;;  %v767_v37 = vstv %s2396_s8  ;;  %s2412_s8 = sld [smem:[#allocation8 + $0xd]] }
 0x110   : > { %v769_v21 = vmul.f32 %v767_v37, %v2847_v31 }
 0x111   : > { %v585_v46 = vsel %vm299_vm5, %v582_v40, %v584_v42  ;;  %v603_v48 = vrot.slane %v597_v43, 4  ;;  %v705_v39 = vsel %vm262_vm4, %v703_v36, %v704_v22  ;;  %v750_v40 = vrot.slane %v744_v30, 4 }
 0x112   : > { %v749_v42 = vrot.slane %v743_v9, 4  ;;  %v822_v43 = vstv %s2399_s24  ;;  %v896_v30 = vrot.slane %v890_v23, 4  ;;  %v935_v9 = vstv %s3118_s23  ;;  %s2414_s24 = sld [smem:[#allocation8 + $0x1b]]  ;;  %s2416_s23 = sld [smem:[#allocation8 + $0x29]] }
 0x113   : > { %439 = vrot.lane.b32.xlu0 %v436_v52, %s2676_s16  ;;  %414 = vrot.lane.b32.xlu1 %v411_v49, %s2676_s16  ;;  %v622_v49 = vmul.f32 %v620_v45, %v2847_v31  ;;  %v596_v52 = vmul.f32 %v2908_v2, %v2843_v28  ;;  %v606_v4 = vsel %vm299_vm5, %v603_v48, %v605_v13  ;;  %v627_v2 = vrot.slane %v621_v51, 6 }
 0x114   : > { %v685_v13 = vrot.slane %v678_v57, 2  ;;  %v824_v44 = vmul.f32 %v822_v43, %v2847_v31  ;;  %v751_v1 = vsel %vm299_vm5, %v749_v42, %v750_v40  ;;  %v825_v53 = vmul.f32 %v822_v43, %v2851_v34 }
 0x115   : > { %v628_v56 = vrot.slane %v622_v49, 6  ;;  %v602_v60 = vrot.slane %v596_v52, 4  ;;  %v768_v49 = vmul.f32 %v767_v37, %v2843_v28  ;;  %v753_v52 = vsel %vm299_vm5, %v750_v40, %v752_v12 }
 0x116   : > { %v830_v50 = vrot.slane %v824_v44, 2  ;;  %v832_v12 = vrot.slane %v825_v53, 2  ;;  %v898_v36 = vsel %vm299_vm5, %v896_v30, %v897_v32  ;;  %v949_v40 = vstv %s2405_s29  ;;  %s2417_s29 = sld [smem:[#allocation8 + $0x30]] }
 0x117   : > { %460 = vrot.lane.b32.xlu0 %v457_v55, %s2676_s16  ;;  %441 = vrot.lane.b32.xlu1 %v438_v62, %s2676_s16  ;;  %v623_v55 = vmul.f32 %v620_v45, %v2851_v34  ;;  %v683_v62 = vrot.slane %v677_v63, 2  ;;  %v629_v5 = vsel %vm336_vm6, %v627_v2, %v628_v56  ;;  %v604_v7 = vsel %vm299_vm5, %v602_v60, %v603_v48 }
 0x118   : > { %v823_v48 = vmul.f32 %v822_v43, %v2843_v28  ;;  %v774_v63 = vrot.slane %v768_v49, 6  ;;  %v969_v42 = vstv %s2406_s7  ;;  %v951_v49 = vmul.f32 %v949_v40, %v2847_v31  ;;  %s3289_s7 = sld [smem:[#allocation8 + $0x32]] }
 0x119   : > { %v630_v8 = vrot.slane %v623_v55, 6  ;;  %v868_v55 = vstv %s2401_s25  ;;  %v971_v43 = vmul.f32 %v969_v42, %v2847_v31  ;;  %v972_v44 = vmul.f32 %v969_v42, %v2851_v34  ;;  %s2681_s25 = smov 122  }
 0x11a   : > { %v870_v2 = vmul.f32 %v868_v55, %v2847_v31  ;;  %v871_v60 = vmul.f32 %v868_v55, %v2851_v34  ;;  %v869_v10 = vmul.f32 %v868_v55, %v2843_v28 }
 0x11b   : > { %487 = vrot.lane.b32.xlu0 %v484_v18, %s2676_s16  ;;  %462 = vrot.lane.b32.xlu1 %v459_v17, %s2676_s16  ;;  %v723_v17 = vmul.f32 %v721_v16, %v2847_v31  ;;  %v686_v18 = vsel %vm262_vm4, %v683_v62, %v685_v13  ;;  %v631_v20 = vsel %vm336_vm6, %v628_v56, %v630_v8  ;;  %v979_v53 = vrot.slane %v972_v44, 2 }
 0x11c   : > { %v876_v13 = vrot.slane %v870_v2, 4  ;;  %v878_v8 = vrot.slane %v871_v60, 4 }
 0x11d   : > { %v729_v29 = vrot.slane %v723_v17, 4 }
 0x11f   : > { %540 = vrot.lane.b32.xlu0 %v537_v33, %s2677_s30  ;;  %485 = vrot.lane.b32.xlu1 %v482_v61, %s2676_s16  ;;  %v684_v61 = vsel %vm262_vm4, %v682_v24, %v683_v62  ;;  %v724_v33 = vmul.f32 %v721_v16, %v2851_v34  ;;  %v730_v14 = vsel %vm299_vm5, %v728_v35, %v729_v29 }
 0x123   : > { %561 = vrot.lane.b32.xlu0 %v558_v59, %s2677_s30  ;;  %542 = vrot.lane.b32.xlu1 %v539_v41, %s2677_s30  ;;  %v731_v59 = vrot.slane %v724_v33, 4  ;;  %v770_v41 = vmul.f32 %v767_v37, %v2851_v34 }
 0x125   : > { %v732_v45 = vsel %vm299_vm5, %v729_v29, %v731_v59  ;;  %v950_v59 = vmul.f32 %v949_v40, %v2843_v28 }
 0x127   : > { %588 = vrot.lane.b32.xlu0 %v585_v46, %s2677_s30  ;;  %563 = vrot.lane.b32.xlu1 %v560_v47, %s2677_s30  ;;  %v775_v46 = vrot.slane %v769_v21, 6  ;;  %v777_v47 = vrot.slane %v770_v41, 6  ;;  %v936_v21 = vmul.f32 %v935_v9, %v2843_v28  ;;  %v937_v41 = vmul.f32 %v935_v9, %v2847_v31 }
 0x129   : > { %v778_v51 = vsel %vm336_vm6, %v775_v46, %v777_v47  ;;  %v776_v6 = vsel %vm336_vm6, %v774_v63, %v775_v46 }
 0x12b   : > { %609 = vrot.lane.b32.xlu0 %v606_v4, %s2677_s30  ;;  %586 = vrot.lane.b32.xlu1 %v583_v54, %s2677_s30  ;;  %v829_v54 = vrot.slane %v823_v48, 2  ;;  %v844_v4 = vmul.f32 %v2910_v3, %v2843_v28  ;;  %v952_v48 = vmul.f32 %v949_v40, %v2851_v34 }
 0x12d   : > { %v831_v57 = vsel %vm262_vm4, %v829_v54, %v830_v50  ;;  %v850_v62 = vrot.slane %v844_v4, 2 }
 0x12f   : > { %632 = vrot.lane.b32.xlu0 %v629_v5, %s2677_s30  ;;  %607 = vrot.lane.b32.xlu1 %v604_v7, %s2677_s30  ;;  %v852_v5 = vsel %vm262_vm4, %v850_v62, %v851_v19  ;;  %v833_v7 = vsel %vm262_vm4, %v830_v50, %v832_v12  ;;  %v875_v19 = vrot.slane %v869_v10, 4  ;;  %v1015_v12 = vstv %s2408_s27  ;;  %s2427_s27 = sld [smem:[#allocation8 + $0x40]] }
 0x130   : > { %v1017_v62 = vmul.f32 %v1015_v12, %v2847_v31 }
 0x131   : > { %v877_v29 = vsel %vm299_vm5, %v875_v19, %v876_v13 }
 0x133   : > { %689 = vrot.lane.b32.xlu0 %v686_v18, %s2678_s3  ;;  %634 = vrot.lane.b32.xlu1 %v631_v20, %s2677_s30  ;;  %v914_v18 = vstv %s2403_s20  ;;  %v879_v20 = vsel %vm299_vm5, %v876_v13, %v878_v8  ;;  %s2415_s20 = sld [smem:[#allocation8 + $0x22]] }
 0x134   : > { %v916_v11 = vmul.f32 %v914_v18, %v2847_v31  ;;  %v915_v22 = vmul.f32 %v914_v18, %v2843_v28 }
 0x137   : > { %710 = vrot.lane.b32.xlu0 %v707_v58, %s2678_s3  ;;  %687 = vrot.lane.b32.xlu1 %v684_v61, %s2678_s3  ;;  %v922_v58 = vrot.slane %v916_v11, 6  ;;  %v917_v61 = vmul.f32 %v914_v18, %v2851_v34  ;;  %v1036_v18 = vstv %s2409_s28  ;;  %v1023_v11 = vrot.slane %v1017_v62, 4  ;;  %s2428_s28 = sld [smem:[#allocation8 + $0x47]] }
 0x138   : > { %v1038_v19 = vmul.f32 %v1036_v18, %v2847_v31  ;;  %v1116_v62 = vstv %s2413_s6  ;;  %s2431_s6 = sld [smem:[#allocation8 + $0x5c]] }
 0x139   : > { %v924_v37 = vrot.slane %v917_v61, 6 }
 0x13a   : > { %v1044_v30 = vrot.slane %v1038_v19, 4 }
 0x13b   : > { %733 = vrot.lane.b32.xlu0 %v730_v14, %s2678_s3  ;;  %708 = vrot.lane.b32.xlu1 %v705_v39, %s2678_s3  ;;  %v925_v39 = vsel %vm336_vm6, %v922_v58, %v924_v37  ;;  %v1061_v37 = vstv %s2410_s4  ;;  %s2429_s4 = sld [smem:[#allocation8 + $0x4e]] }
 0x13c   : > { %v1063_v40 = vmul.f32 %v1061_v37, %v2847_v31  ;;  %v1062_v44 = vmul.f32 %v1061_v37, %v2843_v28 }
 0x13f   : > { %754 = vrot.lane.b32.xlu0 %v751_v1, %s2678_s3  ;;  %735 = vrot.lane.b32.xlu1 %v732_v45, %s2678_s3  ;;  %v970_v1 = vmul.f32 %v969_v42, %v2843_v28  ;;  %v990_v45 = vstv %s2407_s17  ;;  %s2426_s17 = sld [smem:[#allocation8 + $0x39]] }
 0x140   : > { %v992_v50 = vmul.f32 %v990_v45, %v2847_v31  ;;  %v991_v63 = vmul.f32 %v990_v45, %v2843_v28 }
 0x141   : > { %v976_v54 = vrot.slane %v970_v1, 2 }
 0x142   : > { %v998_v55 = vrot.slane %v992_v50, 2 }
 0x143   : > { %781 = vrot.lane.b32.xlu0 %v778_v51, %s2678_s3  ;;  %756 = vrot.lane.b32.xlu1 %v753_v52, %s2678_s3  ;;  %v993_v51 = vmul.f32 %v990_v45, %v2851_v34  ;;  %v977_v52 = vrot.slane %v971_v43, 2  ;;  %v1064_v43 = vmul.f32 %v1061_v37, %v2851_v34 }
 0x145   : > { %v3093_v56 = vpop.permute.xlu0 %352  ;;  %v980_v2 = vsel %vm262_vm4, %v977_v52, %v979_v53  ;;  %v978_v60 = vsel %vm262_vm4, %v976_v54, %v977_v52  ;;  %v1071_v50 = vrot.slane %v1064_v43, 6 }
 0x147   : > { %834 = vrot.lane.b32.xlu0 %v831_v57, %s2679_s19  ;;  %779 = vrot.lane.b32.xlu1 %v776_v6, %s2678_s3  ;;  %v1000_v6 = vrot.slane %v993_v51, 2  ;;  %v1068_v51 = vrot.slane %v1062_v44, 6  ;;  %v1162_v44 = vstv %s2415_s20  ;;  %s2433_s20 = sld [smem:[#allocation8 + $0x3a]] }
 0x149   : > { %v3101_v0 = vpop.permute.xlu1 %354  ;;  %v3103_v3 = vpop.permute.xlu0 %368  ;;  %v1001_v10 = vsel %vm262_vm4, %v998_v55, %v1000_v6 }
 0x14b   : > { %855 = vrot.lane.b32.xlu0 %v852_v5, %s2679_s19  ;;  %836 = vrot.lane.b32.xlu1 %v833_v7, %s2679_s19  ;;  %v997_v5 = vrot.slane %v991_v63, 2  ;;  %v1016_v7 = vmul.f32 %v1015_v12, %v2843_v28 }
 0x14d   : > { %v3112_v16 = vpop.permute.xlu1 %370  ;;  %v3114_v17 = vpop.permute.xlu0 %372  ;;  %v1022_v23 = vrot.slane %v1016_v7, 4  ;;  %v1118_v7 = vmul.f32 %v1116_v62, %v2847_v31 }
 0x14f   : > { %882 = vrot.lane.b32.xlu0 %v879_v20, %s2679_s19  ;;  %857 = vrot.lane.b32.xlu1 %v2957_v25, %s2679_s19  ;;  %v921_v25 = vrot.slane %v915_v22, 6  ;;  %v999_v20 = vsel %vm262_vm4, %v997_v5, %v998_v55  ;;  %v1018_v22 = vmul.f32 %v1015_v12, %v2851_v34  ;;  %v1082_v55 = vstv %s2411_s5  ;;  %s2430_s5 = sld [smem:[#allocation8 + $0x55]] }
 0x150   : > { %v1096_v5 = vstv %s2412_s8  ;;  %s2432_s8 = sld [smem:[#allocation8 + $0x33]] }
 0x151   : > { %v3126_v24 = vpop.permute.xlu1 %499  ;;  %v3128_v26 = vpop.permute.xlu0 %501  ;;  %v923_v35 = vsel %vm336_vm6, %v921_v25, %v922_v58  ;;  %v1024_v25 = vsel %vm299_vm5, %v1022_v23, %v1023_v11  ;;  %v1097_v19 = vmul.f32 %v1096_v5, %v2843_v28  ;;  %v1124_v23 = vrot.slane %v1118_v7, 2 }
 0x152   : > { %v1099_v37 = vmul.f32 %v1096_v5, %v2851_v34 }
 0x153   : > { %903 = vrot.lane.b32.xlu0 %v2977_v38, %s2679_s19  ;;  %880 = vrot.lane.b32.xlu1 %v877_v29, %s2679_s19  ;;  %v1037_v29 = vmul.f32 %v1036_v18, %v2843_v28 }
 0x155   : > { %v3135_v33 = vpop.permute.xlu1 %515  ;;  %v3137_v15 = vpop.permute.xlu0 %517  ;;  %v1043_v9 = vrot.slane %v1037_v29, 4 }
 0x156   : > { %4153 = vst [vmem:[#allocation13_spill] sm:$0xff] %v3135_v33  ;;  %4154 = vst [vmem:[#allocation14_spill] sm:$0xff] %v3137_v15 }
 0x157   : > { %926 = vrot.lane.b32.xlu0 %v923_v35, %s2679_s19  ;;  %901 = vrot.lane.b32.xlu1 %v898_v36, %s2679_s19  ;;  %v1025_v35 = vrot.slane %v1018_v22, 4  ;;  %v1039_v36 = vmul.f32 %v1036_v18, %v2851_v34  ;;  %v1137_v22 = vstv %s2414_s24  ;;  %s2434_s24 = sld [smem:[#allocation8 + $0x41]] }
 0x158   : > { %v1139_v29 = vmul.f32 %v1137_v22, %v2847_v31 }
 0x159   : > { %v3146_v38 = vpop.permute.xlu1 %519  ;;  %v3148_v14 = vpop.permute.xlu0 %646  ;;  %v1046_v42 = vrot.slane %v1039_v36, 4 }
 0x15a   : > { %4155 = vst [vmem:[#allocation15_spill] sm:$0xff] %v3148_v14 }
 0x15b   : > { %940 = vrot.lane.b32.xlu0 %v936_v21, %s2680_s26  ;;  %928 = vrot.lane.b32.xlu1 %v925_v39, %s2679_s19 }
 0x15d   : > { %v3154_v27 = vpop.permute.xlu1 %648  ;;  %v3156_v32 = vpop.permute.xlu0 %662 }
 0x15e   : > { %4156 = vst [vmem:[#allocation16_spill] sm:$0xff] %v3154_v27  ;;  %4157 = vst [vmem:[#allocation17_spill] sm:$0xff] %v3156_v32 }
 0x15f   : > { %956 = vrot.lane.b32.xlu0 %v950_v59, %s2680_s26  ;;  %942 = vrot.lane.b32.xlu1 %v937_v41, %s2680_s26  ;;  %v1045_v59 = vsel %vm299_vm5, %v1043_v9, %v1044_v30  ;;  %v1026_v41 = vsel %vm299_vm5, %v1023_v11, %v1025_v35  ;;  %v1098_v11 = vmul.f32 %v1096_v5, %v2847_v31 }
 0x160   : > { %v1138_v35 = vmul.f32 %v1137_v22, %v2843_v28 }
 0x161   : > { %v3165_v46 = vpop.permute.xlu1 %664  ;;  %v3167_v47 = vpop.permute.xlu0 %666 }
 0x162   : > { %4158 = vst [vmem:[#allocation18_spill] sm:$0xff] %v3165_v46  ;;  %4159 = vst [vmem:[#allocation19_spill] sm:$0xff] %v3167_v47  ;;  %v1144_v43 = vrot.slane %v1138_v35, 2 }
 0x163   : > { %960 = vrot.lane.b32.xlu0 %v952_v48, %s2680_s26  ;;  %958 = vrot.lane.b32.xlu1 %v951_v49, %s2680_s26  ;;  %v1047_v48 = vsel %vm299_vm5, %v1044_v30, %v1046_v42  ;;  %v1069_v49 = vrot.slane %v1063_v40, 6 }
 0x165   : > { %v3176_v4 = vpop.permute.xlu1 %793  ;;  %v3178_v57 = vpop.permute.xlu0 %795  ;;  %v1072_v54 = vsel %vm336_vm6, %v1069_v49, %v1071_v50  ;;  %v1070_v63 = vsel %vm336_vm6, %v1068_v51, %v1069_v49  ;;  %v1164_v50 = vmul.f32 %v1162_v44, %v2847_v31  ;;  %v1165_v51 = vmul.f32 %v1162_v44, %v2851_v34 }
 0x166   : > { %4160 = vst [vmem:[#allocation20_spill] sm:$0xff] %v3176_v4  ;;  %4161 = vst [vmem:[#allocation21_spill] sm:$0xff] %v3178_v57 }
 0x167   : > { %983 = vrot.lane.b32.xlu0 %v980_v2, %s2680_s26  ;;  %981 = vrot.lane.b32.xlu1 %v978_v60, %s2680_s26  ;;  %v1084_v2 = vmul.f32 %v1082_v55, %v2847_v31  ;;  %v1083_v60 = vmul.f32 %v1082_v55, %v2843_v28  ;;  %v1170_v5 = vrot.slane %v1164_v50, 4  ;;  %v1172_v7 = vrot.slane %v1165_v51, 4 }
 0x169   : > { %v3186_v13 = vpop.permute.xlu1 %809  ;;  %v3188_v8 = vpop.permute.xlu0 %811  ;;  %v1173_v35 = vsel %vm299_vm5, %v1170_v5, %v1172_v7 }
 0x16a   : > { %4162 = vst [vmem:[#allocation22_spill] sm:$0xff] %v3186_v13  ;;  %4163 = vst [vmem:[#allocation23_spill] sm:$0xff] %v3188_v8 }
 0x16b   : > { %1004 = vrot.lane.b32.xlu0 %v1001_v10, %s2680_s26  ;;  %1002 = vrot.lane.b32.xlu1 %v999_v20, %s2680_s26  ;;  %v1117_v10 = vmul.f32 %v1116_v62, %v2843_v28 }
 0x16d   : > { %v3197_v58 = vpop.permute.xlu1 %813  ;;  %v3199_v61 = vpop.permute.xlu0 %464  ;;  %v1123_v30 = vrot.slane %v1117_v10, 2  ;;  %v1183_v10 = vstv %s2416_s23  ;;  %s2435_s23 = sld [smem:[#allocation8 + $0x48]] }
 0x16e   : > { %4164 = vst [vmem:[#allocation24_spill] sm:$0xff] %v3197_v58 }
 0x16f   : > { %1027 = vrot.lane.b32.xlu0 %v1024_v25, %s2680_s26  ;;  %1006 = vrot.lane.b32.xlu1 %v1000_v6, %s2680_s26  ;;  %v1119_v25 = vmul.f32 %v1116_v62, %v2851_v34  ;;  %v1125_v40 = vsel %vm262_vm4, %v1123_v30, %v1124_v23 }
 0x171   : > { %v3205_v21 = vpop.permute.xlu1 %418  ;;  %v3207_v39 = vpop.permute.xlu0 %565 }
 0x173   : > { %1048 = vrot.lane.b32.xlu0 %v1045_v59, %s2680_s26  ;;  %1029 = vrot.lane.b32.xlu1 %v1026_v41, %s2680_s26  ;;  %v1145_v59 = vrot.slane %v1139_v29, 2  ;;  %v1126_v41 = vrot.slane %v1119_v25, 2  ;;  %v1184_v29 = vmul.f32 %v1183_v10, %v2843_v28 }
 0x175   : > { %v3216_v1 = vpop.permute.xlu1 %611  ;;  %v3218_v45 = vpop.permute.xlu0 %758 }
 0x176   : > { %4165 = vst [vmem:[#allocation25_spill] sm:$0xff] %v3216_v1  ;;  %4166 = vst [vmem:[#allocation26_spill] sm:$0xff] %v3218_v45 }
 0x177   : > { %1052 = vrot.lane.b32.xlu0 %v1046_v42, %s2680_s26  ;;  %1050 = vrot.lane.b32.xlu1 %v1047_v48, %s2680_s26  ;;  %v1140_v42 = vmul.f32 %v1137_v22, %v2851_v34  ;;  %v1186_v22 = vmul.f32 %v1183_v10, %v2851_v34 }
 0x179   : > { %v3223_v52 = vpop.permute.xlu1 %712  ;;  %v3225_v53 = vpop.permute.xlu0 %859  ;;  %v1147_v55 = vrot.slane %v1140_v42, 2 }
 0x17a   : > { %4167 = vst [vmem:[#allocation27_spill] sm:$0xff] %v3223_v52  ;;  %4168 = vst [vmem:[#allocation28_spill] sm:$0xff] %v3225_v53  ;;  %v1415_v53 = vstv %s2429_s4  ;;  %s2442_s4 = sld [smem:[#allocation8 + $0x49]] }
 0x17b   : > { %1075 = vrot.lane.b32.xlu0 %v1072_v54, %s2680_s26  ;;  %1073 = vrot.lane.b32.xlu1 %v1070_v63, %s2680_s26  ;;  %v1146_v54 = vsel %vm262_vm4, %v1144_v43, %v1145_v59  ;;  %v1127_v63 = vsel %vm262_vm4, %v1124_v23, %v1126_v41  ;;  %v1193_v41 = vrot.slane %v1186_v22, 4  ;;  %v1190_v43 = vrot.slane %v1184_v29, 4 }
 0x17d   : > { %v3231_v6 = vpop.permute.xlu1 %905  ;;  %v3233_v12 = vpop.permute.xlu0 %395 }
 0x17e   : > { %4169 = vst [vmem:[#allocation29_spill] sm:$0xff] %v3231_v6 }
 0x17f   : > { %1089 = vrot.lane.b32.xlu0 %v1084_v2, %s2681_s25  ;;  %1087 = vrot.lane.b32.xlu1 %v1083_v60, %s2681_s25  ;;  %v1163_v2 = vmul.f32 %v1162_v44, %v2843_v28 }
 0x181   : > { %v3241_v18 = vpop.permute.xlu1 %393  ;;  %v3243_v20 = vpop.permute.xlu0 %416  ;;  %v1169_v23 = vrot.slane %v1163_v2, 4 }
 0x182   : > { %4170 = vst [vmem:[#allocation30_spill] sm:$0xff] %v3243_v20 }
 0x183   : > { %1105 = vrot.lane.b32.xlu0 %v1098_v11, %s2681_s25  ;;  %1103 = vrot.lane.b32.xlu1 %v1097_v19, %s2681_s25  ;;  %v1148_v11 = vsel %vm262_vm4, %v1145_v59, %v1147_v55  ;;  %v1185_v19 = vmul.f32 %v1183_v10, %v2847_v31 }
 0x185   : > { %v3252_v36 = vpop.permute.xlu1 %414  ;;  %v3254_v9 = vpop.permute.xlu0 %439  ;;  %v1191_v59 = vrot.slane %v1185_v19, 4 }
 0x187   : > { %1128 = vrot.lane.b32.xlu0 %v1125_v40, %s2681_s25  ;;  %1107 = vrot.lane.b32.xlu1 %v1099_v37, %s2681_s25  ;;  %v1208_v37 = vstv %s2417_s29  ;;  %v1171_v40 = vsel %vm299_vm5, %v1169_v23, %v1170_v5  ;;  %s2436_s29 = sld [smem:[#allocation8 + $0x4f]] }
 0x188   : > { %v1210_v42 = vmul.f32 %v1208_v37, %v2847_v31  ;;  %v1209_v44 = vmul.f32 %v1208_v37, %v2843_v28  ;;  %v1211_v31 = vmul.f32 %v1208_v37, %v2851_v34  ;;  %v3311_v34 = vld [vmem:[#allocation3] sm:$0xff]  ;;  %v1369_v37 = vstv %s2427_s27  ;;  %s2440_s27 = sld [smem:[#allocation8 + $0x3b]] }
 0x189   : > { %v3261_v48 = vpop.permute.xlu1 %441  ;;  %v3263_v49 = vpop.permute.xlu0 %460  ;;  %v1416_v58 = vmul.f32 %v1415_v53, %v3311_v34 }
 0x18a   : > { %4171 = vst [vmem:[#allocation31_spill] sm:$0xff] %v3263_v49  ;;  %v1215_v2 = vrot.slane %v1209_v44, 6  ;;  %v1218_v10 = vrot.slane %v1211_v31, 6  ;;  %v1390_v31 = vstv %s2428_s28  ;;  %s2441_s28 = sld [smem:[#allocation8 + $0x42]] }
 0x18b   : > { %1149 = vrot.lane.b32.xlu0 %v1146_v54, %s2681_s25  ;;  %1130 = vrot.lane.b32.xlu1 %v1127_v63, %s2681_s25  ;;  %v1192_v54 = vsel %vm299_vm5, %v1190_v43, %v1191_v59  ;;  %v1194_v63 = vsel %vm299_vm5, %v1191_v59, %v1193_v41  ;;  %v3323_v59 = vld [vmem:[#allocation3 + $0x10] sm:$0x3f] }
 0x18d   : > { %v3272_v60 = vpop.permute.xlu1 %462  ;;  %v3274_v62 = vpop.permute.xlu0 %487  ;;  %v1562_v32 = vstv %s2436_s29  ;;  %s2450_s29 = sld [smem:[#allocation8 + $0x51]] }
 0x18e   : > { %4172 = vst [vmem:[#allocation32_spill] sm:$0xff] %v3272_v60 }
 0x18f   : > { %1153 = vrot.lane.b32.xlu0 %v1147_v55, %s2681_s25  ;;  %1151 = vrot.lane.b32.xlu1 %v1148_v11, %s2681_s25  ;;  %v1216_v55 = vrot.slane %v1210_v42, 6  ;;  %v1335_v11 = vstv %s3289_s7  ;;  %s2438_s7 = sld [smem:[#allocation8 + $0x5d]] }
 0x190   : > { %v1336_v23 = vmul.f32 %v1335_v11, %v3311_v34 }
 0x191   : > { %v3282_v25 = vpop.permute.xlu1 %485  ;;  %v3284_v30 = vpop.permute.xlu0 %540  ;;  %v1217_v7 = vsel %vm336_vm6, %v1215_v2, %v1216_v55  ;;  %v1219_v29 = vsel %vm336_vm6, %v1216_v55, %v1218_v10  ;;  %v1372_v55 = vmul.f32 %v1369_v37, %v3323_v59 }
 0x193   : > { %1176 = vrot.lane.b32.xlu0 %v1173_v35, %s2681_s25  ;;  %1174 = vrot.lane.b32.xlu1 %v1171_v40, %s2681_s25  ;;  %v1349_v35 = vstv %s2426_s17  ;;  %v3321_v40 = vld [vmem:[#allocation3 + $0x8] sm:$0xff]  ;;  %s3461_s17 = sld [smem:[#allocation8 + $0x34]] }
 0x194   : > { %v1337_v43 = vmul.f32 %v1335_v11, %v3321_v40  ;;  %v1350_v44 = vmul.f32 %v1349_v35, %v3311_v34  ;;  %v1351_v2 = vmul.f32 %v1349_v35, %v3321_v40  ;;  %v1352_v11 = vmul.f32 %v1349_v35, %v3323_v59 }
 0x195   : > { %v3294_v50 = vpop.permute.xlu1 %542  ;;  %v3296_v51 = vpop.permute.xlu0 %561 }
 0x196   : > { %4173 = vst [vmem:[#allocation33_spill] sm:$0xff] %v3296_v51 }
 0x197   : > { %1195 = vrot.lane.b32.xlu1 %v1192_v54, %s2681_s25  ;;  %1197 = vrot.lane.b32.xlu0 %v1194_v63, %s2681_s25  ;;  %v1370_v54 = vmul.f32 %v1369_v37, %v3311_v34  ;;  %v1371_v63 = vmul.f32 %v1369_v37, %v3321_v40  ;;  %v1393_v37 = vmul.f32 %v1390_v31, %v3323_v59 }
 0x199   : > { %v3303_v28 = vpop.permute.xlu1 %563  ;;  %v3305_v5 = vpop.permute.xlu0 %588  ;;  %v1376_v6 = vrot.slane %v1370_v54, 2  ;;  %v1377_v8 = vrot.slane %v1371_v63, 2  ;;  %v1400_v54 = vrot.slane %v1393_v37, 2  ;;  %v1417_v63 = vmul.f32 %v1415_v53, %v3321_v40 }
 0x19a   : > { %4174 = vst [vmem:[#allocation34_spill] sm:$0xff] %v3303_v28  ;;  %4175 = vst [vmem:[#allocation35_spill] sm:$0xff] %v3305_v5 }
 0x19b   : > { %1199 = vrot.lane.b32.xlu1 %v1193_v41, %s2681_s25  ;;  %1220 = vrot.lane.b32.xlu0 %v1217_v7, %s2681_s25  ;;  %v1378_v4 = vsel %vm262_vm4, %v1376_v6, %v1377_v8  ;;  %v1418_v6 = vmul.f32 %v1415_v53, %v3323_v59  ;;  %v1423_v37 = vrot.slane %v1417_v63, 4  ;;  %v1461_v63 = vstv %s2431_s6  ;;  %s2445_s6 = sld [smem:[#allocation8 + $0x5e]] }
 0x19d   : > { %v3313_v19 = vpop.permute.xlu1 %586  ;;  %v3315_v22 = vpop.permute.xlu0 %609 }
 0x19e   : > { %4176 = vst [vmem:[#allocation36_spill] sm:$0xff] %v3313_v19  ;;  %4177 = vst [vmem:[#allocation37_spill] sm:$0xff] %v3315_v22 }
 0x19f   : > { %1222 = vrot.lane.b32.xlu1 %v1219_v29, %s2681_s25  ;;  %1340 = vrot.lane.b32.xlu0 %v1336_v23, %s2676_s16  ;;  %v1391_v23 = vmul.f32 %v1390_v31, %v3311_v34  ;;  %v1392_v29 = vmul.f32 %v1390_v31, %v3321_v40 }
 0x1a1   : > { %v3325_v41 = vpop.permute.xlu1 %607  ;;  %v3327_v42 = vpop.permute.xlu0 %632  ;;  %v1397_v57 = vrot.slane %v1391_v23, 2  ;;  %v1398_v35 = vrot.slane %v1392_v29, 2  ;;  %v1422_v29 = vrot.slane %v1416_v58, 4 }
 0x1a2   : > { %4178 = vst [vmem:[#allocation38_spill] sm:$0xff] %v3325_v41  ;;  %4179 = vst [vmem:[#allocation39_spill] sm:$0xff] %v3327_v42 }
 0x1a3   : > { %1342 = vrot.lane.b32.xlu1 %v1337_v43, %s2676_s16  ;;  %1356 = vrot.lane.b32.xlu0 %v1350_v44, %s2676_s16  ;;  %v1379_v43 = vrot.slane %v1372_v55, 2  ;;  %v1436_v55 = vstv %s2430_s5  ;;  %v1399_v23 = vsel %vm262_vm4, %v1397_v57, %v1398_v35  ;;  %v1424_v58 = vsel %vm299_vm5, %v1422_v29, %v1423_v37  ;;  %s2443_s5 = sld [smem:[#allocation8 + $0x50]] }
 0x1a4   : > { %v1439_v57 = vmul.f32 %v1436_v55, %v3323_v59  ;;  %v1463_v29 = vmul.f32 %v1461_v63, %v3321_v40 }
 0x1a5   : > { %v3337_v7 = vpop.permute.xlu1 %634  ;;  %v3339_v10 = vpop.permute.xlu0 %689  ;;  %v1380_v31 = vsel %vm262_vm4, %v1377_v8, %v1379_v43  ;;  %v1401_v8 = vsel %vm262_vm4, %v1398_v35, %v1400_v54  ;;  %v1437_v43 = vmul.f32 %v1436_v55, %v3311_v34 }
 0x1a6   : > { %4180 = vst [vmem:[#allocation40_spill] sm:$0xff] %v3337_v7  ;;  %4181 = vst [vmem:[#allocation41_spill] sm:$0xff] %v3339_v10  ;;  %v1446_v45 = vrot.slane %v1439_v57, 4  ;;  %v1469_v57 = vrot.slane %v1463_v29, 6 }
 0x1a7   : > { %1358 = vrot.lane.b32.xlu1 %v1351_v2, %s2676_s16  ;;  %1360 = vrot.lane.b32.xlu0 %v1352_v11, %s2676_s16  ;;  %v1443_v53 = vrot.slane %v1437_v43, 4  ;;  %v1464_v43 = vmul.f32 %v1461_v63, %v3323_v59 }
 0x1a9   : > { %v3347_v44 = vpop.permute.xlu1 %687  ;;  %v3349_v13 = vpop.permute.xlu0 %710 }
 0x1aa   : > { %4182 = vst [vmem:[#allocation42_spill] sm:$0xff] %v3347_v44  ;;  %4183 = vst [vmem:[#allocation43_spill] sm:$0xff] %v3349_v13 }
 0x1ab   : > { %1381 = vrot.lane.b32.xlu1 %v1378_v4, %s2676_s16  ;;  %1383 = vrot.lane.b32.xlu0 %v1380_v31, %s2676_s16  ;;  %v1438_v4 = vmul.f32 %v1436_v55, %v3321_v40  ;;  %v1462_v55 = vmul.f32 %v1461_v63, %v3311_v34 }
 0x1ad   : > { %v3357_v2 = vpop.permute.xlu1 %708  ;;  %v3359_v11 = vpop.permute.xlu0 %733  ;;  %v1444_v35 = vrot.slane %v1438_v4, 4 }
 0x1ae   : > { %4184 = vst [vmem:[#allocation44_spill] sm:$0xff] %v3357_v2  ;;  %4185 = vst [vmem:[#allocation45_spill] sm:$0xff] %v3359_v11  ;;  %v1425_v2 = vrot.slane %v1418_v6, 4 }
 0x1af   : > { %1402 = vrot.lane.b32.xlu1 %v1399_v23, %s2676_s16  ;;  %1404 = vrot.lane.b32.xlu0 %v1401_v8, %s2676_s16  ;;  %v1445_v6 = vsel %vm299_vm5, %v1443_v53, %v1444_v35 }
 0x1b0   : > { %v1426_v8 = vsel %vm299_vm5, %v1423_v37, %v1425_v2  ;;  %v1447_v2 = vsel %vm299_vm5, %v1444_v35, %v1446_v45  ;;  %v1468_v37 = vrot.slane %v1462_v55, 6  ;;  %v1516_v35 = vstv %s2434_s24  ;;  %s3547_s24 = sld [smem:[#allocation8 + $0x35]] }
 0x1b1   : > { %v3368_v31 = vpop.permute.xlu1 %735  ;;  %v3370_v13 = vpop.permute.xlu0 %754 }
 0x1b2   : > { %4186 = vst [vmem:[#allocation46_spill] sm:$0xff] %v3368_v31  ;;  %4187 = vst [vmem:[#allocation47_spill] sm:$0xff] %v3370_v13 }
 0x1b3   : > { %1406 = vrot.lane.b32.xlu1 %v1400_v54, %s2676_s16  ;;  %1427 = vrot.lane.b32.xlu0 %v1424_v58, %s2676_s16  ;;  %v1471_v58 = vrot.slane %v1464_v43, 6 }
 0x1b5   : > { %v3376_v46 = vpop.permute.xlu1 %756  ;;  %v3378_v23 = vpop.permute.xlu0 %781 }
 0x1b6   : > { %4188 = vst [vmem:[#allocation48_spill] sm:$0xff] %v3376_v46  ;;  %4189 = vst [vmem:[#allocation49_spill] sm:$0xff] %v3378_v23 }
 0x1b7   : > { %1429 = vrot.lane.b32.xlu1 %v1426_v8, %s2676_s16  ;;  %1448 = vrot.lane.b32.xlu0 %v1445_v6, %s2676_s16  ;;  %v1470_v8 = vsel %vm336_vm6, %v1468_v37, %v1469_v57  ;;  %v1472_v6 = vsel %vm336_vm6, %v1469_v57, %v1471_v58  ;;  %v1518_v37 = vmul.f32 %v1516_v35, %v3321_v40  ;;  %v1537_v57 = vstv %s2435_s23  ;;  %s2422_s23 = sld [smem:[#allocation8 + $0x4d]] }
 0x1b8   : > { %v1538_v46 = vmul.f32 %v1537_v57, %v3311_v34 }
 0x1b9   : > { %v3387_v54 = vpop.permute.xlu1 %779  ;;  %v3389_v4 = vpop.permute.xlu0 %834 }
 0x1ba   : > { %4190 = vst [vmem:[#allocation50_spill] sm:$0xff] %v3387_v54  ;;  %4191 = vst [vmem:[#allocation51_spill] sm:$0xff] %v3389_v4  ;;  %v1482_v4 = vstv %s2432_s8  ;;  %s2448_s8 = sld [smem:[#allocation8 + $0x43]] }
 0x1bb   : > { %1450 = vrot.lane.b32.xlu1 %v1447_v2, %s2676_s16  ;;  %1452 = vrot.lane.b32.xlu0 %v1446_v45, %s2676_s16  ;;  %v1483_v45 = vmul.f32 %v1482_v4, %v3311_v34  ;;  %v1484_v43 = vmul.f32 %v1482_v4, %v3321_v40  ;;  %v1496_v2 = vstv %s2433_s20  ;;  %v1519_v4 = vmul.f32 %v1516_v35, %v3323_v59  ;;  %s2420_s20 = sld [smem:[#allocation8 + $0x3f]] }
 0x1bd   : > { %v3394_v53 = vpop.permute.xlu1 %836  ;;  %v3396_v63 = vpop.permute.xlu0 %855  ;;  %v1526_v13 = vrot.slane %v1519_v4, 2 }
 0x1be   : > { %4192 = vst [vmem:[#allocation52_spill] sm:$0xff] %v3394_v53  ;;  %4193 = vst [vmem:[#allocation53_spill] sm:$0xff] %v3396_v63  ;;  %v1517_v63 = vmul.f32 %v1516_v35, %v3311_v34  ;;  %v1524_v53 = vrot.slane %v1518_v37, 2  ;;  %v1540_v35 = vmul.f32 %v1537_v57, %v3323_v59  ;;  %v1544_v37 = vrot.slane %v1538_v46, 2 }
 0x1bf   : > { %1473 = vrot.lane.b32.xlu1 %v1470_v8, %s2676_s16  ;;  %1475 = vrot.lane.b32.xlu0 %v1472_v6, %s2676_s16  ;;  %v1497_v6 = vmul.f32 %v1496_v2, %v3311_v34  ;;  %s2437_s16 = sld [smem:[#allocation8 + $0x56]] }
 0x1c1   : > { %v3402_v55 = vpop.permute.xlu1 %857  ;;  %v3404_v29 = vpop.permute.xlu0 %882 }
 0x1c2   : > { %4194 = vst [vmem:[#allocation54_spill] sm:$0xff] %v3402_v55  ;;  %4195 = vst [vmem:[#allocation55_spill] sm:$0xff] %v3404_v29  ;;  %v1498_v55 = vmul.f32 %v1496_v2, %v3321_v40  ;;  %v1523_v29 = vrot.slane %v1517_v63, 2 }
 0x1c3   : > { %1487 = vrot.lane.b32.xlu1 %v1483_v45, %s2677_s30  ;;  %1489 = vrot.lane.b32.xlu0 %v1484_v43, %s2677_s30  ;;  %v1539_v45 = vmul.f32 %v1537_v57, %v3321_v40  ;;  %v1527_v57 = vsel %vm262_vm4, %v1524_v53, %v1526_v13 }
 0x1c4   : > { %v1525_v63 = vsel %vm262_vm4, %v1523_v29, %v1524_v53  ;;  %v1547_v29 = vrot.slane %v1540_v35, 2 }
 0x1c5   : > { %v3412_v58 = vpop.permute.xlu1 %880  ;;  %v3414_v8 = vpop.permute.xlu0 %903  ;;  %v1545_v23 = vrot.slane %v1539_v45, 2  ;;  %v1583_v4 = vstv %s2437_s16  ;;  %v1565_v45 = vmul.f32 %v1562_v32, %v3323_v59  ;;  %s2447_s16 = sld [smem:[#allocation8 + $0x3c]] }
 0x1c6   : > { %4196 = vst [vmem:[#allocation56_spill] sm:$0xff] %v3412_v58  ;;  %4197 = vst [vmem:[#allocation57_spill] sm:$0xff] %v3414_v8  ;;  %v1499_v58 = vmul.f32 %v1496_v2, %v3323_v59  ;;  %v1564_v2 = vmul.f32 %v1562_v32, %v3321_v40  ;;  %v1585_v54 = vmul.f32 %v1583_v4, %v3321_v40 }
 0x1c7   : > { %1503 = vrot.lane.b32.xlu1 %v1497_v6, %s2677_s30  ;;  %1505 = vrot.lane.b32.xlu0 %v1498_v55, %s2677_s30  ;;  %v1546_v46 = vsel %vm262_vm4, %v1544_v37, %v1545_v23  ;;  %v1548_v13 = vsel %vm262_vm4, %v1545_v23, %v1547_v29  ;;  %v1572_v53 = vrot.slane %v1565_v45, 4  ;;  %v1586_v35 = vmul.f32 %v1583_v4, %v3323_v59 }
 0x1c9   : > { %v3423_v43 = vpop.permute.xlu1 %901  ;;  %v3425_v8 = vpop.permute.xlu0 %926 }
 0x1ca   : > { %4198 = vst [vmem:[#allocation58_spill] sm:$0xff] %v3423_v43  ;;  %4199 = vst [vmem:[#allocation59_spill] sm:$0xff] %v3425_v8  ;;  %v1563_v43 = vmul.f32 %v1562_v32, %v3311_v34  ;;  %v1584_v8 = vmul.f32 %v1583_v4, %v3311_v34  ;;  %v1608_v32 = vstv %s2438_s7  ;;  %s3561_s7 = sld [smem:[#allocation8 + $0x31]] }
 0x1cb   : > { %1507 = vrot.lane.b32.xlu1 %v1499_v58, %s2677_s30  ;;  %1528 = vrot.lane.b32.xlu0 %v1525_v63, %s2677_s30  ;;  %v1609_v23 = vmul.f32 %v1608_v32, %v3311_v34  ;;  %v1610_v4 = vmul.f32 %v1608_v32, %v3321_v40 }
 0x1cd   : > { %v3432_v55 = vpop.permute.xlu1 %928  ;;  %v3434_v6 = vpop.permute.xlu0 %940 }
 0x1ce   : > { %4200 = vst [vmem:[#allocation60_spill] sm:$0xff] %v3432_v55  ;;  %4201 = vst [vmem:[#allocation61_spill] sm:$0xff] %v3434_v6  ;;  %v1569_v6 = vrot.slane %v1563_v43, 4  ;;  %v1570_v55 = vrot.slane %v1564_v2, 4  ;;  %v1590_v2 = vrot.slane %v1584_v8, 4 }
 0x1cf   : > { %1530 = vrot.lane.b32.xlu1 %v1527_v57, %s2677_s30  ;;  %1549 = vrot.lane.b32.xlu0 %v1546_v46, %s2677_s30  ;;  %v1591_v46 = vrot.slane %v1585_v54, 4 }
 0x1d0   : > { %v1571_v43 = vsel %vm299_vm5, %v1569_v6, %v1570_v55  ;;  %v1616_v6 = vrot.slane %v1610_v4, 6 }
 0x1d1   : > { %v3443_v58 = vpop.permute.xlu1 %942  ;;  %v3445_v63 = vpop.permute.xlu0 %956  ;;  %v1592_v54 = vsel %vm299_vm5, %v1590_v2, %v1591_v46  ;;  %v1629_v2 = vstv %s3461_s17  ;;  %s3575_s17 = sld [smem:[#allocation8 + $0x4a]] }
 0x1d2   : > { %4202 = vst [vmem:[#allocation62_spill] sm:$0xff] %v3443_v58  ;;  %4203 = vst [vmem:[#allocation63_spill] sm:$0xff] %v3445_v63  ;;  %v1573_v63 = vsel %vm299_vm5, %v1570_v55, %v1572_v53  ;;  %v1593_v58 = vrot.slane %v1586_v35, 4  ;;  %v1615_v55 = vrot.slane %v1609_v23, 6  ;;  %v1630_v23 = vmul.f32 %v1629_v2, %v3311_v34 }
 0x1d3   : > { %1551 = vrot.lane.b32.xlu1 %v1548_v13, %s2677_s30  ;;  %1553 = vrot.lane.b32.xlu0 %v1547_v29, %s2677_s30  ;;  %v1611_v13 = vmul.f32 %v1608_v32, %v3323_v59 }
 0x1d4   : > { %v1594_v8 = vsel %vm299_vm5, %v1591_v46, %v1593_v58  ;;  %v1617_v35 = vsel %vm336_vm6, %v1615_v55, %v1616_v6 }
 0x1d5   : > { %v3453_v37 = vpop.permute.xlu1 %958  ;;  %v3455_v57 = vpop.permute.xlu0 %960 }
 0x1d6   : > { %4204 = vst [vmem:[#allocation64_spill] sm:$0xff] %v3453_v37  ;;  %4205 = vst [vmem:[#allocation65_spill] sm:$0xff] %v3455_v57 }
 0x1d7   : > { %1574 = vrot.lane.b32.xlu1 %v1571_v43, %s2677_s30  ;;  %1576 = vrot.lane.b32.xlu0 %v1573_v63, %s2677_s30  ;;  %v1618_v43 = vrot.slane %v1611_v13, 6  ;;  %v1631_v13 = vmul.f32 %v1629_v2, %v3321_v40 }
 0x1d9   : > { %v3465_v29 = vpop.permute.xlu1 %981  ;;  %v3467_v45 = vpop.permute.xlu0 %983  ;;  %v1619_v4 = vsel %vm336_vm6, %v1616_v6, %v1618_v43  ;;  %v1684_v43 = vstv %s2442_s4  ;;  %s3628_s4 = sld [smem:[#allocation8 + $0x54]] }
 0x1da   : > { %4206 = vst [vmem:[#allocation66_spill] sm:$0xff] %v3465_v29  ;;  %4207 = vst [vmem:[#allocation67_spill] sm:$0xff] %v3467_v45 }
 0x1db   : > { %1595 = vrot.lane.b32.xlu1 %v1592_v54, %s2677_s30  ;;  %1597 = vrot.lane.b32.xlu0 %v1594_v8, %s2677_s30  ;;  %v1643_v54 = vstv %s2440_s27  ;;  %v1663_v8 = vstv %s2441_s28  ;;  %s3578_s27 = sld [smem:[#allocation8 + $0x5b]]  ;;  %s3611_s28 = sld [smem:[#allocation8 + $0x5f]] }
 0x1dc   : > { %v1666_v6 = vmul.f32 %v1663_v8, %v3323_v59  ;;  %v1646_v2 = vmul.f32 %v1643_v54, %v3323_v59 }
 0x1dd   : > { %v3474_v63 = vpop.permute.xlu1 %1002  ;;  %v3476_v53 = vpop.permute.xlu0 %1004 }
 0x1de   : > { %4208 = vst [vmem:[#allocation68_spill] sm:$0xff] %v3474_v63  ;;  %4209 = vst [vmem:[#allocation69_spill] sm:$0xff] %v3476_v53  ;;  %v1686_v53 = vmul.f32 %v1684_v43, %v3321_v40  ;;  %v1709_v63 = vstv %s2443_s5  ;;  %v1673_v29 = vrot.slane %v1666_v6, 2  ;;  %s3630_s5 = sld [smem:[#allocation8 + $0x38]] }
 0x1df   : > { %1599 = vrot.lane.b32.xlu1 %v1593_v58, %s2677_s30  ;;  %1620 = vrot.lane.b32.xlu0 %v1617_v35, %s2677_s30  ;;  %v1644_v35 = vmul.f32 %v1643_v54, %v3311_v34  ;;  %v1711_v57 = vmul.f32 %v1709_v63, %v3321_v40 }
 0x1e1   : > { %v3482_v32 = vpop.permute.xlu1 %1006  ;;  %v3484_v46 = vpop.permute.xlu0 %1027  ;;  %v1318_v10 = vstv %s3578_s27  ;;  %s2462_s27 = sld [smem:[#allocation8 + $0x45]] }
 0x1e2   : > { %4210 = vst [vmem:[#allocation70_spill] sm:$0xff] %v3482_v32  ;;  %4211 = vst [vmem:[#allocation71_spill] sm:$0xff] %v3484_v46  ;;  %v1664_v46 = vmul.f32 %v1663_v8, %v3311_v34  ;;  %v1665_v32 = vmul.f32 %v1663_v8, %v3321_v40 }
 0x1e3   : > { %1622 = vrot.lane.b32.xlu1 %v1619_v4, %s2677_s30  ;;  %1634 = vrot.lane.b32.xlu0 %v1630_v23, %s2678_s3  ;;  %s2444_s30 = sld [smem:[#allocation8 + $0x57]]  ;;  %v1645_v23 = vmul.f32 %v1643_v54, %v3321_v40  ;;  %v1710_v54 = vmul.f32 %v1709_v63, %v3311_v34 }
 0x1e4   : > { %v1670_v8 = vrot.slane %v1664_v46, 2  ;;  %v1671_v45 = vrot.slane %v1665_v32, 2  ;;  %v1692_v46 = vrot.slane %v1686_v53, 2 }
 0x1e5   : > { %v3490_v55 = vpop.permute.xlu1 %1029  ;;  %v3492_v58 = vpop.permute.xlu0 %1048 }
 0x1e6   : > { %4212 = vst [vmem:[#allocation72_spill] sm:$0xff] %v3490_v55  ;;  %4213 = vst [vmem:[#allocation73_spill] sm:$0xff] %v3492_v58  ;;  %v1685_v55 = vmul.f32 %v1684_v43, %v3311_v34  ;;  %v1672_v37 = vsel %vm262_vm4, %v1670_v8, %v1671_v45  ;;  %v1674_v32 = vsel %vm262_vm4, %v1671_v45, %v1673_v29 }
 0x1e7   : > { %1636 = vrot.lane.b32.xlu1 %v1631_v13, %s2678_s3  ;;  %1650 = vrot.lane.b32.xlu0 %v1644_v35, %s2678_s3  ;;  %v1687_v13 = vmul.f32 %v1684_v43, %v3323_v59 }
 0x1e9   : > { %v3502_v4 = vpop.permute.xlu1 %1050  ;;  %v3504_v58 = vpop.permute.xlu0 %1052  ;;  %v1694_v6 = vrot.slane %v1687_v13, 2  ;;  %v1730_v43 = vstv %s2444_s30  ;;  %s3642_s30 = sld [smem:[#allocation8 + $0x58]] }
 0x1ea   : > { %4214 = vst [vmem:[#allocation74_spill] sm:$0xff] %v3502_v4  ;;  %4215 = vst [vmem:[#allocation75_spill] sm:$0xff] %v3504_v58  ;;  %v1691_v58 = vrot.slane %v1685_v55, 2  ;;  %v1716_v55 = vrot.slane %v1710_v54, 4  ;;  %v1731_v45 = vmul.f32 %v1730_v43, %v3311_v34  ;;  %v1732_v53 = vmul.f32 %v1730_v43, %v3321_v40 }
 0x1eb   : > { %1652 = vrot.lane.b32.xlu1 %v1645_v23, %s2678_s3  ;;  %1654 = vrot.lane.b32.xlu0 %v1646_v2, %s2678_s3  ;;  %v1695_v29 = vsel %vm262_vm4, %v1692_v46, %v1694_v6 }
 0x1ec   : > { %v1693_v8 = vsel %vm262_vm4, %v1691_v58, %v1692_v46  ;;  %v1733_v58 = vmul.f32 %v1730_v43, %v3323_v59  ;;  %v1755_v46 = vstv %s2445_s6  ;;  %s3692_s6 = sld [smem:[#allocation8 + $0x36]] }
 0x1ed   : > { %v3512_v35 = vpop.permute.xlu1 %1073  ;;  %v3514_v4 = vpop.permute.xlu0 %1075 }
 0x1ee   : > { %4216 = vst [vmem:[#allocation76_spill] sm:$0xff] %v3512_v35  ;;  %4217 = vst [vmem:[#allocation77_spill] sm:$0xff] %v3514_v4  ;;  %v1717_v4 = vrot.slane %v1711_v57, 4  ;;  %v1712_v35 = vmul.f32 %v1709_v63, %v3323_v59  ;;  %v1737_v63 = vrot.slane %v1731_v45, 4  ;;  %v1758_v45 = vmul.f32 %v1755_v46, %v3323_v59 }
 0x1ef   : > { %1675 = vrot.lane.b32.xlu1 %v1672_v37, %s2678_s3  ;;  %1677 = vrot.lane.b32.xlu0 %v1674_v32, %s2678_s3  ;;  %v1738_v32 = vrot.slane %v1732_v53, 4  ;;  %v1877_v33 = vstv %s3642_s30  ;;  %s2372_s30 = sld [smem:[#allocation8 + $0x15]] }
 0x1f0   : > { %v1718_v57 = vsel %vm299_vm5, %v1716_v55, %v1717_v4  ;;  %v1719_v54 = vrot.slane %v1712_v35, 4  ;;  %v1740_v55 = vrot.slane %v1733_v58, 4 }
 0x1f1   : > { %v3522_v23 = vpop.permute.xlu1 %1087  ;;  %v3524_v2 = vpop.permute.xlu0 %1089  ;;  %v1739_v43 = vsel %vm299_vm5, %v1737_v63, %v1738_v32  ;;  %v1810_v63 = vstv %s2448_s8  ;;  %s3709_s8 = sld [smem:[#allocation8 + $0x3d]] }
 0x1f2   : > { %4218 = vst [vmem:[#allocation78_spill] sm:$0xff] %v3522_v23  ;;  %4219 = vst [vmem:[#allocation79_spill] sm:$0xff] %v3524_v2  ;;  %v1756_v2 = vmul.f32 %v1755_v46, %v3311_v34  ;;  %v1757_v23 = vmul.f32 %v1755_v46, %v3321_v40  ;;  %v1720_v35 = vsel %vm299_vm5, %v1717_v4, %v1719_v54  ;;  %v1765_v54 = vrot.slane %v1758_v45, 6 }
 0x1f3   : > { %1696 = vrot.lane.b32.xlu1 %v1693_v8, %s2678_s3  ;;  %1698 = vrot.lane.b32.xlu0 %v1695_v29, %s2678_s3  ;;  %v1741_v4 = vsel %vm299_vm5, %v1738_v32, %v1740_v55  ;;  %v1813_v45 = vmul.f32 %v1810_v63, %v3323_v59 }
 0x1f5   : > { %v3533_v37 = vpop.permute.xlu1 %1103  ;;  %v3535_v13 = vpop.permute.xlu0 %1105 }
 0x1f6   : > { %4220 = vst [vmem:[#allocation80_spill] sm:$0xff] %v3533_v37  ;;  %4221 = vst [vmem:[#allocation81_spill] sm:$0xff] %v3535_v13 }
 0x1f7   : > { %1700 = vrot.lane.b32.xlu1 %v1694_v6, %s2678_s3  ;;  %1721 = vrot.lane.b32.xlu0 %v1718_v57, %s2678_s3  ;;  %v1762_v57 = vrot.slane %v1756_v2, 6 }
 0x1f9   : > { %v3541_v8 = vpop.permute.xlu1 %1107  ;;  %v3543_v29 = vpop.permute.xlu0 %1128 }
 0x1fa   : > { %4222 = vst [vmem:[#allocation82_spill] sm:$0xff] %v3541_v8  ;;  %4223 = vst [vmem:[#allocation83_spill] sm:$0xff] %v3543_v29  ;;  %v1763_v29 = vrot.slane %v1757_v23, 6  ;;  %v1776_v23 = vstv %s3547_s24  ;;  %v1820_v8 = vrot.slane %v1813_v45, 2  ;;  %s3711_s24 = sld [smem:[#allocation8 + $0x44]] }
 0x1fb   : > { %1723 = vrot.lane.b32.xlu1 %v1720_v35, %s2678_s3  ;;  %1742 = vrot.lane.b32.xlu0 %v1739_v43, %s2678_s3  ;;  %v1811_v35 = vmul.f32 %v1810_v63, %v3311_v34  ;;  %v1812_v43 = vmul.f32 %v1810_v63, %v3321_v40 }
 0x1fc   : > { %v1764_v2 = vsel %vm336_vm6, %v1762_v57, %v1763_v29  ;;  %v1766_v32 = vsel %vm336_vm6, %v1763_v29, %v1765_v54  ;;  %v1778_v29 = vmul.f32 %v1776_v23, %v3321_v40 }
 0x1fd   : > { %v3554_v6 = vpop.permute.xlu1 %1130  ;;  %v3556_v53 = vpop.permute.xlu0 %1149 }
 0x1fe   : > { %4224 = vst [vmem:[#allocation84_spill] sm:$0xff] %v3554_v6  ;;  %4225 = vst [vmem:[#allocation85_spill] sm:$0xff] %v3556_v53  ;;  %v1232_v53 = vstv %s3561_s7  ;;  %s2463_s7 = sld [smem:[#allocation8 + $0x4c]] }
 0x1ff   : > { %1744 = vrot.lane.b32.xlu1 %v1741_v4, %s2678_s3  ;;  %1746 = vrot.lane.b32.xlu0 %v1740_v55, %s2678_s3  ;;  %v1246_v4 = vstv %s2420_s20  ;;  %v1777_v55 = vmul.f32 %v1776_v23, %v3311_v34  ;;  %s3723_s20 = sld [smem:[#allocation8 + $0x4b]] }
 0x200   : > { %v1247_v54 = vmul.f32 %v1246_v4, %v3311_v34  ;;  %v3587_v63 = vmul.f32 %v1246_v4, %v3321_v40 }
 0x201   : > { %v3563_v58 = vpop.permute.xlu1 %1151  ;;  %v3565_v46 = vpop.permute.xlu0 %1153 }
 0x202   : > { %4226 = vst [vmem:[#allocation86_spill] sm:$0xff] %v3563_v58  ;;  %4227 = vst [vmem:[#allocation87_spill] sm:$0xff] %v3565_v46  ;;  %v1818_v46 = vrot.slane %v1812_v43, 2  ;;  %v1856_v58 = vstv %s2450_s29  ;;  %v1253_v43 = vrot.slane %v1247_v54, 2  ;;  %s2459_s29 = sld [smem:[#allocation8 + $0x60]] }
 0x203   : > { %1767 = vrot.lane.b32.xlu1 %v1764_v2, %s2678_s3  ;;  %1769 = vrot.lane.b32.xlu0 %v1766_v32, %s2678_s3  ;;  %v3589_v2 = vstv %s2422_s23  ;;  %v1817_v32 = vrot.slane %v1811_v35, 2  ;;  %s3607_s3 = sld [smem:[#allocation8 + $0x46]]  ;;  %v1859_v41 = vmul.f32 %v1856_v58, %v3323_v59  ;;  %s3734_s23 = sld [smem:[#allocation8 + $0x52]] }
 0x204   : > { %v1283_v23 = vmul.f32 %v3589_v2, %v3311_v34  ;;  %v1821_v31 = vsel %vm262_vm4, %v1818_v46, %v1820_v8  ;;  %v4234_v8 = vrot.slane %v3587_v63, 2 }
 0x205   : > { %v3580_v57 = vpop.permute.xlu1 %1174  ;;  %v3582_v6 = vpop.permute.xlu0 %1176  ;;  %v1819_v37 = vsel %vm262_vm4, %v1817_v32, %v1818_v46  ;;  %v1866_v14 = vrot.slane %v1859_v41, 4 }
 0x206   : > { %4228 = vst [vmem:[#allocation88_spill] sm:$0xff] %v3580_v57  ;;  %4229 = vst [vmem:[#allocation89_spill] sm:$0xff] %v3582_v6  ;;  %v1790_v57 = vstv %s2447_s16  ;;  %v3598_v6 = vmul.f32 %v3589_v2, %v3321_v40  ;;  %v1289_v11 = vrot.slane %v1283_v23, 4  ;;  %v1255_v46 = vsel %vm262_vm4, %v1253_v43, %v4234_v8  ;;  %s2461_s16 = sld [smem:[#allocation8 + $0x3e]] }
 0x207   : > { %1781 = vrot.lane.b32.xlu1 %v1777_v55, %s2679_s19  ;;  %1783 = vrot.lane.b32.xlu0 %v1778_v29, %s2679_s19  ;;  %v1857_v55 = vmul.f32 %v1856_v58, %v3311_v34  ;;  %v1858_v29 = vmul.f32 %v1856_v58, %v3321_v40  ;;  %v1791_v54 = vmul.f32 %v1790_v57, %v3311_v34 }
 0x208   : > { %v1792_v45 = vmul.f32 %v1790_v57, %v3321_v40  ;;  %v1319_v43 = vmul.f32 %v1318_v10, %v3311_v34  ;;  %v1793_v8 = vmul.f32 %v1790_v57, %v3323_v59  ;;  %v1902_v57 = vstv %s3611_s28  ;;  %s2466_s28 = sld [smem:[#allocation8 + $0x61]] }
 0x209   : > { %v3600_v13 = vpop.permute.xlu1 %1195  ;;  %v3602_v35 = vpop.permute.xlu0 %1197  ;;  %v1864_v52 = vrot.slane %v1858_v29, 4  ;;  %v1249_v29 = vmul.f32 %v1246_v4, %v3323_v59  ;;  %v1263_v51 = vstv %s3607_s3  ;;  %s2465_s3 = sld [smem:[#allocation8 + $0x5a]] }
 0x20a   : > { %4230 = vst [vmem:[#allocation90_spill] sm:$0xff] %v3600_v13  ;;  %4231 = vst [vmem:[#allocation91_spill] sm:$0xff] %v3602_v35  ;;  %v1831_v35 = vstv %s3575_s17  ;;  %v1233_v13 = vmul.f32 %v1232_v53, %v3311_v34  ;;  %v1325_v27 = vrot.slane %v1319_v43, 6  ;;  %v1264_v41 = vmul.f32 %v1263_v51, %v3311_v34  ;;  %s3791_s17 = sld [smem:[#allocation8 + $0x37]] }
 0x20b   : > { %1822 = vrot.lane.b32.xlu1 %v1819_v37, %s2679_s19  ;;  %1824 = vrot.lane.b32.xlu0 %v1821_v31, %s2679_s19  ;;  %v1863_v31 = vrot.slane %v1857_v55, 4  ;;  %v1832_v23 = vmul.f32 %v1831_v35, %v3311_v34  ;;  %v3639_v55 = vmul.f32 %v1318_v10, %v3321_v40  ;;  %v1234_v37 = vmul.f32 %v1232_v53, %v3321_v40 }
 0x20c   : > { %v1260_v58 = vadd.f32 %v1255_v46, %v1233_v13  ;;  %v1834_v4 = vmul.f32 %v1831_v35, %v3323_v59  ;;  %v1299_v43 = vstv %s3628_s4  ;;  %v1270_v7 = vrot.slane %v1264_v41, 2  ;;  %s2371_s4 = sld [smem:[#allocation8 + $0xe]] }
 0x20d   : > { %v3620_v22 = vpop.permute.xlu1 %1199  ;;  %v3622_v32 = vpop.permute.xlu0 %1220  ;;  %v1865_v28 = vsel %vm299_vm5, %v1863_v31, %v1864_v52  ;;  %v1838_v13 = vrot.slane %v1832_v23, 2  ;;  %v1285_v31 = vmul.f32 %v3589_v2, %v3323_v59  ;;  %v1238_v2 = vstv %s3630_s5  ;;  %s2373_s5 = sld [smem:[#allocation8 + $0x1c]] }
 0x20e   : > { %4232 = vst [vmem:[#allocation92_spill] sm:$0xff] %v3620_v22  ;;  %4233 = vst [vmem:[#allocation93_spill] sm:$0xff] %v3622_v32  ;;  %v1833_v22 = vmul.f32 %v1831_v35, %v3321_v40  ;;  %v1321_v35 = vmul.f32 %v1318_v10, %v3323_v59  ;;  %v1878_v41 = vmul.f32 %v1877_v33, %v3311_v34 }
 0x20f   : > { %1797 = vrot.lane.b32.xlu1 %v1791_v54, %s2679_s19  ;;  %1799 = vrot.lane.b32.xlu0 %v1792_v45, %s2679_s19  ;;  %v4236_v54 = vrot.slane %v3598_v6, 4  ;;  %v1292_v47 = vrot.slane %v1285_v31, 4 }
 0x210   : > { %v1839_v46 = vrot.slane %v1833_v22, 2  ;;  %v3665_v22 = vmul.f32 %v1263_v51, %v3321_v40  ;;  %v1328_v49 = vrot.slane %v1321_v35, 6 }
 0x211   : > { %v3646_v32 = vpop.permute.xlu1 %1222  ;;  %v1291_v45 = vsel %vm299_vm5, %v1289_v11, %v4236_v54  ;;  %v3651_v44 = vpop.permute.xlu0 %1340  ;;  %v1256_v11 = vrot.slane %v1249_v29, 2  ;;  %v1904_v29 = vmul.f32 %v1902_v57, %v3321_v40 }
 0x212   : > { %4235 = vst [vmem:[#allocation94_spill] sm:$0xff] %v3646_v32  ;;  %v1296_v54 = vadd.f32 %v1291_v45, %v1260_v58  ;;  %v1867_v58 = vsel %vm299_vm5, %v1864_v52, %v1866_v14  ;;  %v1840_v10 = vsel %vm262_vm4, %v1838_v13, %v1839_v46  ;;  %v1905_v45 = vmul.f32 %v1902_v57, %v3323_v59 }
 0x213   : > { %1801 = vrot.lane.b32.xlu1 %v1793_v8, %s2679_s19  ;;  %1868 = vrot.lane.b32.xlu0 %v1865_v28, %s2679_s19  ;;  %v1841_v8 = vrot.slane %v1834_v4, 2  ;;  %v1903_v28 = vmul.f32 %v1902_v57, %v3311_v34  ;;  %v4237_v32 = vrot.slane %v3587_v63, 2  ;;  %v1266_v4 = vmul.f32 %v1263_v51, %v3323_v59 }
 0x214   : > { %v1271_v42 = vrot.slane %v3665_v22, 2  ;;  %v1300_v14 = vmul.f32 %v1299_v43, %v3311_v34  ;;  %v1301_v52 = vmul.f32 %v1299_v43, %v3321_v40  ;;  %v1241_v63 = vmul.f32 %v1238_v2, %v3323_v59 }
 0x215   : > { %v3667_v23 = vpop.permute.xlu1 %1342  ;;  %v3670_v53 = vpop.permute.xlu0 %1356  ;;  %v1257_v15 = vsel %vm262_vm4, %v4237_v32, %v1256_v11  ;;  %v1842_v57 = vsel %vm262_vm4, %v1839_v46, %v1841_v8  ;;  %v1909_v11 = vrot.slane %v1903_v28, 6  ;;  %v1910_v31 = vrot.slane %v1904_v29, 6 }
 0x216   : > { %v1912_v51 = vrot.slane %v1905_v45, 6  ;;  %v1879_v22 = vmul.f32 %v1877_v33, %v3321_v40  ;;  %v1261_v1 = vadd.f32 %v1257_v15, %v1234_v37  ;;  %v1273_v19 = vrot.slane %v1266_v4, 2 }
 0x217   : > { %1870 = vrot.lane.b32.xlu1 %v1867_v58, %s2679_s19  ;;  %1843 = vrot.lane.b32.xlu0 %v1840_v10, %s2679_s19  ;;  %v1880_v58 = vmul.f32 %v1877_v33, %v3323_v59  ;;  %v4238_v10 = vrot.slane %v3639_v55, 6  ;;  %v4239_v46 = vrot.slane %v3598_v6, 4  ;;  %v1239_v29 = vmul.f32 %v1238_v2, %v3311_v34 }
 0x218   : > { %v1306_v45 = vrot.slane %v1300_v14, 4  ;;  %v1302_v33 = vmul.f32 %v1299_v43, %v3323_v59  ;;  %v1272_v5 = vsel %vm262_vm4, %v1270_v7, %v1271_v42  ;;  %v1307_v20 = vrot.slane %v1301_v52, 4 }
 0x219   : > { %v3688_v13 = vpop.permute.xlu1 %1358  ;;  %v1361_v32 = vpop.permute.xlu0 %1360  ;;  %v1327_v60 = vsel %vm336_vm6, %v1325_v27, %v4238_v10  ;;  %v1293_v28 = vsel %vm299_vm5, %v4239_v46, %v1292_v47  ;;  %v1280_v27 = vadd.f32 %v1273_v19, %v1241_v63  ;;  %v1911_v35 = vsel %vm336_vm6, %v1909_v11, %v1910_v31 }
 0x21a   : > { %v1913_v6 = vsel %vm336_vm6, %v1910_v31, %v1912_v51  ;;  %v1884_v47 = vrot.slane %v1878_v41, 4  ;;  %v1887_v4 = vrot.slane %v1880_v58, 4  ;;  %v1332_v14 = vadd.f32 %v1327_v60, %v1296_v54 }
 0x21b   : > { %1845 = vrot.lane.b32.xlu1 %v1842_v57, %s2679_s19  ;;  %1847 = vrot.lane.b32.xlu0 %v1841_v8, %s2679_s19  ;;  %v1885_v8 = vrot.slane %v1879_v22, 4  ;;  %v1297_v43 = vadd.f32 %v1293_v28, %v1261_v1  ;;  %v4240_v7 = vmov %v4238_v10  ;;  %v1278_v63 = vadd.f32 %v1272_v5, %v1239_v29 }
 0x21c   : > { %v1329_v52 = vsel %vm336_vm6, %v4240_v7, %v1328_v49  ;;  %v1240_v57 = vmul.f32 %v1238_v2, %v3321_v40  ;;  %v1309_v11 = vrot.slane %v1302_v33, 4  ;;  %v1308_v31 = vsel %vm299_vm5, %v1306_v45, %v1307_v20 }
 0x21d   : > { %v1382_v15 = vpop.permute.xlu1 %1381  ;;  %v1384_v37 = vpop.permute.xlu0 %1383  ;;  %v1274_v51 = vsel %vm262_vm4, %v1271_v42, %v1273_v19  ;;  %v1923_v60 = vstv %s3692_s6  ;;  %v1346_v1 = vadd.f32 %v3651_v44, %v1332_v14  ;;  %v1886_v49 = vsel %vm299_vm5, %v1884_v47, %v1885_v8  ;;  %s2375_s6 = sld [smem:[#allocation8 + $0x2a]] }
 0x21e   : > { %v1316_v55 = vadd.f32 %v1309_v11, %v1280_v27  ;;  %v1888_v5 = vsel %vm299_vm5, %v1885_v8, %v1887_v4  ;;  %v1333_v54 = vadd.f32 %v1329_v52, %v1297_v43  ;;  %v1314_v19 = vadd.f32 %v1308_v31, %v1278_v63 }
 0x21f   : > { %1914 = vrot.lane.b32.xlu1 %v1911_v35, %s2679_s19  ;;  %1916 = vrot.lane.b32.xlu0 %v1913_v6, %s2679_s19  ;;  %v1279_v42 = vadd.f32 %v1274_v51, %v1240_v57  ;;  %v1387_v58 = vadd.f32 %v1382_v15, %v1346_v1  ;;  %v1310_v10 = vsel %vm299_vm5, %v1307_v20, %v1309_v11  ;;  %v1937_v29 = vstv %s3709_s8  ;;  %s2370_s8 = sld [smem:[#allocation8 + $0x7]] }
 0x220   : > { %v1367_v2 = vadd.f32 %v1361_v32, %v1316_v55  ;;  %v1924_v44 = vmul.f32 %v1923_v60, %v3311_v34  ;;  %v1957_v45 = vstv %s3711_s24  ;;  %v1347_v33 = vadd.f32 %v3667_v23, %v1333_v54  ;;  %s2374_s24 = sld [smem:[#allocation8 + $0x23]] }
 0x221   : > { %v1403_v41 = vpop.permute.xlu1 %1402  ;;  %v1405_v22 = vpop.permute.xlu0 %1404  ;;  %v1365_v27 = vadd.f32 %v3670_v53, %v1314_v19  ;;  %v1315_v20 = vadd.f32 %v1310_v10, %v1279_v42  ;;  %v1925_v47 = vmul.f32 %v1923_v60, %v3321_v40  ;;  %v1938_v43 = vmul.f32 %v1937_v29, %v3311_v34 }
 0x222   : > { %v1388_v32 = vadd.f32 %v1384_v37, %v1347_v33  ;;  %v1958_v7 = vmul.f32 %v1957_v45, %v3311_v34  ;;  %v1959_v23 = vmul.f32 %v1957_v45, %v3321_v40  ;;  %v1978_v53 = vstv %s3723_s20  ;;  %s2363_s20 = sshll.u32 %s2827_s14, 4 }
 0x223   : > { %1889 = vrot.lane.b32.xlu1 %v1886_v49, %s2679_s19  ;;  %1891 = vrot.lane.b32.xlu0 %v1888_v5, %s2679_s19  ;;  %v1411_v15 = vadd.f32 %v1403_v41, %v1365_v27  ;;  %v1366_v52 = vadd.f32 %v3688_v13, %v1315_v20  ;;  %v1960_v57 = vmul.f32 %v1957_v45, %v3323_v59  ;;  %v2003_v49 = vstv %s3734_s23  ;;  %s2473_s23 = sshll.u32 %s2721_s13, 8  ;;  %s2682_s13 = smov [#allocation9]  }
 0x224   : > { %v1939_v11 = vmul.f32 %v1937_v29, %v3321_v40  ;;  %v1940_v31 = vmul.f32 %v1937_v29, %v3323_v59  ;;  %v1979_v51 = vmul.f32 %v1978_v53, %v3311_v34  ;;  %v1964_v60 = vrot.slane %v1958_v7, 2  ;;  %v3769_v7 = vld [vmem:[#allocation3] sm:$0xff] }
 0x225   : > { %v1407_v46 = vpop.permute.xlu1 %1406  ;;  %v1428_v28 = vpop.permute.xlu0 %1427  ;;  %v1412_v37 = vadd.f32 %v1405_v22, %v1366_v52  ;;  %v1980_v1 = vmul.f32 %v1978_v53, %v3321_v40  ;;  %v1981_v55 = vmul.f32 %v1978_v53, %v3323_v59  ;;  %v1965_v19 = vrot.slane %v1959_v23, 2 }
 0x226   : > { %v1413_v35 = vadd.f32 %v1407_v46, %v1367_v2  ;;  %v1433_v6 = vadd.f32 %v1428_v28, %v1387_v58  ;;  %v1967_v42 = vrot.slane %v1960_v57, 2  ;;  %v2004_v22 = vmul.f32 %v2003_v49, %v3311_v34 }
 0x227   : > { %1893 = vrot.lane.b32.xlu1 %v1887_v4, %s2679_s19  ;;  %1928 = vrot.lane.b32.xlu0 %v1924_v44, %s2680_s26  ;;  %s3749_s19 = sld [smem:[#allocation8 + $0x59]]  ;;  %v1985_v10 = vrot.slane %v1979_v51, 2  ;;  %v1986_v46 = vrot.slane %v1980_v1, 2  ;;  %v1988_v28 = vrot.slane %v1981_v55, 2  ;;  %v2005_v44 = vmul.f32 %v2003_v49, %v3321_v40 }
 0x228   : > { %v1966_v33 = vsel %vm262_vm4, %v1964_v60, %v1965_v19  ;;  %v1968_v27 = vsel %vm262_vm4, %v1965_v19, %v1967_v42  ;;  %v2010_v34 = vrot.slane %v2004_v22, 4  ;;  %v3783_v42 = vld [vmem:[#allocation3 + $0x8] sm:$0xff] }
 0x229   : > { %v1430_v8 = vpop.permute.xlu1 %1429  ;;  %v1449_v14 = vpop.permute.xlu0 %1448 }
 0x22a   : > { %v1434_v4 = vadd.f32 %v1430_v8, %v1388_v32  ;;  %v1457_v63 = vadd.f32 %v1449_v14, %v1411_v15  ;;  %v1987_v15 = vsel %vm262_vm4, %v1985_v10, %v1986_v46  ;;  %v2011_v8 = vrot.slane %v2005_v44, 4 }
 0x22b   : > { %1930 = vrot.lane.b32.xlu1 %v1925_v47, %s2680_s26  ;;  %1944 = vrot.lane.b32.xlu0 %v1938_v43, %s2680_s26  ;;  %v1989_v47 = vsel %vm262_vm4, %v1986_v46, %v1988_v28 }
 0x22c   : > { %v2012_v57 = vsel %vm299_vm5, %v2010_v34, %v2011_v8  ;;  %v2084_v34 = vstv %s2461_s16 }
 0x22d   : > { %v1451_v41 = vpop.permute.xlu1 %1450  ;;  %v1453_v13 = vpop.permute.xlu0 %1452 }
 0x22e   : > { %v1458_v5 = vadd.f32 %v1451_v41, %v1412_v37  ;;  %v1459_v54 = vadd.f32 %v1453_v13, %v1413_v35  ;;  %v2024_v35 = vstv %s3749_s19  ;;  %s175_s19 = scalar_lea.vmem [#allocation9], %s2363_s20 }
 0x22f   : > { %1946 = vrot.lane.b32.xlu1 %v1939_v11, %s2680_s26  ;;  %1948 = vrot.lane.b32.xlu0 %v1940_v31, %s2680_s26  ;;  %v2025_v23 = vmul.f32 %v3769_v7, %v2024_v35  ;;  %v2026_v53 = vmul.f32 %v2024_v35, %v3321_v40  ;;  %v3776_v11 = vld [vmem:[#allocation3 + $0x10] sm:$0x3f]  ;;  %v2049_v31 = vstv %s2459_s29  ;;  %s2268_s29 = sshll.u32 %s175_s19, 4  ;;  %s4093_s29 = int_to_ptr.vmem [resolvable:$true] %s2268_s29 }
 0x230   : > { %v2050_v19 = vmul.f32 %v3769_v7, %v2049_v31  ;;  %v2051_v22 = vmul.f32 %v3783_v42, %v2049_v31 }
 0x231   : > { %v1474_v2 = vpop.permute.xlu1 %1473  ;;  %v1476_v58 = vpop.permute.xlu0 %1475  ;;  %v2031_v13 = vrot.slane %v2025_v23, 4  ;;  %v2032_v60 = vrot.slane %v2026_v53, 4  ;;  %v2086_v23 = vmul.f32 %v3783_v42, %v2084_v34  ;;  %v2070_v53 = vstv %s3791_s17  ;;  %s4091_s17 = scalar_lea.hbm %s4139_s2, %s2473_s23 }
 0x232   : > { %v1479_v29 = vadd.f32 %v1474_v2, %v1433_v6  ;;  %v1480_v45 = vadd.f32 %v1476_v58, %v1434_v4  ;;  %v2006_v6 = vmul.f32 %v2003_v49, %v3323_v59  ;;  %v2027_v59 = vmul.f32 %v3776_v11, %v2024_v35 }
 0x233   : > { %1969 = vrot.lane.b32.xlu1 %v1966_v33, %s2680_s26  ;;  %1971 = vrot.lane.b32.xlu0 %v1968_v27, %s2680_s26  ;;  %v2033_v2 = vsel %vm299_vm5, %v2031_v13, %v2032_v60  ;;  %v2052_v58 = vmul.f32 %v3776_v11, %v2049_v31  ;;  %v2056_v44 = vrot.slane %v2050_v19, 6  ;;  %v2072_v19 = vmul.f32 %v3783_v42, %v2070_v53 }
 0x234   : > { %v2013_v37 = vrot.slane %v2006_v6, 4  ;;  %v2034_v49 = vrot.slane %v2027_v59, 4 }
 0x235   : > { %v1488_v20 = vpop.permute.xlu1 %1487  ;;  %v1490_v32 = vpop.permute.xlu0 %1489  ;;  %v2059_v33 = vrot.slane %v2052_v58, 6 }
 0x236   : > { %v1493_v14 = vadd.f32 %v1488_v20, %v1479_v29  ;;  %v1494_v43 = vadd.f32 %v1490_v32, %v1480_v45  ;;  %v2014_v55 = vsel %vm299_vm5, %v2011_v8, %v2013_v37  ;;  %v2125_v8 = vstv %s2463_s7 }
 0x237   : > { %1990 = vrot.lane.b32.xlu1 %v1987_v15, %s2680_s26  ;;  %1992 = vrot.lane.b32.xlu0 %v1989_v47, %s2680_s26  ;;  %v2127_v37 = vmul.f32 %v3783_v42, %v2125_v8  ;;  %v2128_v13 = vmul.f32 %v3776_v11, %v2125_v8 }
 0x239   : > { %v1504_v52 = vpop.permute.xlu1 %1503  ;;  %v1506_v4 = vpop.permute.xlu0 %1505 }
 0x23a   : > { %v1512_v51 = vadd.f32 %v1504_v52, %v1457_v63  ;;  %v1513_v41 = vadd.f32 %v1506_v4, %v1458_v5 }
 0x23b   : > { %1994 = vrot.lane.b32.xlu1 %v1988_v28, %s2680_s26  ;;  %2015 = vrot.lane.b32.xlu0 %v2012_v57, %s2680_s26  ;;  %v2035_v28 = vsel %vm299_vm5, %v2032_v60, %v2034_v49  ;;  %v2126_v57 = vmul.f32 %v3769_v7, %v2125_v8  ;;  %v2104_v60 = vstv %s2462_s27  ;;  %s2255_s27 = scalar_lea.sflag [#allocation6], %s2827_s14 }
 0x23c   : > { %v2107_v58 = vmul.f32 %v3776_v11, %v2104_v60 }
 0x23d   : > { %v1508_v40 = vpop.permute.xlu1 %1507  ;;  %v1529_v1 = vpop.permute.xlu0 %1528 }
 0x23e   : > { %v1514_v63 = vadd.f32 %v1508_v40, %v1459_v54  ;;  %v1534_v5 = vadd.f32 %v1529_v1, %v1493_v14  ;;  %v2057_v54 = vrot.slane %v2051_v22, 6 }
 0x23f   : > { %2017 = vrot.lane.b32.xlu1 %v2014_v55, %s2680_s26  ;;  %2036 = vrot.lane.b32.xlu0 %v2033_v2, %s2680_s26  ;;  %v2132_v55 = vrot.slane %v2126_v57, 2  ;;  %v2106_v2 = vmul.f32 %v3783_v42, %v2104_v60 }
 0x240   : > { %v2058_v15 = vsel %vm336_vm6, %v2056_v44, %v2057_v54  ;;  %v2060_v47 = vsel %vm336_vm6, %v2057_v54, %v2059_v33 }
 0x241   : > { %v1531_v10 = vpop.permute.xlu1 %1530  ;;  %v1550_v46 = vpop.permute.xlu0 %1549 }
 0x242   : > { %v1535_v29 = vadd.f32 %v1531_v10, %v1494_v43  ;;  %v1558_v45 = vadd.f32 %v1550_v46, %v1512_v51  ;;  %v2085_v43 = vmul.f32 %v3769_v7, %v2084_v34  ;;  %v2087_v51 = vmul.f32 %v3776_v11, %v2084_v34 }
 0x243   : > { %2038 = vrot.lane.b32.xlu1 %v2035_v28, %s2680_s26  ;;  %2040 = vrot.lane.b32.xlu0 %v2034_v49, %s2680_s26  ;;  %v2133_v49 = vrot.slane %v2127_v37, 2  ;;  %v2171_v10 = vstv %s2465_s3  ;;  %v2112_v34 = vrot.slane %v2106_v2, 2  ;;  %s2598_s3 = scalar_lea.vmem %s4093_s29, 256 }
 0x244   : > { %v2173_v54 = vmul.f32 %v3783_v42, %v2171_v10  ;;  %p2599_p13 = scmp.ne.s32.totalorder %s4093_s29, %s2598_s3 }
 0x245   : > { %v1552_v27 = vpop.permute.xlu1 %1551  ;;  %v1554_v35 = vpop.permute.xlu0 %1553  ;;  %v2134_v44 = vsel %vm262_vm4, %v2132_v55, %v2133_v49 }
 0x246   : > { %v1559_v20 = vadd.f32 %v1552_v27, %v1513_v41  ;;  %v1560_v32 = vadd.f32 %v1554_v35, %v1514_v63  ;;  %v2071_v41 = vmul.f32 %v3769_v7, %v2070_v53  ;;  %p2600_p8 = pnand %p2599_p13, %p4323_p12 }
 0x247   : > { %2061 = vrot.lane.b32.xlu1 %v2058_v15, %s2680_s26  ;;  %2063 = vrot.lane.b32.xlu0 %v2060_v47, %s2680_s26  ;;  %s2464_s26 = sld [smem:[#allocation8 + $0x53]]  ;;  %v2174_v15 = vmul.f32 %v3776_v11, %v2171_v10 }
 0x248   : > { %p2601_p9 = pneg %p2600_p8 }
 0x249   : > { %v1575_v6 = vpop.permute.xlu1 %1574  ;;  %v1577_v14 = vpop.permute.xlu0 %1576  ;;  %v2181_v37 = vrot.slane %v2174_v15, 4 }
 0x24a   : > { %v1580_v52 = vadd.f32 %v1575_v6, %v1534_v5  ;;  %v1581_v4 = vadd.f32 %v1577_v14, %v1535_v29  ;;  %v2105_v5 = vmul.f32 %v3769_v7, %v2104_v60  ;;  %v2135_v29 = vrot.slane %v2128_v13, 2 }
 0x24b   : > { %2091 = vrot.lane.b32.xlu1 %v2085_v43, %s2681_s25  ;;  %2093 = vrot.lane.b32.xlu0 %v2086_v23, %s2681_s25  ;;  %v2179_v43 = vrot.slane %v2173_v54, 4 }
 0x24c   : > { %v2111_v35 = vrot.slane %v2105_v5, 2  ;;  %v2136_v8 = vsel %vm262_vm4, %v2133_v49, %v2135_v29 }
 0x24d   : > { %v1596_v59 = vpop.permute.xlu1 %1595  ;;  %v1598_v31 = vpop.permute.xlu0 %1597  ;;  %v2150_v6 = vstv %s2464_s26  ;;  %v2182_v49 = vsel %vm299_vm5, %v2179_v43, %v2181_v37  ;;  %s2602_s26 = sshll.u32 %s2682_s13, 4  ;;  %s2603_s26 = int_to_ptr.vmem [resolvable:$false] %s2602_s26 }
 0x24e   : > { %v1604_v40 = vadd.f32 %v1596_v59, %v1558_v45  ;;  %v1605_v1 = vadd.f32 %v1598_v31, %v1559_v20  ;;  %v2172_v45 = vmul.f32 %v3769_v7, %v2171_v10  ;;  %v2114_v20 = vrot.slane %v2107_v58, 2  ;;  %p2605_p10 = scmp.lt.s32.totalorder %s4093_s29, %s2603_s26 }
 0x24f   : > { %2095 = vrot.lane.b32.xlu1 %v2087_v51, %s2681_s25  ;;  %2075 = vrot.lane.b32.xlu0 %v2071_v41, %s2681_s25  ;;  %v2196_v59 = vstv %s2466_s28  ;;  %v2151_v51 = vmul.f32 %v3769_v7, %v2150_v6  ;;  %v2152_v41 = vmul.f32 %v3783_v42, %v2150_v6  ;;  %s2604_s28 = scalar_lea.vmem %s2603_s26, 512 }
 0x250   : > { %v2178_v14 = vrot.slane %v2172_v45, 4  ;;  %v2115_v57 = vsel %vm262_vm4, %v2112_v34, %v2114_v20  ;;  %p2606_p1 = scmp.lt.s32.totalorder %s2604_s28, %s2598_s3 }
 0x251   : > { %v1600_v22 = vpop.permute.xlu1 %1599  ;;  %v1621_v63 = vpop.permute.xlu0 %1620  ;;  %v2157_v2 = vrot.slane %v2151_v51, 4  ;;  %v2158_v58 = vrot.slane %v2152_v41, 4 }
 0x252   : > { %v1606_v46 = vadd.f32 %v1600_v22, %v1560_v32  ;;  %v1626_v28 = vadd.f32 %v1621_v63, %v1580_v52  ;;  %v2113_v52 = vsel %vm262_vm4, %v2111_v35, %v2112_v34  ;;  %v2180_v13 = vsel %vm299_vm5, %v2178_v14, %v2179_v43  ;;  %p2607_p4 = por %p2606_p1, %p2605_p10 }
 0x253   : > { %2077 = vrot.lane.b32.xlu1 %v2072_v19, %s2681_s25  ;;  %2137 = vrot.lane.b32.xlu0 %v2134_v44, %s2681_s25  ;;  %v2153_v19 = vmul.f32 %v3776_v11, %v2150_v6  ;;  %v2197_v22 = vmul.f32 %v3769_v7, %v2196_v59  ;;  %v2199_v7 = vmul.f32 %v3776_v11, %v2196_v59 }
 0x254   : > { %p2608_p11 = pnand %p2607_p4, %p2601_p9 }
 0x255   : > { %v1623_v33 = vpop.permute.xlu1 %1622  ;;  %v1635_v27 = vpop.permute.xlu0 %1634  ;;  %v2160_v44 = vrot.slane %v2153_v19, 4  ;;  %v2206_v15 = vrot.slane %v2199_v7, 6  ;;  %v3860_v7 = vld [vmem:[#allocation2] sm:$0xff] }
 0x256   : > { %v1627_v32 = vadd.f32 %v1623_v33, %v1581_v4  ;;  %v1640_v47 = vadd.f32 %v1635_v27, %v1626_v28  ;;  %v2159_v27 = vsel %vm299_vm5, %v2157_v2, %v2158_v58 }
 0x257   : > { %2139 = vrot.lane.b32.xlu1 %v2136_v8, %s2681_s25  ;;  %2141 = vrot.lane.b32.xlu0 %v2135_v29, %s2681_s25  ;;  %v2203_v29 = vrot.slane %v2197_v22, 6 }
 0x259   : > { %v1637_v23 = vpop.permute.xlu1 %1636  ;;  %v1651_v53 = vpop.permute.xlu0 %1650 }
 0x25a   : > { %v1641_v31 = vadd.f32 %v1637_v23, %v1627_v32  ;;  %v1659_v4 = vadd.f32 %v1651_v53, %v1604_v40  ;;  %v2198_v40 = vmul.f32 %v3783_v42, %v2196_v59 }
 0x25b   : > { %2116 = vrot.lane.b32.xlu1 %v2113_v52, %s2681_s25  ;;  %2118 = vrot.lane.b32.xlu0 %v2115_v57, %s2681_s25 }
 0x25c   : > { %v2204_v45 = vrot.slane %v2198_v40, 6 }
 0x25d   : > { %v1653_v60 = vpop.permute.xlu1 %1652  ;;  %v1655_v55 = vpop.permute.xlu0 %1654 }
 0x25e   : > { %v1660_v63 = vadd.f32 %v1653_v60, %v1605_v1  ;;  %v1661_v5 = vadd.f32 %v1655_v55, %v1606_v46  ;;  %v2161_v46 = vsel %vm299_vm5, %v2158_v58, %v2160_v44  ;;  %v2205_v20 = vsel %vm336_vm6, %v2203_v29, %v2204_v45 }
 0x25f   : > { %2183 = vrot.lane.b32.xlu1 %v2180_v13, %s2681_s25  ;;  %2185 = vrot.lane.b32.xlu0 %v2182_v49, %s2681_s25  ;;  %v2207_v6 = vsel %vm336_vm6, %v2204_v45, %v2206_v15  ;;  %v3853_v45 = vld [vmem:[#allocation2 + $0x8] sm:$0xff] }
 0x261   : > { %v1676_v10 = vpop.permute.xlu1 %1675  ;;  %v1678_v28 = vpop.permute.xlu0 %1677 }
 0x262   : > { %v1681_v54 = vadd.f32 %v1676_v10, %v1640_v47  ;;  %v1682_v33 = vadd.f32 %v1678_v28, %v1641_v31  ;;  %v255_v28 = vstv %s2371_s4 }
 0x263   : > { %2187 = vrot.lane.b32.xlu1 %v2181_v37, %s2681_s25  ;;  %2162 = vrot.lane.b32.xlu0 %v2159_v27, %s2681_s25 }
 0x265   : > { %v1697_v42 = vpop.permute.xlu1 %1696  ;;  %v1699_v1 = vpop.permute.xlu0 %1698 }
 0x266   : > { %v1705_v35 = vadd.f32 %v1697_v42, %v1659_v4  ;;  %v1706_v34 = vadd.f32 %v1699_v1, %v1660_v63  ;;  %v256_v42 = vmul.f32 %v3860_v7, %v255_v28  ;;  %v2552_v1 = vld [vmem:[#allocation2 + $0x10] sm:$0x3f] }
 0x267   : > { %2164 = vrot.lane.b32.xlu1 %v2161_v46, %s2681_s25  ;;  %2208 = vrot.lane.b32.xlu0 %v2205_v20, %s2681_s25  ;;  %v258_v46 = vmul.f32 %v2552_v1, %v255_v28 }
 0x269   : > { %v1701_v32 = vpop.permute.xlu1 %1700  ;;  %v1722_v47 = vpop.permute.xlu0 %1721 }
 0x26a   : > { %v1707_v11 = vadd.f32 %v1701_v32, %v1661_v5  ;;  %v1727_v8 = vadd.f32 %v1722_v47, %v1681_v54  ;;  %v257_v54 = vmul.f32 %v3853_v45, %v255_v28  ;;  %v292_v47 = vstv %s2373_s5 }
 0x26b   : > { %2210 = vrot.lane.b32.xlu1 %v2207_v6, %s2681_s25  ;;  %s3851_s25 = sld [smem:[#allocation8]]  ;;  %v266_v6 = vrot.slane %v258_v46, 2 }
 0x26c   : > { %v264_v20 = vrot.slane %v257_v54, 2 }
 0x26d   : > { %v1724_v14 = vpop.permute.xlu1 %1723  ;;  %v1743_v43 = vpop.permute.xlu0 %1742 }
 0x26e   : > { %v1728_v23 = vadd.f32 %v1724_v14, %v1682_v33  ;;  %v1751_v53 = vadd.f32 %v1743_v43, %v1705_v35  ;;  %v273_v14 = vstv %s2372_s30 }
 0x26f   : > { %v3869_v43 = vmul.f32 %v2552_v1, %v273_v14 }
 0x271   : > { %v1745_v52 = vpop.permute.xlu1 %1744  ;;  %v1747_v57 = vpop.permute.xlu0 %1746  ;;  %v241_v32 = vstv %s3851_s25 }
 0x272   : > { %v1752_v37 = vadd.f32 %v1745_v52, %v1706_v34  ;;  %v1753_v59 = vadd.f32 %v1747_v57, %v1707_v11  ;;  %v263_v11 = vrot.slane %v256_v42, 2  ;;  %v293_v57 = vmul.f32 %v3860_v7, %v292_v47 }
 0x274   : > { %v265_v52 = vsel %vm262_vm4, %v263_v11, %v264_v20 }
 0x275   : > { %v1768_v31 = vpop.permute.xlu1 %1767  ;;  %v1770_v4 = vpop.permute.xlu0 %1769 }
 0x276   : > { %v1773_v51 = vadd.f32 %v1768_v31, %v1727_v8  ;;  %v1774_v41 = vadd.f32 %v1770_v4, %v1728_v23  ;;  %v294_v8 = vmul.f32 %v3853_v45, %v292_v47  ;;  %v329_v31 = vstv %s2375_s6 }
 0x277   : > { %v332_v28 = vmul.f32 %v2552_v1, %v329_v31 }
 0x278   : > { %v301_v4 = vrot.slane %v294_v8, 4 }
 0x279   : > { %v1782_v13 = vpop.permute.xlu1 %1781  ;;  %v1784_v60 = vpop.permute.xlu0 %1783  ;;  %v340_v8 = vrot.slane %v332_v28, 6 }
 0x27a   : > { %v1787_v55 = vadd.f32 %v1782_v13, %v1773_v51  ;;  %v1788_v49 = vadd.f32 %v1784_v60, %v1774_v41  ;;  %v331_v51 = vmul.f32 %v3853_v45, %v329_v31  ;;  %v267_v41 = vsel %vm262_vm4, %v264_v20, %v266_v6 }
 0x27b   : > { %v247_v13 = vstv %s2370_s8 }
 0x27c   : > { %v250_v54 = vmul.f32 %v2552_v1, %v247_v13  ;;  %v338_v46 = vrot.slane %v331_v51, 6 }
 0x27d   : > { %v1823_v19 = vpop.permute.xlu1 %1822  ;;  %v1825_v22 = vpop.permute.xlu0 %1824 }
 0x27e   : > { %v1828_v40 = vadd.f32 %v1823_v19, %v1787_v55  ;;  %v1829_v63 = vadd.f32 %v1825_v22, %v1788_v49  ;;  %v243_v55 = vmul.f32 %v3853_v45, %v241_v32  ;;  %v310_v49 = vstv %s2374_s24 }
 0x27f   : > { %v283_v19 = vrot.slane %v3869_v43, 2 }
 0x281   : > { %v1798_v5 = vpop.permute.xlu1 %1797  ;;  %v1800_v2 = vpop.permute.xlu0 %1799  ;;  %v290_v20 = vadd.f32 %v283_v19, %v250_v54 }
 0x282   : > { %v3847_v58 = vadd.f32 %v1798_v5, %v1751_v53  ;;  %v3849_v10 = vadd.f32 %v1800_v2, %v1752_v37  ;;  %v295_v37 = vmul.f32 %v2552_v1, %v292_v47  ;;  %v330_v5 = vmul.f32 %v3860_v7, %v329_v31 }
 0x284   : > { %v303_v2 = vrot.slane %v295_v37, 4  ;;  %v337_v11 = vrot.slane %v330_v5, 6 }
 0x285   : > { %v1802_v44 = vpop.permute.xlu1 %1801  ;;  %v1869_v29 = vpop.permute.xlu0 %1868 }
 0x286   : > { %v3856_v33 = vadd.f32 %v1802_v44, %v1753_v59  ;;  %v3858_v27 = vadd.f32 %v1869_v29, %v1828_v40  ;;  %v242_v59 = vmul.f32 %v3860_v7, %v241_v32  ;;  %v271_v44 = vadd.f32 %v267_v41, %v243_v55 }
 0x287   : > { %v313_v29 = vmul.f32 %v2552_v1, %v310_v49  ;;  %v304_v6 = vsel %vm299_vm5, %v301_v4, %v303_v2  ;;  %v339_v37 = vsel %vm336_vm6, %v337_v11, %v338_v46  ;;  %v312_v2 = vmul.f32 %v3853_v45, %v310_v49 }
 0x288   : > { %v270_v60 = vadd.f32 %v265_v52, %v242_v59  ;;  %v308_v43 = vadd.f32 %v304_v6, %v271_v44  ;;  %v275_v52 = vmul.f32 %v3853_v45, %v273_v14  ;;  %v274_v59 = vmul.f32 %v3860_v7, %v273_v14 }
 0x289   : > { %v1871_v35 = vpop.permute.xlu1 %1870  ;;  %v3863_v34 = vpop.permute.xlu0 %1843 }
 0x28a   : > { %v3865_v15 = vadd.f32 %v1871_v35, %v1829_v63  ;;  %v300_v63 = vrot.slane %v293_v57, 4  ;;  %v320_v57 = vrot.slane %v313_v29, 4  ;;  %v280_v44 = vrot.slane %v274_v59, 2 }
 0x28c   : > { %v302_v42 = vsel %vm299_vm5, %v300_v63, %v301_v4  ;;  %v327_v31 = vadd.f32 %v320_v57, %v290_v20  ;;  %v281_v4 = vrot.slane %v275_v52, 2  ;;  %v248_v20 = vmul.f32 %v3860_v7, %v247_v13 }
 0x28d   : > { %v3871_v23 = vpop.permute.xlu1 %1845  ;;  %v3873_v53 = vpop.permute.xlu0 %1847  ;;  %v307_v35 = vadd.f32 %v302_v42, %v270_v60  ;;  %v341_v60 = vsel %vm336_vm6, %v338_v46, %v340_v8 }
 0x28e   : > { %v345_v63 = vadd.f32 %v341_v60, %v308_v43  ;;  %v379_v5 = vadd.f32 %v3114_v17, %v327_v31  ;;  %v282_v46 = vsel %vm262_vm4, %v280_v44, %v281_v4  ;;  %v284_v11 = vsel %vm262_vm4, %v281_v4, %v283_v19  ;;  %v4244_v44 = vld [vmem:[#allocation31_spill] sm:$0xff] }
 0x28f   : > { %v344_v1 = vadd.f32 %v339_v37, %v307_v35 }
 0x290   : > { %v359_v28 = vadd.f32 %v3101_v0, %v345_v63  ;;  %v425_v14 = vadd.f32 %v3205_v21, %v379_v5  ;;  %v318_v0 = vrot.slane %v312_v2, 4  ;;  %v249_v21 = vmul.f32 %v3853_v45, %v247_v13  ;;  %v4242_v2 = vld [vmem:[#allocation35_spill] sm:$0xff] }
 0x291   : > { %v3882_v22 = vpop.permute.xlu1 %1914  ;;  %v3884_v40 = vpop.permute.xlu0 %1916  ;;  %v358_v55 = vadd.f32 %v3093_v56, %v344_v1  ;;  %v311_v56 = vmul.f32 %v3860_v7, %v310_v49 }
 0x292   : > { %v400_v35 = vadd.f32 %v3233_v12, %v359_v28  ;;  %v288_v12 = vadd.f32 %v282_v46, %v248_v20  ;;  %v321_v13 = vsel %vm299_vm5, %v318_v0, %v320_v57  ;;  %v4241_v57 = vld [vmem:[#allocation30_spill] sm:$0xff]  ;;  %v4243_v28 = vld [vmem:[#allocation36_spill] sm:$0xff]  ;;  %v4247_v46 = vld [vmem:[#allocation39_spill] sm:$0xff] }
 0x293   : > { %v399_v29 = vadd.f32 %v3241_v18, %v358_v55  ;;  %v471_v18 = vadd.f32 %v3199_v61, %v425_v14  ;;  %v317_v52 = vrot.slane %v311_v56, 4  ;;  %v4245_v14 = vld [vmem:[#allocation25_spill] sm:$0xff]  ;;  %v4248_v56 = vld [vmem:[#allocation40_spill] sm:$0xff] }
 0x294   : > { %v446_v8 = vadd.f32 %v3261_v48, %v400_v35 }
 0x295   : > { %v3888_v32 = vpop.permute.xlu1 %1889  ;;  %v3890_v47 = vpop.permute.xlu0 %1891  ;;  %v445_v17 = vadd.f32 %v3254_v9, %v399_v29  ;;  %v289_v9 = vadd.f32 %v284_v11, %v249_v21  ;;  %v319_v37 = vsel %vm299_vm5, %v317_v52, %v318_v0  ;;  %v526_v19 = vadd.f32 %v3146_v38, %v471_v18  ;;  %v4246_v29 = vld [vmem:[#allocation32_spill] sm:$0xff]  ;;  %v4250_v11 = vld [vmem:[#allocation19_spill] sm:$0xff]  ;;  %v4251_v18 = vld [vmem:[#allocation14_spill] sm:$0xff] }
 0x296   : > { %v492_v7 = vadd.f32 %v3274_v62, %v446_v8  ;;  %v4253_v52 = vld [vmem:[#allocation15_spill] sm:$0xff] }
 0x297   : > { %v491_v6 = vadd.f32 %v3282_v25, %v445_v17  ;;  %v325_v25 = vadd.f32 %v319_v37, %v288_v12  ;;  %v326_v1 = vadd.f32 %v321_v13, %v289_v9  ;;  %v572_v60 = vadd.f32 %v3207_v39, %v526_v19  ;;  %v4254_v19 = vld [vmem:[#allocation33_spill] sm:$0xff] }
 0x298   : > { %v506_v59 = vadd.f32 %v3128_v26, %v492_v7 }
 0x299   : > { %v3896_v51 = vpop.permute.xlu1 %1893  ;;  %v3898_v41 = vpop.permute.xlu0 %1928  ;;  %v505_v45 = vadd.f32 %v3126_v24, %v491_v6  ;;  %v377_v31 = vadd.f32 %v3103_v3, %v325_v25  ;;  %v378_v62 = vadd.f32 %v3112_v16, %v326_v1  ;;  %v618_v39 = vadd.f32 %v4245_v14, %v572_v60  ;;  %v4252_v6 = vld [vmem:[#allocation16_spill] sm:$0xff]  ;;  %v4255_v25 = vld [vmem:[#allocation34_spill] sm:$0xff]  ;;  %v4258_v60 = vld [vmem:[#allocation27_spill] sm:$0xff] }
 0x29a   : > { %v547_v24 = vadd.f32 %v3294_v50, %v506_v59  ;;  %v4256_v1 = vld [vmem:[#allocation42_spill] sm:$0xff] }
 0x29b   : > { %v546_v38 = vadd.f32 %v3284_v30, %v505_v45  ;;  %v423_v4 = vadd.f32 %v3252_v36, %v377_v31  ;;  %v424_v5 = vadd.f32 %v4241_v57, %v378_v62  ;;  %v4249_v36 = vld [vmem:[#allocation13_spill] sm:$0xff]  ;;  %v673_v21 = vadd.f32 %v4250_v11, %v618_v39  ;;  %v4257_v31 = vld [vmem:[#allocation38_spill] sm:$0xff] }
 0x29c   : > { %v593_v26 = vadd.f32 %v4242_v2, %v547_v24  ;;  %v4259_v24 = vld [vmem:[#allocation37_spill] sm:$0xff]  ;;  %v4263_v14 = vld [vmem:[#allocation50_spill] sm:$0xff] }
 0x29d   : > { %v3907_v54 = vpop.permute.xlu1 %1930  ;;  %v3909_v42 = vpop.permute.xlu0 %1944  ;;  %v592_v3 = vadd.f32 %v4243_v28, %v546_v38  ;;  %v469_v16 = vadd.f32 %v4244_v44, %v423_v4  ;;  %v470_v30 = vadd.f32 %v4246_v29, %v424_v5  ;;  %v719_v38 = vadd.f32 %v4258_v60, %v673_v21  ;;  %v4260_v57 = vld [vmem:[#allocation41_spill] sm:$0xff]  ;;  %v4262_v44 = vld [vmem:[#allocation46_spill] sm:$0xff] }
 0x29e   : > { %v639_v35 = vadd.f32 %v4248_v56, %v593_v26  ;;  %v4261_v2 = vld [vmem:[#allocation45_spill] sm:$0xff]  ;;  %v4266_v56 = vld [vmem:[#allocation18_spill] sm:$0xff] }
 0x29f   : > { %v638_v50 = vadd.f32 %v4247_v46, %v592_v3  ;;  %v524_v0 = vadd.f32 %v4249_v36, %v469_v16  ;;  %v525_v8 = vadd.f32 %v4251_v18, %v470_v30  ;;  %v4264_v29 = vld [vmem:[#allocation17_spill] sm:$0xff]  ;;  %v4265_v46 = vld [vmem:[#allocation26_spill] sm:$0xff]  ;;  %v4268_v18 = vld [vmem:[#allocation44_spill] sm:$0xff] }
 0x2a0   : > { %v653_v12 = vadd.f32 %v4252_v6, %v639_v35  ;;  %v4267_v36 = vld [vmem:[#allocation49_spill] sm:$0xff]  ;;  %v4269_v6 = vld [vmem:[#allocation43_spill] sm:$0xff] }
 0x2a1   : > { %v3921_v43 = vpop.permute.xlu1 %1946  ;;  %v3923_v49 = vpop.permute.xlu0 %1948  ;;  %v652_v9 = vadd.f32 %v4253_v52, %v638_v50  ;;  %v570_v45 = vadd.f32 %v4254_v19, %v524_v0  ;;  %v571_v13 = vadd.f32 %v4255_v25, %v525_v8  ;;  %v765_v50 = vadd.f32 %v4265_v46, %v719_v38  ;;  %v4270_v52 = vld [vmem:[#allocation20_spill] sm:$0xff]  ;;  %v4271_v19 = vld [vmem:[#allocation47_spill] sm:$0xff] }
 0x2a2   : > { %v694_v5 = vadd.f32 %v4260_v57, %v653_v12  ;;  %v4272_v25 = vld [vmem:[#allocation24_spill] sm:$0xff] }
 0x2a3   : > { %v693_v59 = vadd.f32 %v4256_v1, %v652_v9  ;;  %v616_v62 = vadd.f32 %v4257_v31, %v570_v45  ;;  %v617_v4 = vadd.f32 %v4259_v24, %v571_v13  ;;  %v820_v13 = vadd.f32 %v4272_v25, %v765_v50  ;;  %v4273_v1 = vld [vmem:[#allocation48_spill] sm:$0xff]  ;;  %v4274_v31 = vld [vmem:[#allocation21_spill] sm:$0xff]  ;;  %v4275_v24 = vld [vmem:[#allocation51_spill] sm:$0xff] }
 0x2a4   : > { %v740_v16 = vadd.f32 %v4262_v44, %v694_v5  ;;  %v4276_v57 = vld [vmem:[#allocation52_spill] sm:$0xff]  ;;  %v1852_v25 = vadd.f32 %v3863_v34, %v3847_v58 }
 0x2a5   : > { %v3929_v61 = vpop.permute.xlu1 %1969  ;;  %v3931_v48 = vpop.permute.xlu0 %1971  ;;  %v739_v26 = vadd.f32 %v4261_v2, %v693_v59  ;;  %v671_v30 = vadd.f32 %v4264_v29, %v616_v62  ;;  %v672_v35 = vadd.f32 %v4266_v56, %v617_v4  ;;  %v4277_v2 = vld [vmem:[#allocation22_spill] sm:$0xff]  ;;  %v4278_v44 = vld [vmem:[#allocation28_spill] sm:$0xff]  ;;  %v4280_v29 = vld [vmem:[#allocation55_spill] sm:$0xff] }
 0x2a6   : > { %v786_v0 = vadd.f32 %v4267_v36, %v740_v16  ;;  %v866_v16 = vadd.f32 %v4278_v44, %v820_v13  ;;  %v4281_v46 = vld [vmem:[#allocation56_spill] sm:$0xff]  ;;  %v4282_v36 = vld [vmem:[#allocation53_spill] sm:$0xff]  ;;  %v1853_v13 = vadd.f32 %v3871_v23, %v3849_v10  ;;  %v4291_v44 = vld [vmem:[#allocation63_spill] sm:$0xff] }
 0x2a7   : > { %v785_v39 = vadd.f32 %v4263_v14, %v739_v26  ;;  %v717_v8 = vadd.f32 %v4268_v18, %v671_v30  ;;  %v718_v12 = vadd.f32 %v4269_v6, %v672_v35  ;;  %v4279_v14 = vld [vmem:[#allocation23_spill] sm:$0xff]  ;;  %v4283_v18 = vld [vmem:[#allocation54_spill] sm:$0xff]  ;;  %v4292_v34 = vld [vmem:[#allocation64_spill] sm:$0xff] }
 0x2a8   : > { %v800_v62 = vadd.f32 %v4274_v31, %v786_v0  ;;  %v4284_v6 = vld [vmem:[#allocation59_spill] sm:$0xff]  ;;  %v4288_v31 = vld [vmem:[#allocation57_spill] sm:$0xff]  ;;  %v1899_v58 = vadd.f32 %v3890_v47, %v1853_v13  ;;  %v4298_v47 = vld [vmem:[#allocation70_spill] sm:$0xff] }
 0x2a9   : > { %v3940_v55 = vpop.permute.xlu1 %1990  ;;  %v3942_v63 = vpop.permute.xlu0 %1992  ;;  %v799_v9 = vadd.f32 %v4270_v52, %v785_v39  ;;  %v763_v45 = vadd.f32 %v4271_v19, %v717_v8  ;;  %v764_v59 = vadd.f32 %v4273_v1, %v718_v12  ;;  %v4285_v52 = vld [vmem:[#allocation60_spill] sm:$0xff]  ;;  %v4286_v19 = vld [vmem:[#allocation58_spill] sm:$0xff]  ;;  %v4287_v1 = vld [vmem:[#allocation29_spill] sm:$0xff] }
 0x2aa   : > { %v841_v5 = vadd.f32 %v4276_v57, %v800_v62  ;;  %v4290_v57 = vld [vmem:[#allocation62_spill] sm:$0xff]  ;;  %v4293_v10 = vld [vmem:[#allocation65_spill] sm:$0xff] }
 0x2ab   : > { %v840_v4 = vadd.f32 %v4275_v24, %v799_v9  ;;  %v818_v26 = vadd.f32 %v4277_v2, %v763_v45  ;;  %v819_v39 = vadd.f32 %v4279_v14, %v764_v59  ;;  %v912_v59 = vadd.f32 %v4287_v1, %v866_v16  ;;  %v4289_v24 = vld [vmem:[#allocation61_spill] sm:$0xff]  ;;  %v4294_v16 = vld [vmem:[#allocation66_spill] sm:$0xff] }
 0x2ac   : > { %v887_v30 = vadd.f32 %v4280_v29, %v841_v5 }
 0x2ad   : > { %v3953_v17 = vpop.permute.xlu1 %1994  ;;  %v3955_v20 = vpop.permute.xlu0 %2015  ;;  %v886_v50 = vadd.f32 %v4281_v46, %v840_v4  ;;  %v864_v0 = vadd.f32 %v4282_v36, %v818_v26  ;;  %v865_v8 = vadd.f32 %v4283_v18, %v819_v39  ;;  %v1898_v39 = vadd.f32 %v3888_v32, %v1852_v25  ;;  %v4295_v46 = vld [vmem:[#allocation67_spill] sm:$0xff]  ;;  %v4296_v36 = vld [vmem:[#allocation68_spill] sm:$0xff]  ;;  %v4297_v32 = vld [vmem:[#allocation69_spill] sm:$0xff] }
 0x2ae   : > { %v933_v9 = vadd.f32 %v4285_v52, %v887_v30  ;;  %v967_v23 = vadd.f32 %v4293_v10, %v912_v59  ;;  %v1854_v18 = vadd.f32 %v3873_v53, %v3856_v33  ;;  %v1920_v59 = vadd.f32 %v3882_v22, %v3858_v27 }
 0x2af   : > { %v932_v12 = vadd.f32 %v4284_v6, %v886_v50  ;;  %v910_v45 = vadd.f32 %v4286_v19, %v864_v0  ;;  %v911_v62 = vadd.f32 %v4288_v31, %v865_v8  ;;  %v1953_v8 = vadd.f32 %v3909_v42, %v1898_v39  ;;  %v4301_v42 = vld [vmem:[#allocation73_spill] sm:$0xff] }
 0x2b0   : > { %v947_v5 = vadd.f32 %v4290_v57, %v933_v9  ;;  %v1954_v6 = vadd.f32 %v3921_v43, %v1899_v58  ;;  %v1013_v52 = vadd.f32 %v4298_v47, %v967_v23  ;;  %v4299_v9 = vld [vmem:[#allocation71_spill] sm:$0xff]  ;;  %v1900_v31 = vadd.f32 %v3896_v51, %v1854_v18  ;;  %v4305_v51 = vld [vmem:[#allocation77_spill] sm:$0xff]  ;;  %v4306_v58 = vld [vmem:[#allocation80_spill] sm:$0xff] }
 0x2b1   : > { %v3962_v7 = vpop.permute.xlu1 %2017  ;;  %v3964_v37 = vpop.permute.xlu0 %2036  ;;  %v946_v4 = vadd.f32 %v4289_v24, %v932_v12  ;;  %v965_v14 = vadd.f32 %v4291_v44, %v910_v45  ;;  %v966_v29 = vadd.f32 %v4292_v34, %v911_v62  ;;  %v4300_v45 = vld [vmem:[#allocation72_spill] sm:$0xff]  ;;  %v1999_v33 = vadd.f32 %v3940_v55, %v1953_v8  ;;  %v4302_v62 = vld [vmem:[#allocation74_spill] sm:$0xff]  ;;  %v4307_v34 = vld [vmem:[#allocation81_spill] sm:$0xff] }
 0x2b2   : > { %v988_v50 = vadd.f32 %v4295_v46, %v947_v5  ;;  %v2000_v53 = vadd.f32 %v3942_v63, %v1954_v6  ;;  %v4304_v5 = vld [vmem:[#allocation76_spill] sm:$0xff]  ;;  %v1955_v39 = vadd.f32 %v3923_v49, %v1900_v31  ;;  %v1921_v10 = vadd.f32 %v3884_v40, %v3865_v15  ;;  %v4308_v46 = vld [vmem:[#allocation78_spill] sm:$0xff]  ;;  %v4316_v31 = vld [vmem:[#allocation87_spill] sm:$0xff] }
 0x2b3   : > { %v987_v30 = vadd.f32 %v4294_v16, %v946_v4  ;;  %v1011_v0 = vadd.f32 %v4296_v36, %v965_v14  ;;  %v1012_v12 = vadd.f32 %v4297_v32, %v966_v29  ;;  %v4303_v4 = vld [vmem:[#allocation75_spill] sm:$0xff]  ;;  %v1934_v14 = vadd.f32 %v3898_v41, %v1920_v59  ;;  %v4312_v47 = vld [vmem:[#allocation90_spill] sm:$0xff] }
 0x2b4   : > { %v1034_v25 = vadd.f32 %v4300_v45, %v988_v50  ;;  %v1059_v57 = vadd.f32 %v4303_v4, %v1013_v52  ;;  %v2045_v27 = vadd.f32 %v3964_v37, %v1999_v33  ;;  %v2001_v49 = vadd.f32 %v3953_v17, %v1955_v39  ;;  %v4309_v50 = vld [vmem:[#allocation85_spill] sm:$0xff]  ;;  %v4314_v59 = vld [vmem:[#allocation79_spill] sm:$0xff] }
 0x2b5   : > { %v3974_v28 = vpop.permute.xlu1 %2038  ;;  %v3976_v3 = vpop.permute.xlu0 %2040  ;;  %v1033_v19 = vadd.f32 %v4299_v9, %v987_v30  ;;  %v1057_v43 = vadd.f32 %v4301_v42, %v1011_v0  ;;  %v1058_v24 = vadd.f32 %v4302_v62, %v1012_v12  ;;  %v1975_v41 = vadd.f32 %v3929_v61, %v1934_v14  ;;  %v4310_v0 = vld [vmem:[#allocation86_spill] sm:$0xff] }
 0x2b6   : > { %v2046_v22 = vadd.f32 %v3974_v28, %v2000_v53  ;;  %v1080_v55 = vadd.f32 %v4305_v51, %v1034_v25  ;;  %v1935_v8 = vadd.f32 %v3907_v54, %v1921_v10  ;;  %v2047_v15 = vadd.f32 %v3976_v3, %v2001_v49  ;;  %v4311_v12 = vld [vmem:[#allocation82_spill] sm:$0xff] }
 0x2b7   : > { %v1079_v44 = vadd.f32 %v4304_v5, %v1033_v19  ;;  %v1112_v63 = vadd.f32 %v4306_v58, %v1057_v43  ;;  %v1113_v29 = vadd.f32 %v4307_v34, %v1058_v24  ;;  %v2021_v6 = vadd.f32 %v3955_v20, %v1975_v41  ;;  %v4317_v24 = vld [vmem:[#allocation88_spill] sm:$0xff] }
 0x2b8   : > { %v1114_v61 = vadd.f32 %v4311_v12, %v1059_v57  ;;  %v1976_v52 = vadd.f32 %v3931_v48, %v1935_v8  ;;  %v1094_v3 = vadd.f32 %v4314_v59, %v1080_v55 }
 0x2b9   : > { %v3984_v11 = vpop.permute.xlu1 %2061  ;;  %v3986_v21 = vpop.permute.xlu0 %2063  ;;  %v1093_v28 = vadd.f32 %v4308_v46, %v1079_v44  ;;  %v1158_v36 = vadd.f32 %v4309_v50, %v1112_v63  ;;  %v1159_v18 = vadd.f32 %v4310_v0, %v1113_v29  ;;  %v4322_v50 = vld [vmem:[#allocation94_spill] sm:$0xff] }
 0x2ba   : > { %v2067_v45 = vadd.f32 %v3984_v11, %v2021_v6  ;;  %v1160_v33 = vadd.f32 %v4316_v31, %v1114_v61  ;;  %v2022_v53 = vadd.f32 %v3962_v7, %v1976_v52  ;;  %v4319_v7 = vld [vmem:[#allocation84_spill] sm:$0xff] }
 0x2bb   : > { %v1204_v17 = vadd.f32 %v4312_v47, %v1158_v36  ;;  %v1135_v55 = vadd.f32 %v4319_v7, %v1094_v3 }
 0x2bc   : > { %v2068_v39 = vadd.f32 %v3986_v21, %v2022_v53 }
 0x2bd   : > { %v2092_v60 = vpop.permute.xlu1 %2091  ;;  %v2094_v38 = vpop.permute.xlu0 %2093  ;;  %v2220_v11 = vrot.slane %v1204_v17, 1 }
 0x2be   : > { %v2100_v30 = vadd.f32 %v2092_v60, %v2045_v27  ;;  %v2101_v37 = vadd.f32 %v2094_v38, %v2046_v22  ;;  %v4313_v60 = vld [vmem:[#allocation91_spill] sm:$0xff] }
 0x2bf   : > { %v1205_v38 = vadd.f32 %v4313_v60, %v1159_v18 }
 0x2c1   : > { %v4002_v56 = vpop.permute.xlu1 %2095  ;;  %v4004_v35 = vpop.permute.xlu0 %2075  ;;  %v2221_v57 = vrot.slane %v1205_v38, 1 }
 0x2c2   : > { %v2102_v54 = vadd.f32 %v4002_v56, %v2047_v15  ;;  %v2081_v42 = vadd.f32 %v4004_v35, %v2067_v45  ;;  %v4318_v56 = vld [vmem:[#allocation92_spill] sm:$0xff]  ;;  %v4320_v35 = vld [vmem:[#allocation93_spill] sm:$0xff] }
 0x2c3   : > { %v1206_v5 = vadd.f32 %v4318_v56, %v1160_v33  ;;  %v2222_v10 = vsel %vm2219_vm7, %v2220_v11, %v2221_v57 }
 0x2c5   : > { %v4019_v2 = vpop.permute.xlu1 %2077  ;;  %v2138_v26 = vpop.permute.xlu0 %2137  ;;  %v2223_v29 = vrot.slane %v1206_v5, 1 }
 0x2c6   : > { %v2146_v40 = vadd.f32 %v2138_v26, %v2100_v30  ;;  %v4315_v26 = vld [vmem:[#allocation83_spill] sm:$0xff]  ;;  %v2082_v58 = vadd.f32 %v4019_v2, %v2068_v39  ;;  %v4321_v30 = vld [vmem:[#allocation89_spill] sm:$0xff] }
 0x2c7   : > { %v2224_v2 = vsel %vm2219_vm7, %v2221_v57, %v2223_v29 }
 0x2c9   : > { %v2140_v13 = vpop.permute.xlu1 %2139  ;;  %v2142_v1 = vpop.permute.xlu0 %2141 }
 0x2ca   : > { %v2147_v32 = vadd.f32 %v2140_v13, %v2101_v37  ;;  %v1134_v13 = vadd.f32 %v4315_v26, %v1093_v28  ;;  %v2148_v43 = vadd.f32 %v2142_v1, %v2102_v54  ;;  %v1181_v37 = vadd.f32 %v4321_v30, %v1135_v55 }
 0x2cc   : > { %v1180_v4 = vadd.f32 %v4317_v24, %v1134_v13  ;;  %v1227_v36 = vadd.f32 %v4322_v50, %v1181_v37 }
 0x2cd   : > { %v2117_v23 = vpop.permute.xlu1 %2116  ;;  %v2119_v16 = vpop.permute.xlu0 %2118 }
 0x2ce   : > { %v2122_v27 = vadd.f32 %v2117_v23, %v2081_v42  ;;  %v1226_v1 = vadd.f32 %v4320_v35, %v1180_v4  ;;  %v2123_v21 = vadd.f32 %v2119_v16, %v2082_v58 }
 0x2d0   : > { %v2227_v28 = vadd.f32 %v2222_v10, %v1226_v1 }
 0x2d1   : > { %v2184_v9 = vpop.permute.xlu1 %2183  ;;  %v2186_v19 = vpop.permute.xlu0 %2185 }
 0x2d2   : > { %v2192_v25 = vadd.f32 %v2184_v9, %v2146_v40  ;;  %v2193_v20 = vadd.f32 %v2186_v19, %v2147_v32  ;;  %v2228_v40 = vadd.f32 %v2224_v2, %v1227_v36 }
 0x2d4   : > { %v2232_v48 = vrot.slane %v2192_v25, 1  ;;  %v2233_v62 = vrot.slane %v2193_v20, 1 }
 0x2d5   : > { %v2188_v44 = vpop.permute.xlu1 %2187  ;;  %v2163_v14 = vpop.permute.xlu0 %2162 }
 0x2d6   : > { %v2194_v22 = vadd.f32 %v2188_v44, %v2148_v43  ;;  %v2234_v51 = vsel %vm2219_vm7, %v2232_v48, %v2233_v62  ;;  %v2168_v34 = vadd.f32 %v2163_v14, %v2122_v27 }
 0x2d8   : > { %v2235_v63 = vrot.slane %v2194_v22, 1 }
 0x2d9   : > { %v2165_v41 = vpop.permute.xlu1 %2164  ;;  %v2209_v49 = vpop.permute.xlu0 %2208 }
 0x2da   : > { %v2214_v23 = vadd.f32 %v2209_v49, %v2168_v34  ;;  %v2236_v46 = vsel %vm2219_vm7, %v2233_v62, %v2235_v63  ;;  %v2169_v0 = vadd.f32 %v2165_v41, %v2123_v21 }
 0x2dc   : > { %v2239_v18 = vadd.f32 %v2234_v51, %v2214_v23 }
 0x2dd   : > { %v2211_v8 = vpop.permute.xlu1 %2210 }
 0x2de   : > { %v2241_v6 = vadd.f32 %v2239_v18, %v2227_v28  ;;  %v2215_v15 = vadd.f32 %v2211_v8, %v2169_v0 }
 0x2e0   : > { %v2243_v32 = vmul.f32 0.5, %v2241_v6  ;;  %v2240_v12 = vadd.f32 %v2236_v46, %v2215_v15 }
 0x2e2   : > { %2543 = vtanh.f32 %v2243_v32  ;;  %v2242_v16 = vadd.f32 %v2240_v12, %v2228_v40 }
 0x2e4   : > { %v2244_v61 = vmul.f32 0.5, %v2242_v16 }
 0x2e6   : > { %2545 = vtanh.f32 %v2244_v61 }
 0x2ec   : > { %v2544_v47 = vpop.eup %2543 }
 0x2ed   : > { %v2247_v17 = vmul.f32 0.5, %v2544_v47 }
 0x2ef   : > { %v2249_v60 = vadd.f32 0.5, %v2247_v17 }
 0x2f0   : > { %v2546_v38 = vpop.eup %2545 }
 0x2f1   : > { %v2248_v52 = vmul.f32 0.5, %v2546_v38  ;;  %2252 = vst.msk [vmem:[%s175_s19] sm:$0xff] %vm2251_vm8, %v2249_v60 }
 0x2f3   : > { %v2250_v9 = vadd.f32 0.5, %v2248_v52 }
 0x2f5   : > { %2253 = vst.msk [vmem:[%s175_s19 + $0x8] sm:$0xff] %vm2251_vm8, %v2250_v9 }
 0x2f6   : > { %2611 = shalt.err (!%p2608_p11)
}
 0x2f7   : > { %s2612_s4 = scalar_lea.hbm %s4091_s17, 256  ;;  %s2616_s30 = scalar_lea.hbm %s4139_s2, 512 }
 0x2f8   : > { %p2613_p0 = scmp.ne.s32.totalorder %s4091_s17, %s2612_s4  ;;  %p2617_p6 = scmp.lt.u32.totalorder %s4091_s17, %s4139_s2 }
 0x2f9   : > { %p2618_p5 = scmp.lt.u32.totalorder %s2616_s30, %s2612_s4  ;;  %p2620_p13 = scmp.lt.u32.totalorder %s2612_s4, %s4091_s17 }
 0x2fa   : > { %p2614_p2 = pnand %p2613_p0, %p4323_p12 }
 0x2fb   : > { %p2619_p3 = por %p2618_p5, %p2617_p6 }
 0x2fc   : > { %p2615_p7 = pneg %p2614_p2 }
 0x2fd   : > { %p2621_p8 = por %p2620_p13, %p2619_p3 }
 0x2ff   : > { %p2622_p9 = pnand %p2621_p8, %p2615_p7 }
 0x301   : > { %2625 = shalt.err (!%p2622_p9)
}
 0x302   : > { %s2683_s24 = smov 128   ;;  %s2684_s20 = smov 8  }
 0x303   : > { %2480 = dma.vmem_to_hbm [thread:$0]  (%p4323_p12), %s4093_s29, 256, %s4091_s17, %s2255_s27, %s2683_s24, %s2683_s24, %s2684_s20  }
 0x304 PF: > { %s2283_s23 = sand.u32 1, %s2656_s9   ;;  %p4324_p10 = scmp.ne.s32.totalorder %s4146_s22, 0 }
 0x305   : > { %p4325_p1 = scmp.ge.s32.totalorder %s2668_s12, 2  ;;  %s2284_s19 = scalar_lea.sflag [#allocation6], %s2283_s23 }
 0x307   : > { %p2491_p4 = pnand %p4325_p1, %p4324_p10 }
 0x309   : > { %2651 = dma.done.wait (!%p2491_p4), %s2284_s19, 256  }
 0x30a   : > { %2653 = vsyncadd (!%p2491_p4), %s2284_s19, 4294967040  ;;  %p16_p11 = scmp.ge.s32.totalorder %s2725_s15, 4   ;;  %s4326_s9 = smov %s2660_s10 }
 0x30b   : > { %s4327_s10 = smov %s2664_s11  ;;  %s4328_s11 = smov %s2737_s18 }
 0x30c   : > { %s4329_s12 = smov %s2725_s15  ;;  %18 = sbr.rel (!%p16_p11) target bundleno = 6 (0x6), region = 81 }
 0x313   :  { %2289 = vsyncpa [#allocation5], 1 }
 0x314   :  { %2291 = vsyncpa [#allocation5 + $0x1], 1 }
 0x315   :  { %2292 = vsyncpa [#allocation6], 1 }
 0x316   :  { %2294 = vsyncpa [#allocation6 + $0x1], 1 }
 0x317   :  { %2295 = vsyncpa [#allocation7], 1 }
 0x318   :  { %2297 = vsyncpa [#allocation7 + $0x1], 1 }

</bundles_post_ra>
